<compile_context>
chip_gen: v7x
topology: tpu7x:2x2x1
jax: 0.10.0
libtpu: 0.0.40
codegen_flags: <defaults>
</compile_context>

<pallas_src>
import math

import jax
import jax.numpy as jnp
import numpy as np
from jax import lax
from jax.experimental import pallas as pl
from jax.experimental.pallas import tpu as pltpu


def _make_kernel(num_subset, inter_c, batch_block, num_nodes):
    S, IC, B, V = num_subset, inter_c, batch_block, num_nodes
    inv_ic = 1.0 / float(IC)

    def kernel(x_ref, wab_ref, bab_ref, wdf_ref, adj_ref, wdn_ref, cbias_ref, o_ref):
        x = x_ref[...]                                           # (C, B*V) lane-dense slab

        # residual "down" branch (1x1 conv + BN folded) + all folded bias constants
        acc = jnp.dot(wdn_ref[...], x,
                      preferred_element_type=jnp.float32) + cbias_ref[...]   # (O, B*V)

        for i in range(S):                                       # subset axis, unrolled
            # fused conv_a / conv_b : one (2*IC, C) @ (C, B*V) matmul
            ab = jnp.dot(wab_ref[i], x,
                         preferred_element_type=jnp.float32) + bab_ref[i]    # (2*IC, B*V)
            a1 = ab[:IC]                                         # (IC, B*V)
            a2 = ab[IC:]
            adj_i = adj_ref[i]                                   # (V, V)

            xz_parts = []
            for b in range(B):                                   # per-sample attention
                lo, hi = b * V, (b + 1) * V
                a1b = a1[:, lo:hi]                               # (IC, V)
                a2b = a2[:, lo:hi]                               # (IC, V)
                # contract over IC (axis 0) without an explicit transpose
                s = lax.dot_general(a1b, a2b, (((0,), (0,)), ((), ())),
                                    preferred_element_type=jnp.float32) * inv_ic
                # softmax over dim -2 (rows of the V x V matrix)
                s = s - jnp.max(s, axis=0, keepdims=True)
                e = jnp.exp(s)
                attn = e / jnp.sum(e, axis=0, keepdims=True) + adj_i          # (V, V)
                xb = x[:, lo:hi]                                 # (C, V)
                xz_parts.append(jnp.dot(xb, attn, preferred_element_type=jnp.float32))
            xz = jnp.concatenate(xz_parts, axis=1)               # (C, B*V)

            # conv_d projection with BatchNorm scale pre-folded into the weights
            acc = acc + jnp.dot(wdf_ref[i], xz, preferred_element_type=jnp.float32)

        o_ref[...] = jnp.maximum(acc, 0.0).astype(o_ref.dtype)

    return kernel


def _pick_batch_block(num_nodes, target=128):
    # smallest B such that B * V is a multiple of 128 lanes
    return target // math.gcd(num_nodes, target)


def agcn_graph_convolution(x, p):
    N, C, V = x.shape
    S, IC2, _ = p["wab"].shape
    IC = IC2 // 2
    O = p["wdf"].shape[1]

    B = _pick_batch_block(V)
    Np = ((N + B - 1) // B) * B
    if Np != N:
        x = jnp.pad(x, ((0, Np - N), (0, 0), (0, 0)))

    # lane-dense layout: samples contiguous along lanes -> (C, Np*V)
    xt = jnp.transpose(x, (1, 0, 2)).reshape(C, Np * V)

    BV = B * V
    num_blocks = Np // B
    kernel = _make_kernel(S, IC, B, V)

    out_flat = pl.pallas_call(
        kernel,
        out_shape=jax.ShapeDtypeStruct((O, Np * V), x.dtype),
        grid_spec=pltpu.PrefetchScalarGridSpec(
            num_scalar_prefetch=0,
            grid=(num_blocks,),
            in_specs=[
                pl.BlockSpec((C, BV), lambda n: (0, n)),             # x slab (lane-dense)
                pl.BlockSpec((S, 2 * IC, C), lambda n: (0, 0, 0)),   # fused conv_a/b weights (resident)
                pl.BlockSpec((S, 2 * IC, 1), lambda n: (0, 0, 0)),   # fused conv_a/b biases (resident)
                pl.BlockSpec((S, O, C), lambda n: (0, 0, 0)),        # conv_d weights (BN scale folded)
                pl.BlockSpec((S, V, V), lambda n: (0, 0, 0)),        # adj_a + adj_b
                pl.BlockSpec((O, C), lambda n: (0, 0)),              # down weight (conv + BN folded)
                pl.BlockSpec((O, 1), lambda n: (0, 0)),              # all folded bias / BN constants
            ],
            out_specs=pl.BlockSpec((O, BV), lambda n: (0, n)),       # lane-dense output slab
        ),
        compiler_params=pltpu.CompilerParams(
            dimension_semantics=("parallel",)),
    )(xt, p["wab"], p["bab"], p["wdf"], p["adj"], p["wdown_f"], p["cbias"])

    out = jnp.transpose(out_flat.reshape(O, Np, V), (1, 0, 2))       # (Np, O, V)
    return out[:N]


def init_params(key, in_features, out_features, num_nodes,
                num_subset=3, coff_embedding=4, eps=1e-5):
    inter_c = out_features // coff_embedding
    ks = jax.random.split(key, 12)

    def nrm(k, shape, scale=0.1):
        return scale * jax.random.normal(k, shape, jnp.float32)

    wa = nrm(ks[0], (num_subset, inter_c, in_features))
    ba = nrm(ks[1], (num_subset, inter_c, 1))
    wb = nrm(ks[2], (num_subset, inter_c, in_features))
    bb = nrm(ks[3], (num_subset, inter_c, 1))
    wd = nrm(ks[4], (num_subset, out_features, in_features))
    bd = nrm(ks[5], (num_subset, out_features, 1))

    # adj_a: buffer (fixed adjacency); adj_b: Parameter init'd to 1e-6
    adj_a = jax.nn.softmax(nrm(ks[6], (num_subset, num_nodes, num_nodes), 1.0), axis=-1)
    adj_b = jnp.full((num_subset, num_nodes, num_nodes), 1e-6, jnp.float32)
    adj = adj_a + adj_b

    # main BatchNorm1d (inference mode with running stats, folded to scale/shift)
    # TODO(synk): training-mode BatchNorm (batch statistics) is not reproduced;
    # inference-mode running-stat normalization is used instead.
    gamma = jnp.ones((out_features,), jnp.float32)
    beta = jnp.zeros((out_features,), jnp.float32)
    rmean = nrm(ks[7], (out_features,), 0.05)
    rvar = jnp.ones((out_features,), jnp.float32) + jnp.abs(nrm(ks[8], (out_features,), 0.05))
    bn_scale = gamma / jnp.sqrt(rvar + eps)
    bn_shift = beta - rmean * bn_scale

    # down branch (Conv1d 1x1 + BatchNorm1d if in != out, identity otherwise)
    if in_features != out_features:
        wdown = nrm(ks[9], (out_features, in_features))
        bdown = nrm(ks[10], (out_features,))
        gd = jnp.ones((out_features,), jnp.float32)
        btd = jnp.zeros((out_features,), jnp.float32)
        md = nrm(ks[11], (out_features,), 0.05)
        vd = jnp.ones((out_features,), jnp.float32)
        sd = gd / jnp.sqrt(vd + eps)
        wdown_f = sd[:, None] * wdown
        bdown_f = sd * bdown + (btd - md * sd)
    else:
        wdown_f = jnp.eye(out_features, dtype=jnp.float32)
        bdown_f = jnp.zeros((out_features,), jnp.float32)

    # ---- one-time host-side folds for the kernel ----
    wab = jnp.concatenate([wa, wb], axis=1)                       # (S, 2*IC, C)
    bab = jnp.concatenate([ba, bb], axis=1)                       # (S, 2*IC, 1)
    wdf = bn_scale[None, :, None] * wd                            # BN scale folded into conv_d
    cbias = (bn_scale[:, None] * jnp.sum(bd, axis=0)              # BN-scaled conv_d biases
             + bn_shift[:, None]                                  # BN shift
             + bdown_f[:, None])                                  # down-branch bias

    return dict(
        # raw params (reference path)
        wa=wa, ba=ba, wb=wb, bb=bb, wd=wd, bd=bd, adj=adj,
        bn_scale=bn_scale[:, None], bn_shift=bn_shift[:, None],
        wdown_f=wdown_f, bdown_f=bdown_f[:, None],
        inter_c=inter_c,
        # fused params (kernel path)
        wab=wab, bab=bab, wdf=wdf, cbias=cbias,
    )


def ref_forward(x, p):
    """Pure-JAX reference mirroring the PyTorch forward (inference-mode BN)."""
    S = p["wa"].shape[0]
    inter_c = p["inter_c"]
    y = 0.0
    for i in range(S):
        a1 = jnp.einsum("oc,ncv->nov", p["wa"][i], x) + p["ba"][i][None]    # (N, IC, V)
        a2 = jnp.einsum("oc,ncv->nov", p["wb"][i], x) + p["bb"][i][None]    # (N, IC, V)
        s = jnp.einsum("niv,niw->nvw", a1, a2) / inter_c                    # (N, V, V)
        attn = jax.nn.softmax(s, axis=-2) + p["adj"][i][None]
        xz = jnp.einsum("ncv,nvw->ncw", x, attn)
        z = jnp.einsum("oc,ncv->nov", p["wd"][i], xz) + p["bd"][i][None]
        y = y + z
    y = y * p["bn_scale"][None] + p["bn_shift"][None]
    down = jnp.einsum("oc,ncv->nov", p["wdown_f"], x) + p["bdown_f"][None]
    return jnp.maximum(y + down, 0.0)


if __name__ == "__main__":
    key = jax.random.PRNGKey(0)
    N, C_in, C_out, V = 16, 16, 32, 16        # batch, in_features, out_features, num_nodes
    kx, kp = jax.random.split(key)

    x = jax.random.normal(kx, (N, C_in, V), jnp.float32)
    params = init_params(kp, C_in, C_out, V)

    out = agcn_graph_convolution(x, params)
    out = jax.block_until_ready(out)
    ref = ref_forward(x, params)
    assert out.shape == (N, C_out, V) and out.dtype == jnp.float32
    np.testing.assert_allclose(np.asarray(out), np.asarray(ref), rtol=2e-5, atol=2e-5)

    # small-batch / padding path (N not a multiple of the batch block)
    x2 = jax.random.normal(jax.random.PRNGKey(1), (3, C_in, V), jnp.float32)
    out2 = jax.block_until_ready(agcn_graph_convolution(x2, params))
    np.testing.assert_allclose(np.asarray(out2), np.asarray(ref_forward(x2, params)),
                               rtol=2e-5, atol=2e-5)

    print("KERNEL_OK")
</pallas_src>

<mosaic_0001>
module attributes {stable_mosaic.version = 11 : i64} {
  func.func @kernel(%arg0: i32, %arg1: memref<16x128xf32, #tpu.memory_space<vmem>>, %arg2: memref<3x16x16xf32, #tpu.memory_space<vmem>>, %arg3: memref<3x16x1xf32, #tpu.memory_space<vmem>>, %arg4: memref<3x32x16xf32, #tpu.memory_space<vmem>>, %arg5: memref<3x16x16xf32, #tpu.memory_space<vmem>>, %arg6: memref<32x16xf32, #tpu.memory_space<vmem>>, %arg7: memref<32x1xf32, #tpu.memory_space<vmem>>, %arg8: memref<32x128xf32, #tpu.memory_space<vmem>>) attributes {dimension_semantics = [#tpu.dimension_semantics<parallel>], iteration_bounds = array<i64: 2>, scalar_prefetch = 0 : i64, scratch_operands = 0 : i64, tpu.core_type = #tpu.core_type<tc>, window_params = [{transform_indices = @transform_0, window_bounds = array<i64: 16, 128>}, {pipeline_mode = #tpu.pipeline_mode<synchronous>, transform_indices = @transform_1, window_bounds = array<i64: 3, 16, 16>}, {pipeline_mode = #tpu.pipeline_mode<synchronous>, transform_indices = @transform_2, window_bounds = array<i64: 3, 16, 1>}, {pipeline_mode = #tpu.pipeline_mode<synchronous>, transform_indices = @transform_3, window_bounds = array<i64: 3, 32, 16>}, {pipeline_mode = #tpu.pipeline_mode<synchronous>, transform_indices = @transform_4, window_bounds = array<i64: 3, 16, 16>}, {pipeline_mode = #tpu.pipeline_mode<synchronous>, transform_indices = @transform_5, window_bounds = array<i64: 32, 16>}, {pipeline_mode = #tpu.pipeline_mode<synchronous>, transform_indices = @transform_6, window_bounds = array<i64: 32, 1>}, {transform_indices = @transform_7, window_bounds = array<i64: 32, 128>}]} {
    %c0 = arith.constant 0 : index
    %c0_0 = arith.constant 0 : index
    %0 = vector.load %arg1[%c0, %c0_0] : memref<16x128xf32, #tpu.memory_space<vmem>>, vector<16x128xf32>
    %c0_1 = arith.constant 0 : index
    %c0_2 = arith.constant 0 : index
    %1 = vector.load %arg6[%c0_1, %c0_2] : memref<32x16xf32, #tpu.memory_space<vmem>>, vector<32x16xf32>
    %cst = arith.constant dense<0.000000e+00> : vector<32x128xf32>
    %2 = tpu.matmul %1, %0, %cst {dimension_numbers = #tpu.dot_dimension_numbers<[1], [0], [0], [1], [0, 0, 1, 1], [], []>} : vector<32x16xf32>, vector<16x128xf32>, vector<32x128xf32> -> vector<32x128xf32>
    %c0_3 = arith.constant 0 : index
    %c0_4 = arith.constant 0 : index
    %3 = vector.load %arg7[%c0_3, %c0_4] : memref<32x1xf32, #tpu.memory_space<vmem>>, vector<32x1xf32>
    %4 = vector.broadcast %3 : vector<32x1xf32> to vector<32x128xf32>
    %5 = arith.addf %2, %4 : vector<32x128xf32>
    %c0_5 = arith.constant 0 : index
    %c0_6 = arith.constant 0 : index
    %c0_7 = arith.constant 0 : index
    %6 = vector.load %arg2[%c0_5, %c0_6, %c0_7] : memref<3x16x16xf32, #tpu.memory_space<vmem>>, vector<1x16x16xf32>
    %7 = vector.shape_cast %6 : vector<1x16x16xf32> to vector<16x16xf32>
    %cst_8 = arith.constant dense<0.000000e+00> : vector<16x128xf32>
    %8 = tpu.matmul %7, %0, %cst_8 {dimension_numbers = #tpu.dot_dimension_numbers<[1], [0], [0], [1], [0, 0, 1, 1], [], []>} : vector<16x16xf32>, vector<16x128xf32>, vector<16x128xf32> -> vector<16x128xf32>
    %c0_9 = arith.constant 0 : index
    %c0_10 = arith.constant 0 : index
    %c0_11 = arith.constant 0 : index
    %9 = vector.load %arg3[%c0_9, %c0_10, %c0_11] : memref<3x16x1xf32, #tpu.memory_space<vmem>>, vector<1x16x1xf32>
    %10 = vector.shape_cast %9 : vector<1x16x1xf32> to vector<16x1xf32>
    %11 = vector.broadcast %10 : vector<16x1xf32> to vector<16x128xf32>
    %12 = arith.addf %8, %11 : vector<16x128xf32>
    %13 = vector.extract_strided_slice %12 {offsets = [0, 0], sizes = [8, 128], strides = [1, 1]} : vector<16x128xf32> to vector<8x128xf32>
    %14 = vector.extract_strided_slice %12 {offsets = [8, 0], sizes = [8, 128], strides = [1, 1]} : vector<16x128xf32> to vector<8x128xf32>
    %c0_12 = arith.constant 0 : index
    %c0_13 = arith.constant 0 : index
    %c0_14 = arith.constant 0 : index
    %15 = vector.load %arg5[%c0_12, %c0_13, %c0_14] : memref<3x16x16xf32, #tpu.memory_space<vmem>>, vector<1x16x16xf32>
    %16 = vector.shape_cast %15 : vector<1x16x16xf32> to vector<16x16xf32>
    %17 = vector.extract_strided_slice %13 {offsets = [0, 0], sizes = [8, 16], strides = [1, 1]} : vector<8x128xf32> to vector<8x16xf32>
    %18 = vector.extract_strided_slice %14 {offsets = [0, 0], sizes = [8, 16], strides = [1, 1]} : vector<8x128xf32> to vector<8x16xf32>
    %cst_15 = arith.constant dense<0.000000e+00> : vector<16x16xf32>
    %19 = tpu.matmul %17, %18, %cst_15 {dimension_numbers = #tpu.dot_dimension_numbers<[0], [0], [1], [1], [0, 1, 1, 1], [], []>} : vector<8x16xf32>, vector<8x16xf32>, vector<16x16xf32> -> vector<16x16xf32>
    %cst_16 = arith.constant 1.250000e-01 : f32
    %20 = vector.broadcast %cst_16 : f32 to vector<16x16xf32>
    %21 = arith.mulf %19, %20 : vector<16x16xf32>
    %cst_17 = arith.constant dense<0xFF800000> : vector<16xf32>
    %22 = vector.multi_reduction <maximumf>, %21, %cst_17 [0] : vector<16x16xf32> to vector<16xf32>
    %23 = vector.shape_cast %22 : vector<16xf32> to vector<1x16xf32>
    %24 = vector.broadcast %23 : vector<1x16xf32> to vector<16x16xf32>
    %25 = arith.subf %21, %24 : vector<16x16xf32>
    %26 = math.exp %25 : vector<16x16xf32>
    %cst_18 = arith.constant dense<0.000000e+00> : vector<16xf32>
    %27 = vector.multi_reduction <add>, %26, %cst_18 [0] : vector<16x16xf32> to vector<16xf32>
    %28 = vector.shape_cast %27 : vector<16xf32> to vector<1x16xf32>
    %29 = vector.broadcast %28 : vector<1x16xf32> to vector<16x16xf32>
    %30 = arith.divf %26, %29 : vector<16x16xf32>
    %31 = arith.addf %30, %16 : vector<16x16xf32>
    %32 = vector.extract_strided_slice %0 {offsets = [0, 0], sizes = [16, 16], strides = [1, 1]} : vector<16x128xf32> to vector<16x16xf32>
    %cst_19 = arith.constant dense<0.000000e+00> : vector<16x16xf32>
    %33 = tpu.matmul %32, %31, %cst_19 {dimension_numbers = #tpu.dot_dimension_numbers<[1], [0], [0], [1], [0, 0, 1, 1], [], []>} : vector<16x16xf32>, vector<16x16xf32>, vector<16x16xf32> -> vector<16x16xf32>
    %34 = vector.extract_strided_slice %13 {offsets = [0, 16], sizes = [8, 16], strides = [1, 1]} : vector<8x128xf32> to vector<8x16xf32>
    %35 = vector.extract_strided_slice %14 {offsets = [0, 16], sizes = [8, 16], strides = [1, 1]} : vector<8x128xf32> to vector<8x16xf32>
    %cst_20 = arith.constant dense<0.000000e+00> : vector<16x16xf32>
    %36 = tpu.matmul %34, %35, %cst_20 {dimension_numbers = #tpu.dot_dimension_numbers<[0], [0], [1], [1], [0, 1, 1, 1], [], []>} : vector<8x16xf32>, vector<8x16xf32>, vector<16x16xf32> -> vector<16x16xf32>
    %cst_21 = arith.constant 1.250000e-01 : f32
    %37 = vector.broadcast %cst_21 : f32 to vector<16x16xf32>
    %38 = arith.mulf %36, %37 : vector<16x16xf32>
    %cst_22 = arith.constant dense<0xFF800000> : vector<16xf32>
    %39 = vector.multi_reduction <maximumf>, %38, %cst_22 [0] : vector<16x16xf32> to vector<16xf32>
    %40 = vector.shape_cast %39 : vector<16xf32> to vector<1x16xf32>
    %41 = vector.broadcast %40 : vector<1x16xf32> to vector<16x16xf32>
    %42 = arith.subf %38, %41 : vector<16x16xf32>
    %43 = math.exp %42 : vector<16x16xf32>
    %cst_23 = arith.constant dense<0.000000e+00> : vector<16xf32>
    %44 = vector.multi_reduction <add>, %43, %cst_23 [0] : vector<16x16xf32> to vector<16xf32>
    %45 = vector.shape_cast %44 : vector<16xf32> to vector<1x16xf32>
    %46 = vector.broadcast %45 : vector<1x16xf32> to vector<16x16xf32>
    %47 = arith.divf %43, %46 : vector<16x16xf32>
    %48 = arith.addf %47, %16 : vector<16x16xf32>
    %49 = vector.extract_strided_slice %0 {offsets = [0, 16], sizes = [16, 16], strides = [1, 1]} : vector<16x128xf32> to vector<16x16xf32>
    %cst_24 = arith.constant dense<0.000000e+00> : vector<16x16xf32>
    %50 = tpu.matmul %49, %48, %cst_24 {dimension_numbers = #tpu.dot_dimension_numbers<[1], [0], [0], [1], [0, 0, 1, 1], [], []>} : vector<16x16xf32>, vector<16x16xf32>, vector<16x16xf32> -> vector<16x16xf32>
    %51 = vector.extract_strided_slice %13 {offsets = [0, 32], sizes = [8, 16], strides = [1, 1]} : vector<8x128xf32> to vector<8x16xf32>
    %52 = vector.extract_strided_slice %14 {offsets = [0, 32], sizes = [8, 16], strides = [1, 1]} : vector<8x128xf32> to vector<8x16xf32>
    %cst_25 = arith.constant dense<0.000000e+00> : vector<16x16xf32>
    %53 = tpu.matmul %51, %52, %cst_25 {dimension_numbers = #tpu.dot_dimension_numbers<[0], [0], [1], [1], [0, 1, 1, 1], [], []>} : vector<8x16xf32>, vector<8x16xf32>, vector<16x16xf32> -> vector<16x16xf32>
    %cst_26 = arith.constant 1.250000e-01 : f32
    %54 = vector.broadcast %cst_26 : f32 to vector<16x16xf32>
    %55 = arith.mulf %53, %54 : vector<16x16xf32>
    %cst_27 = arith.constant dense<0xFF800000> : vector<16xf32>
    %56 = vector.multi_reduction <maximumf>, %55, %cst_27 [0] : vector<16x16xf32> to vector<16xf32>
    %57 = vector.shape_cast %56 : vector<16xf32> to vector<1x16xf32>
    %58 = vector.broadcast %57 : vector<1x16xf32> to vector<16x16xf32>
    %59 = arith.subf %55, %58 : vector<16x16xf32>
    %60 = math.exp %59 : vector<16x16xf32>
    %cst_28 = arith.constant dense<0.000000e+00> : vector<16xf32>
    %61 = vector.multi_reduction <add>, %60, %cst_28 [0] : vector<16x16xf32> to vector<16xf32>
    %62 = vector.shape_cast %61 : vector<16xf32> to vector<1x16xf32>
    %63 = vector.broadcast %62 : vector<1x16xf32> to vector<16x16xf32>
    %64 = arith.divf %60, %63 : vector<16x16xf32>
    %65 = arith.addf %64, %16 : vector<16x16xf32>
    %66 = vector.extract_strided_slice %0 {offsets = [0, 32], sizes = [16, 16], strides = [1, 1]} : vector<16x128xf32> to vector<16x16xf32>
    %cst_29 = arith.constant dense<0.000000e+00> : vector<16x16xf32>
    %67 = tpu.matmul %66, %65, %cst_29 {dimension_numbers = #tpu.dot_dimension_numbers<[1], [0], [0], [1], [0, 0, 1, 1], [], []>} : vector<16x16xf32>, vector<16x16xf32>, vector<16x16xf32> -> vector<16x16xf32>
    %68 = vector.extract_strided_slice %13 {offsets = [0, 48], sizes = [8, 16], strides = [1, 1]} : vector<8x128xf32> to vector<8x16xf32>
    %69 = vector.extract_strided_slice %14 {offsets = [0, 48], sizes = [8, 16], strides = [1, 1]} : vector<8x128xf32> to vector<8x16xf32>
    %cst_30 = arith.constant dense<0.000000e+00> : vector<16x16xf32>
    %70 = tpu.matmul %68, %69, %cst_30 {dimension_numbers = #tpu.dot_dimension_numbers<[0], [0], [1], [1], [0, 1, 1, 1], [], []>} : vector<8x16xf32>, vector<8x16xf32>, vector<16x16xf32> -> vector<16x16xf32>
    %cst_31 = arith.constant 1.250000e-01 : f32
    %71 = vector.broadcast %cst_31 : f32 to vector<16x16xf32>
    %72 = arith.mulf %70, %71 : vector<16x16xf32>
    %cst_32 = arith.constant dense<0xFF800000> : vector<16xf32>
    %73 = vector.multi_reduction <maximumf>, %72, %cst_32 [0] : vector<16x16xf32> to vector<16xf32>
    %74 = vector.shape_cast %73 : vector<16xf32> to vector<1x16xf32>
    %75 = vector.broadcast %74 : vector<1x16xf32> to vector<16x16xf32>
    %76 = arith.subf %72, %75 : vector<16x16xf32>
    %77 = math.exp %76 : vector<16x16xf32>
    %cst_33 = arith.constant dense<0.000000e+00> : vector<16xf32>
    %78 = vector.multi_reduction <add>, %77, %cst_33 [0] : vector<16x16xf32> to vector<16xf32>
    %79 = vector.shape_cast %78 : vector<16xf32> to vector<1x16xf32>
    %80 = vector.broadcast %79 : vector<1x16xf32> to vector<16x16xf32>
    %81 = arith.divf %77, %80 : vector<16x16xf32>
    %82 = arith.addf %81, %16 : vector<16x16xf32>
    %83 = vector.extract_strided_slice %0 {offsets = [0, 48], sizes = [16, 16], strides = [1, 1]} : vector<16x128xf32> to vector<16x16xf32>
    %cst_34 = arith.constant dense<0.000000e+00> : vector<16x16xf32>
    %84 = tpu.matmul %83, %82, %cst_34 {dimension_numbers = #tpu.dot_dimension_numbers<[1], [0], [0], [1], [0, 0, 1, 1], [], []>} : vector<16x16xf32>, vector<16x16xf32>, vector<16x16xf32> -> vector<16x16xf32>
    %85 = vector.extract_strided_slice %13 {offsets = [0, 64], sizes = [8, 16], strides = [1, 1]} : vector<8x128xf32> to vector<8x16xf32>
    %86 = vector.extract_strided_slice %14 {offsets = [0, 64], sizes = [8, 16], strides = [1, 1]} : vector<8x128xf32> to vector<8x16xf32>
    %cst_35 = arith.constant dense<0.000000e+00> : vector<16x16xf32>
    %87 = tpu.matmul %85, %86, %cst_35 {dimension_numbers = #tpu.dot_dimension_numbers<[0], [0], [1], [1], [0, 1, 1, 1], [], []>} : vector<8x16xf32>, vector<8x16xf32>, vector<16x16xf32> -> vector<16x16xf32>
    %cst_36 = arith.constant 1.250000e-01 : f32
    %88 = vector.broadcast %cst_36 : f32 to vector<16x16xf32>
    %89 = arith.mulf %87, %88 : vector<16x16xf32>
    %cst_37 = arith.constant dense<0xFF800000> : vector<16xf32>
    %90 = vector.multi_reduction <maximumf>, %89, %cst_37 [0] : vector<16x16xf32> to vector<16xf32>
    %91 = vector.shape_cast %90 : vector<16xf32> to vector<1x16xf32>
    %92 = vector.broadcast %91 : vector<1x16xf32> to vector<16x16xf32>
    %93 = arith.subf %89, %92 : vector<16x16xf32>
    %94 = math.exp %93 : vector<16x16xf32>
    %cst_38 = arith.constant dense<0.000000e+00> : vector<16xf32>
    %95 = vector.multi_reduction <add>, %94, %cst_38 [0] : vector<16x16xf32> to vector<16xf32>
    %96 = vector.shape_cast %95 : vector<16xf32> to vector<1x16xf32>
    %97 = vector.broadcast %96 : vector<1x16xf32> to vector<16x16xf32>
    %98 = arith.divf %94, %97 : vector<16x16xf32>
    %99 = arith.addf %98, %16 : vector<16x16xf32>
    %100 = vector.extract_strided_slice %0 {offsets = [0, 64], sizes = [16, 16], strides = [1, 1]} : vector<16x128xf32> to vector<16x16xf32>
    %cst_39 = arith.constant dense<0.000000e+00> : vector<16x16xf32>
    %101 = tpu.matmul %100, %99, %cst_39 {dimension_numbers = #tpu.dot_dimension_numbers<[1], [0], [0], [1], [0, 0, 1, 1], [], []>} : vector<16x16xf32>, vector<16x16xf32>, vector<16x16xf32> -> vector<16x16xf32>
    %102 = vector.extract_strided_slice %13 {offsets = [0, 80], sizes = [8, 16], strides = [1, 1]} : vector<8x128xf32> to vector<8x16xf32>
    %103 = vector.extract_strided_slice %14 {offsets = [0, 80], sizes = [8, 16], strides = [1, 1]} : vector<8x128xf32> to vector<8x16xf32>
    %cst_40 = arith.constant dense<0.000000e+00> : vector<16x16xf32>
    %104 = tpu.matmul %102, %103, %cst_40 {dimension_numbers = #tpu.dot_dimension_numbers<[0], [0], [1], [1], [0, 1, 1, 1], [], []>} : vector<8x16xf32>, vector<8x16xf32>, vector<16x16xf32> -> vector<16x16xf32>
    %cst_41 = arith.constant 1.250000e-01 : f32
    %105 = vector.broadcast %cst_41 : f32 to vector<16x16xf32>
    %106 = arith.mulf %104, %105 : vector<16x16xf32>
    %cst_42 = arith.constant dense<0xFF800000> : vector<16xf32>
    %107 = vector.multi_reduction <maximumf>, %106, %cst_42 [0] : vector<16x16xf32> to vector<16xf32>
    %108 = vector.shape_cast %107 : vector<16xf32> to vector<1x16xf32>
    %109 = vector.broadcast %108 : vector<1x16xf32> to vector<16x16xf32>
    %110 = arith.subf %106, %109 : vector<16x16xf32>
    %111 = math.exp %110 : vector<16x16xf32>
    %cst_43 = arith.constant dense<0.000000e+00> : vector<16xf32>
    %112 = vector.multi_reduction <add>, %111, %cst_43 [0] : vector<16x16xf32> to vector<16xf32>
    %113 = vector.shape_cast %112 : vector<16xf32> to vector<1x16xf32>
    %114 = vector.broadcast %113 : vector<1x16xf32> to vector<16x16xf32>
    %115 = arith.divf %111, %114 : vector<16x16xf32>
    %116 = arith.addf %115, %16 : vector<16x16xf32>
    %117 = vector.extract_strided_slice %0 {offsets = [0, 80], sizes = [16, 16], strides = [1, 1]} : vector<16x128xf32> to vector<16x16xf32>
    %cst_44 = arith.constant dense<0.000000e+00> : vector<16x16xf32>
    %118 = tpu.matmul %117, %116, %cst_44 {dimension_numbers = #tpu.dot_dimension_numbers<[1], [0], [0], [1], [0, 0, 1, 1], [], []>} : vector<16x16xf32>, vector<16x16xf32>, vector<16x16xf32> -> vector<16x16xf32>
    %119 = vector.extract_strided_slice %13 {offsets = [0, 96], sizes = [8, 16], strides = [1, 1]} : vector<8x128xf32> to vector<8x16xf32>
    %120 = vector.extract_strided_slice %14 {offsets = [0, 96], sizes = [8, 16], strides = [1, 1]} : vector<8x128xf32> to vector<8x16xf32>
    %cst_45 = arith.constant dense<0.000000e+00> : vector<16x16xf32>
    %121 = tpu.matmul %119, %120, %cst_45 {dimension_numbers = #tpu.dot_dimension_numbers<[0], [0], [1], [1], [0, 1, 1, 1], [], []>} : vector<8x16xf32>, vector<8x16xf32>, vector<16x16xf32> -> vector<16x16xf32>
    %cst_46 = arith.constant 1.250000e-01 : f32
    %122 = vector.broadcast %cst_46 : f32 to vector<16x16xf32>
    %123 = arith.mulf %121, %122 : vector<16x16xf32>
    %cst_47 = arith.constant dense<0xFF800000> : vector<16xf32>
    %124 = vector.multi_reduction <maximumf>, %123, %cst_47 [0] : vector<16x16xf32> to vector<16xf32>
    %125 = vector.shape_cast %124 : vector<16xf32> to vector<1x16xf32>
    %126 = vector.broadcast %125 : vector<1x16xf32> to vector<16x16xf32>
    %127 = arith.subf %123, %126 : vector<16x16xf32>
    %128 = math.exp %127 : vector<16x16xf32>
    %cst_48 = arith.constant dense<0.000000e+00> : vector<16xf32>
    %129 = vector.multi_reduction <add>, %128, %cst_48 [0] : vector<16x16xf32> to vector<16xf32>
    %130 = vector.shape_cast %129 : vector<16xf32> to vector<1x16xf32>
    %131 = vector.broadcast %130 : vector<1x16xf32> to vector<16x16xf32>
    %132 = arith.divf %128, %131 : vector<16x16xf32>
    %133 = arith.addf %132, %16 : vector<16x16xf32>
    %134 = vector.extract_strided_slice %0 {offsets = [0, 96], sizes = [16, 16], strides = [1, 1]} : vector<16x128xf32> to vector<16x16xf32>
    %cst_49 = arith.constant dense<0.000000e+00> : vector<16x16xf32>
    %135 = tpu.matmul %134, %133, %cst_49 {dimension_numbers = #tpu.dot_dimension_numbers<[1], [0], [0], [1], [0, 0, 1, 1], [], []>} : vector<16x16xf32>, vector<16x16xf32>, vector<16x16xf32> -> vector<16x16xf32>
    %136 = vector.extract_strided_slice %13 {offsets = [0, 112], sizes = [8, 16], strides = [1, 1]} : vector<8x128xf32> to vector<8x16xf32>
    %137 = vector.extract_strided_slice %14 {offsets = [0, 112], sizes = [8, 16], strides = [1, 1]} : vector<8x128xf32> to vector<8x16xf32>
    %cst_50 = arith.constant dense<0.000000e+00> : vector<16x16xf32>
    %138 = tpu.matmul %136, %137, %cst_50 {dimension_numbers = #tpu.dot_dimension_numbers<[0], [0], [1], [1], [0, 1, 1, 1], [], []>} : vector<8x16xf32>, vector<8x16xf32>, vector<16x16xf32> -> vector<16x16xf32>
    %cst_51 = arith.constant 1.250000e-01 : f32
    %139 = vector.broadcast %cst_51 : f32 to vector<16x16xf32>
    %140 = arith.mulf %138, %139 : vector<16x16xf32>
    %cst_52 = arith.constant dense<0xFF800000> : vector<16xf32>
    %141 = vector.multi_reduction <maximumf>, %140, %cst_52 [0] : vector<16x16xf32> to vector<16xf32>
    %142 = vector.shape_cast %141 : vector<16xf32> to vector<1x16xf32>
    %143 = vector.broadcast %142 : vector<1x16xf32> to vector<16x16xf32>
    %144 = arith.subf %140, %143 : vector<16x16xf32>
    %145 = math.exp %144 : vector<16x16xf32>
    %cst_53 = arith.constant dense<0.000000e+00> : vector<16xf32>
    %146 = vector.multi_reduction <add>, %145, %cst_53 [0] : vector<16x16xf32> to vector<16xf32>
    %147 = vector.shape_cast %146 : vector<16xf32> to vector<1x16xf32>
    %148 = vector.broadcast %147 : vector<1x16xf32> to vector<16x16xf32>
    %149 = arith.divf %145, %148 : vector<16x16xf32>
    %150 = arith.addf %149, %16 : vector<16x16xf32>
    %151 = vector.extract_strided_slice %0 {offsets = [0, 112], sizes = [16, 16], strides = [1, 1]} : vector<16x128xf32> to vector<16x16xf32>
    %cst_54 = arith.constant dense<0.000000e+00> : vector<16x16xf32>
    %152 = tpu.matmul %151, %150, %cst_54 {dimension_numbers = #tpu.dot_dimension_numbers<[1], [0], [0], [1], [0, 0, 1, 1], [], []>} : vector<16x16xf32>, vector<16x16xf32>, vector<16x16xf32> -> vector<16x16xf32>
    %153 = tpu.concatenate %33, %50, %67, %84, %101, %118, %135, %152 in 1 : vector<16x16xf32>, vector<16x16xf32>, vector<16x16xf32>, vector<16x16xf32>, vector<16x16xf32>, vector<16x16xf32>, vector<16x16xf32>, vector<16x16xf32> -> vector<16x128xf32>
    %c0_55 = arith.constant 0 : index
    %c0_56 = arith.constant 0 : index
    %c0_57 = arith.constant 0 : index
    %154 = vector.load %arg4[%c0_55, %c0_56, %c0_57] : memref<3x32x16xf32, #tpu.memory_space<vmem>>, vector<1x32x16xf32>
    %155 = vector.shape_cast %154 : vector<1x32x16xf32> to vector<32x16xf32>
    %cst_58 = arith.constant dense<0.000000e+00> : vector<32x128xf32>
    %156 = tpu.matmul %155, %153, %cst_58 {dimension_numbers = #tpu.dot_dimension_numbers<[1], [0], [0], [1], [0, 0, 1, 1], [], []>} : vector<32x16xf32>, vector<16x128xf32>, vector<32x128xf32> -> vector<32x128xf32>
    %157 = arith.addf %5, %156 : vector<32x128xf32>
    %c1 = arith.constant 1 : index
    %c0_59 = arith.constant 0 : index
    %c0_60 = arith.constant 0 : index
    %158 = vector.load %arg2[%c1, %c0_59, %c0_60] : memref<3x16x16xf32, #tpu.memory_space<vmem>>, vector<1x16x16xf32>
    %159 = vector.shape_cast %158 : vector<1x16x16xf32> to vector<16x16xf32>
    %cst_61 = arith.constant dense<0.000000e+00> : vector<16x128xf32>
    %160 = tpu.matmul %159, %0, %cst_61 {dimension_numbers = #tpu.dot_dimension_numbers<[1], [0], [0], [1], [0, 0, 1, 1], [], []>} : vector<16x16xf32>, vector<16x128xf32>, vector<16x128xf32> -> vector<16x128xf32>
    %c1_62 = arith.constant 1 : index
    %c0_63 = arith.constant 0 : index
    %c0_64 = arith.constant 0 : index
    %161 = vector.load %arg3[%c1_62, %c0_63, %c0_64] : memref<3x16x1xf32, #tpu.memory_space<vmem>>, vector<1x16x1xf32>
    %162 = vector.shape_cast %161 : vector<1x16x1xf32> to vector<16x1xf32>
    %163 = vector.broadcast %162 : vector<16x1xf32> to vector<16x128xf32>
    %164 = arith.addf %160, %163 : vector<16x128xf32>
    %165 = vector.extract_strided_slice %164 {offsets = [0, 0], sizes = [8, 128], strides = [1, 1]} : vector<16x128xf32> to vector<8x128xf32>
    %166 = vector.extract_strided_slice %164 {offsets = [8, 0], sizes = [8, 128], strides = [1, 1]} : vector<16x128xf32> to vector<8x128xf32>
    %c1_65 = arith.constant 1 : index
    %c0_66 = arith.constant 0 : index
    %c0_67 = arith.constant 0 : index
    %167 = vector.load %arg5[%c1_65, %c0_66, %c0_67] : memref<3x16x16xf32, #tpu.memory_space<vmem>>, vector<1x16x16xf32>
    %168 = vector.shape_cast %167 : vector<1x16x16xf32> to vector<16x16xf32>
    %169 = vector.extract_strided_slice %165 {offsets = [0, 0], sizes = [8, 16], strides = [1, 1]} : vector<8x128xf32> to vector<8x16xf32>
    %170 = vector.extract_strided_slice %166 {offsets = [0, 0], sizes = [8, 16], strides = [1, 1]} : vector<8x128xf32> to vector<8x16xf32>
    %cst_68 = arith.constant dense<0.000000e+00> : vector<16x16xf32>
    %171 = tpu.matmul %169, %170, %cst_68 {dimension_numbers = #tpu.dot_dimension_numbers<[0], [0], [1], [1], [0, 1, 1, 1], [], []>} : vector<8x16xf32>, vector<8x16xf32>, vector<16x16xf32> -> vector<16x16xf32>
    %cst_69 = arith.constant 1.250000e-01 : f32
    %172 = vector.broadcast %cst_69 : f32 to vector<16x16xf32>
    %173 = arith.mulf %171, %172 : vector<16x16xf32>
    %cst_70 = arith.constant dense<0xFF800000> : vector<16xf32>
    %174 = vector.multi_reduction <maximumf>, %173, %cst_70 [0] : vector<16x16xf32> to vector<16xf32>
    %175 = vector.shape_cast %174 : vector<16xf32> to vector<1x16xf32>
    %176 = vector.broadcast %175 : vector<1x16xf32> to vector<16x16xf32>
    %177 = arith.subf %173, %176 : vector<16x16xf32>
    %178 = math.exp %177 : vector<16x16xf32>
    %cst_71 = arith.constant dense<0.000000e+00> : vector<16xf32>
    %179 = vector.multi_reduction <add>, %178, %cst_71 [0] : vector<16x16xf32> to vector<16xf32>
    %180 = vector.shape_cast %179 : vector<16xf32> to vector<1x16xf32>
    %181 = vector.broadcast %180 : vector<1x16xf32> to vector<16x16xf32>
    %182 = arith.divf %178, %181 : vector<16x16xf32>
    %183 = arith.addf %182, %168 : vector<16x16xf32>
    %184 = vector.extract_strided_slice %0 {offsets = [0, 0], sizes = [16, 16], strides = [1, 1]} : vector<16x128xf32> to vector<16x16xf32>
    %cst_72 = arith.constant dense<0.000000e+00> : vector<16x16xf32>
    %185 = tpu.matmul %184, %183, %cst_72 {dimension_numbers = #tpu.dot_dimension_numbers<[1], [0], [0], [1], [0, 0, 1, 1], [], []>} : vector<16x16xf32>, vector<16x16xf32>, vector<16x16xf32> -> vector<16x16xf32>
    %186 = vector.extract_strided_slice %165 {offsets = [0, 16], sizes = [8, 16], strides = [1, 1]} : vector<8x128xf32> to vector<8x16xf32>
    %187 = vector.extract_strided_slice %166 {offsets = [0, 16], sizes = [8, 16], strides = [1, 1]} : vector<8x128xf32> to vector<8x16xf32>
    %cst_73 = arith.constant dense<0.000000e+00> : vector<16x16xf32>
    %188 = tpu.matmul %186, %187, %cst_73 {dimension_numbers = #tpu.dot_dimension_numbers<[0], [0], [1], [1], [0, 1, 1, 1], [], []>} : vector<8x16xf32>, vector<8x16xf32>, vector<16x16xf32> -> vector<16x16xf32>
    %cst_74 = arith.constant 1.250000e-01 : f32
    %189 = vector.broadcast %cst_74 : f32 to vector<16x16xf32>
    %190 = arith.mulf %188, %189 : vector<16x16xf32>
    %cst_75 = arith.constant dense<0xFF800000> : vector<16xf32>
    %191 = vector.multi_reduction <maximumf>, %190, %cst_75 [0] : vector<16x16xf32> to vector<16xf32>
    %192 = vector.shape_cast %191 : vector<16xf32> to vector<1x16xf32>
    %193 = vector.broadcast %192 : vector<1x16xf32> to vector<16x16xf32>
    %194 = arith.subf %190, %193 : vector<16x16xf32>
    %195 = math.exp %194 : vector<16x16xf32>
    %cst_76 = arith.constant dense<0.000000e+00> : vector<16xf32>
    %196 = vector.multi_reduction <add>, %195, %cst_76 [0] : vector<16x16xf32> to vector<16xf32>
    %197 = vector.shape_cast %196 : vector<16xf32> to vector<1x16xf32>
    %198 = vector.broadcast %197 : vector<1x16xf32> to vector<16x16xf32>
    %199 = arith.divf %195, %198 : vector<16x16xf32>
    %200 = arith.addf %199, %168 : vector<16x16xf32>
    %201 = vector.extract_strided_slice %0 {offsets = [0, 16], sizes = [16, 16], strides = [1, 1]} : vector<16x128xf32> to vector<16x16xf32>
    %cst_77 = arith.constant dense<0.000000e+00> : vector<16x16xf32>
    %202 = tpu.matmul %201, %200, %cst_77 {dimension_numbers = #tpu.dot_dimension_numbers<[1], [0], [0], [1], [0, 0, 1, 1], [], []>} : vector<16x16xf32>, vector<16x16xf32>, vector<16x16xf32> -> vector<16x16xf32>
    %203 = vector.extract_strided_slice %165 {offsets = [0, 32], sizes = [8, 16], strides = [1, 1]} : vector<8x128xf32> to vector<8x16xf32>
    %204 = vector.extract_strided_slice %166 {offsets = [0, 32], sizes = [8, 16], strides = [1, 1]} : vector<8x128xf32> to vector<8x16xf32>
    %cst_78 = arith.constant dense<0.000000e+00> : vector<16x16xf32>
    %205 = tpu.matmul %203, %204, %cst_78 {dimension_numbers = #tpu.dot_dimension_numbers<[0], [0], [1], [1], [0, 1, 1, 1], [], []>} : vector<8x16xf32>, vector<8x16xf32>, vector<16x16xf32> -> vector<16x16xf32>
    %cst_79 = arith.constant 1.250000e-01 : f32
    %206 = vector.broadcast %cst_79 : f32 to vector<16x16xf32>
    %207 = arith.mulf %205, %206 : vector<16x16xf32>
    %cst_80 = arith.constant dense<0xFF800000> : vector<16xf32>
    %208 = vector.multi_reduction <maximumf>, %207, %cst_80 [0] : vector<16x16xf32> to vector<16xf32>
    %209 = vector.shape_cast %208 : vector<16xf32> to vector<1x16xf32>
    %210 = vector.broadcast %209 : vector<1x16xf32> to vector<16x16xf32>
    %211 = arith.subf %207, %210 : vector<16x16xf32>
    %212 = math.exp %211 : vector<16x16xf32>
    %cst_81 = arith.constant dense<0.000000e+00> : vector<16xf32>
    %213 = vector.multi_reduction <add>, %212, %cst_81 [0] : vector<16x16xf32> to vector<16xf32>
    %214 = vector.shape_cast %213 : vector<16xf32> to vector<1x16xf32>
    %215 = vector.broadcast %214 : vector<1x16xf32> to vector<16x16xf32>
    %216 = arith.divf %212, %215 : vector<16x16xf32>
    %217 = arith.addf %216, %168 : vector<16x16xf32>
    %218 = vector.extract_strided_slice %0 {offsets = [0, 32], sizes = [16, 16], strides = [1, 1]} : vector<16x128xf32> to vector<16x16xf32>
    %cst_82 = arith.constant dense<0.000000e+00> : vector<16x16xf32>
    %219 = tpu.matmul %218, %217, %cst_82 {dimension_numbers = #tpu.dot_dimension_numbers<[1], [0], [0], [1], [0, 0, 1, 1], [], []>} : vector<16x16xf32>, vector<16x16xf32>, vector<16x16xf32> -> vector<16x16xf32>
    %220 = vector.extract_strided_slice %165 {offsets = [0, 48], sizes = [8, 16], strides = [1, 1]} : vector<8x128xf32> to vector<8x16xf32>
    %221 = vector.extract_strided_slice %166 {offsets = [0, 48], sizes = [8, 16], strides = [1, 1]} : vector<8x128xf32> to vector<8x16xf32>
    %cst_83 = arith.constant dense<0.000000e+00> : vector<16x16xf32>
    %222 = tpu.matmul %220, %221, %cst_83 {dimension_numbers = #tpu.dot_dimension_numbers<[0], [0], [1], [1], [0, 1, 1, 1], [], []>} : vector<8x16xf32>, vector<8x16xf32>, vector<16x16xf32> -> vector<16x16xf32>
    %cst_84 = arith.constant 1.250000e-01 : f32
    %223 = vector.broadcast %cst_84 : f32 to vector<16x16xf32>
    %224 = arith.mulf %222, %223 : vector<16x16xf32>
    %cst_85 = arith.constant dense<0xFF800000> : vector<16xf32>
    %225 = vector.multi_reduction <maximumf>, %224, %cst_85 [0] : vector<16x16xf32> to vector<16xf32>
    %226 = vector.shape_cast %225 : vector<16xf32> to vector<1x16xf32>
    %227 = vector.broadcast %226 : vector<1x16xf32> to vector<16x16xf32>
    %228 = arith.subf %224, %227 : vector<16x16xf32>
    %229 = math.exp %228 : vector<16x16xf32>
    %cst_86 = arith.constant dense<0.000000e+00> : vector<16xf32>
    %230 = vector.multi_reduction <add>, %229, %cst_86 [0] : vector<16x16xf32> to vector<16xf32>
    %231 = vector.shape_cast %230 : vector<16xf32> to vector<1x16xf32>
    %232 = vector.broadcast %231 : vector<1x16xf32> to vector<16x16xf32>
    %233 = arith.divf %229, %232 : vector<16x16xf32>
    %234 = arith.addf %233, %168 : vector<16x16xf32>
    %235 = vector.extract_strided_slice %0 {offsets = [0, 48], sizes = [16, 16], strides = [1, 1]} : vector<16x128xf32> to vector<16x16xf32>
    %cst_87 = arith.constant dense<0.000000e+00> : vector<16x16xf32>
    %236 = tpu.matmul %235, %234, %cst_87 {dimension_numbers = #tpu.dot_dimension_numbers<[1], [0], [0], [1], [0, 0, 1, 1], [], []>} : vector<16x16xf32>, vector<16x16xf32>, vector<16x16xf32> -> vector<16x16xf32>
    %237 = vector.extract_strided_slice %165 {offsets = [0, 64], sizes = [8, 16], strides = [1, 1]} : vector<8x128xf32> to vector<8x16xf32>
    %238 = vector.extract_strided_slice %166 {offsets = [0, 64], sizes = [8, 16], strides = [1, 1]} : vector<8x128xf32> to vector<8x16xf32>
    %cst_88 = arith.constant dense<0.000000e+00> : vector<16x16xf32>
    %239 = tpu.matmul %237, %238, %cst_88 {dimension_numbers = #tpu.dot_dimension_numbers<[0], [0], [1], [1], [0, 1, 1, 1], [], []>} : vector<8x16xf32>, vector<8x16xf32>, vector<16x16xf32> -> vector<16x16xf32>
    %cst_89 = arith.constant 1.250000e-01 : f32
    %240 = vector.broadcast %cst_89 : f32 to vector<16x16xf32>
    %241 = arith.mulf %239, %240 : vector<16x16xf32>
    %cst_90 = arith.constant dense<0xFF800000> : vector<16xf32>
    %242 = vector.multi_reduction <maximumf>, %241, %cst_90 [0] : vector<16x16xf32> to vector<16xf32>
    %243 = vector.shape_cast %242 : vector<16xf32> to vector<1x16xf32>
    %244 = vector.broadcast %243 : vector<1x16xf32> to vector<16x16xf32>
    %245 = arith.subf %241, %244 : vector<16x16xf32>
    %246 = math.exp %245 : vector<16x16xf32>
    %cst_91 = arith.constant dense<0.000000e+00> : vector<16xf32>
    %247 = vector.multi_reduction <add>, %246, %cst_91 [0] : vector<16x16xf32> to vector<16xf32>
    %248 = vector.shape_cast %247 : vector<16xf32> to vector<1x16xf32>
    %249 = vector.broadcast %248 : vector<1x16xf32> to vector<16x16xf32>
    %250 = arith.divf %246, %249 : vector<16x16xf32>
    %251 = arith.addf %250, %168 : vector<16x16xf32>
    %252 = vector.extract_strided_slice %0 {offsets = [0, 64], sizes = [16, 16], strides = [1, 1]} : vector<16x128xf32> to vector<16x16xf32>
    %cst_92 = arith.constant dense<0.000000e+00> : vector<16x16xf32>
    %253 = tpu.matmul %252, %251, %cst_92 {dimension_numbers = #tpu.dot_dimension_numbers<[1], [0], [0], [1], [0, 0, 1, 1], [], []>} : vector<16x16xf32>, vector<16x16xf32>, vector<16x16xf32> -> vector<16x16xf32>
    %254 = vector.extract_strided_slice %165 {offsets = [0, 80], sizes = [8, 16], strides = [1, 1]} : vector<8x128xf32> to vector<8x16xf32>
    %255 = vector.extract_strided_slice %166 {offsets = [0, 80], sizes = [8, 16], strides = [1, 1]} : vector<8x128xf32> to vector<8x16xf32>
    %cst_93 = arith.constant dense<0.000000e+00> : vector<16x16xf32>
    %256 = tpu.matmul %254, %255, %cst_93 {dimension_numbers = #tpu.dot_dimension_numbers<[0], [0], [1], [1], [0, 1, 1, 1], [], []>} : vector<8x16xf32>, vector<8x16xf32>, vector<16x16xf32> -> vector<16x16xf32>
    %cst_94 = arith.constant 1.250000e-01 : f32
    %257 = vector.broadcast %cst_94 : f32 to vector<16x16xf32>
    %258 = arith.mulf %256, %257 : vector<16x16xf32>
    %cst_95 = arith.constant dense<0xFF800000> : vector<16xf32>
    %259 = vector.multi_reduction <maximumf>, %258, %cst_95 [0] : vector<16x16xf32> to vector<16xf32>
    %260 = vector.shape_cast %259 : vector<16xf32> to vector<1x16xf32>
    %261 = vector.broadcast %260 : vector<1x16xf32> to vector<16x16xf32>
    %262 = arith.subf %258, %261 : vector<16x16xf32>
    %263 = math.exp %262 : vector<16x16xf32>
    %cst_96 = arith.constant dense<0.000000e+00> : vector<16xf32>
    %264 = vector.multi_reduction <add>, %263, %cst_96 [0] : vector<16x16xf32> to vector<16xf32>
    %265 = vector.shape_cast %264 : vector<16xf32> to vector<1x16xf32>
    %266 = vector.broadcast %265 : vector<1x16xf32> to vector<16x16xf32>
    %267 = arith.divf %263, %266 : vector<16x16xf32>
    %268 = arith.addf %267, %168 : vector<16x16xf32>
    %269 = vector.extract_strided_slice %0 {offsets = [0, 80], sizes = [16, 16], strides = [1, 1]} : vector<16x128xf32> to vector<16x16xf32>
    %cst_97 = arith.constant dense<0.000000e+00> : vector<16x16xf32>
    %270 = tpu.matmul %269, %268, %cst_97 {dimension_numbers = #tpu.dot_dimension_numbers<[1], [0], [0], [1], [0, 0, 1, 1], [], []>} : vector<16x16xf32>, vector<16x16xf32>, vector<16x16xf32> -> vector<16x16xf32>
    %271 = vector.extract_strided_slice %165 {offsets = [0, 96], sizes = [8, 16], strides = [1, 1]} : vector<8x128xf32> to vector<8x16xf32>
    %272 = vector.extract_strided_slice %166 {offsets = [0, 96], sizes = [8, 16], strides = [1, 1]} : vector<8x128xf32> to vector<8x16xf32>
    %cst_98 = arith.constant dense<0.000000e+00> : vector<16x16xf32>
    %273 = tpu.matmul %271, %272, %cst_98 {dimension_numbers = #tpu.dot_dimension_numbers<[0], [0], [1], [1], [0, 1, 1, 1], [], []>} : vector<8x16xf32>, vector<8x16xf32>, vector<16x16xf32> -> vector<16x16xf32>
    %cst_99 = arith.constant 1.250000e-01 : f32
    %274 = vector.broadcast %cst_99 : f32 to vector<16x16xf32>
    %275 = arith.mulf %273, %274 : vector<16x16xf32>
    %cst_100 = arith.constant dense<0xFF800000> : vector<16xf32>
    %276 = vector.multi_reduction <maximumf>, %275, %cst_100 [0] : vector<16x16xf32> to vector<16xf32>
    %277 = vector.shape_cast %276 : vector<16xf32> to vector<1x16xf32>
    %278 = vector.broadcast %277 : vector<1x16xf32> to vector<16x16xf32>
    %279 = arith.subf %275, %278 : vector<16x16xf32>
    %280 = math.exp %279 : vector<16x16xf32>
    %cst_101 = arith.constant dense<0.000000e+00> : vector<16xf32>
    %281 = vector.multi_reduction <add>, %280, %cst_101 [0] : vector<16x16xf32> to vector<16xf32>
    %282 = vector.shape_cast %281 : vector<16xf32> to vector<1x16xf32>
    %283 = vector.broadcast %282 : vector<1x16xf32> to vector<16x16xf32>
    %284 = arith.divf %280, %283 : vector<16x16xf32>
    %285 = arith.addf %284, %168 : vector<16x16xf32>
    %286 = vector.extract_strided_slice %0 {offsets = [0, 96], sizes = [16, 16], strides = [1, 1]} : vector<16x128xf32> to vector<16x16xf32>
    %cst_102 = arith.constant dense<0.000000e+00> : vector<16x16xf32>
    %287 = tpu.matmul %286, %285, %cst_102 {dimension_numbers = #tpu.dot_dimension_numbers<[1], [0], [0], [1], [0, 0, 1, 1], [], []>} : vector<16x16xf32>, vector<16x16xf32>, vector<16x16xf32> -> vector<16x16xf32>
    %288 = vector.extract_strided_slice %165 {offsets = [0, 112], sizes = [8, 16], strides = [1, 1]} : vector<8x128xf32> to vector<8x16xf32>
    %289 = vector.extract_strided_slice %166 {offsets = [0, 112], sizes = [8, 16], strides = [1, 1]} : vector<8x128xf32> to vector<8x16xf32>
    %cst_103 = arith.constant dense<0.000000e+00> : vector<16x16xf32>
    %290 = tpu.matmul %288, %289, %cst_103 {dimension_numbers = #tpu.dot_dimension_numbers<[0], [0], [1], [1], [0, 1, 1, 1], [], []>} : vector<8x16xf32>, vector<8x16xf32>, vector<16x16xf32> -> vector<16x16xf32>
    %cst_104 = arith.constant 1.250000e-01 : f32
    %291 = vector.broadcast %cst_104 : f32 to vector<16x16xf32>
    %292 = arith.mulf %290, %291 : vector<16x16xf32>
    %cst_105 = arith.constant dense<0xFF800000> : vector<16xf32>
    %293 = vector.multi_reduction <maximumf>, %292, %cst_105 [0] : vector<16x16xf32> to vector<16xf32>
    %294 = vector.shape_cast %293 : vector<16xf32> to vector<1x16xf32>
    %295 = vector.broadcast %294 : vector<1x16xf32> to vector<16x16xf32>
    %296 = arith.subf %292, %295 : vector<16x16xf32>
    %297 = math.exp %296 : vector<16x16xf32>
    %cst_106 = arith.constant dense<0.000000e+00> : vector<16xf32>
    %298 = vector.multi_reduction <add>, %297, %cst_106 [0] : vector<16x16xf32> to vector<16xf32>
    %299 = vector.shape_cast %298 : vector<16xf32> to vector<1x16xf32>
    %300 = vector.broadcast %299 : vector<1x16xf32> to vector<16x16xf32>
    %301 = arith.divf %297, %300 : vector<16x16xf32>
    %302 = arith.addf %301, %168 : vector<16x16xf32>
    %303 = vector.extract_strided_slice %0 {offsets = [0, 112], sizes = [16, 16], strides = [1, 1]} : vector<16x128xf32> to vector<16x16xf32>
    %cst_107 = arith.constant dense<0.000000e+00> : vector<16x16xf32>
    %304 = tpu.matmul %303, %302, %cst_107 {dimension_numbers = #tpu.dot_dimension_numbers<[1], [0], [0], [1], [0, 0, 1, 1], [], []>} : vector<16x16xf32>, vector<16x16xf32>, vector<16x16xf32> -> vector<16x16xf32>
    %305 = tpu.concatenate %185, %202, %219, %236, %253, %270, %287, %304 in 1 : vector<16x16xf32>, vector<16x16xf32>, vector<16x16xf32>, vector<16x16xf32>, vector<16x16xf32>, vector<16x16xf32>, vector<16x16xf32>, vector<16x16xf32> -> vector<16x128xf32>
    %c1_108 = arith.constant 1 : index
    %c0_109 = arith.constant 0 : index
    %c0_110 = arith.constant 0 : index
    %306 = vector.load %arg4[%c1_108, %c0_109, %c0_110] : memref<3x32x16xf32, #tpu.memory_space<vmem>>, vector<1x32x16xf32>
    %307 = vector.shape_cast %306 : vector<1x32x16xf32> to vector<32x16xf32>
    %cst_111 = arith.constant dense<0.000000e+00> : vector<32x128xf32>
    %308 = tpu.matmul %307, %305, %cst_111 {dimension_numbers = #tpu.dot_dimension_numbers<[1], [0], [0], [1], [0, 0, 1, 1], [], []>} : vector<32x16xf32>, vector<16x128xf32>, vector<32x128xf32> -> vector<32x128xf32>
    %309 = arith.addf %157, %308 : vector<32x128xf32>
    %c2 = arith.constant 2 : index
    %c0_112 = arith.constant 0 : index
    %c0_113 = arith.constant 0 : index
    %310 = vector.load %arg2[%c2, %c0_112, %c0_113] : memref<3x16x16xf32, #tpu.memory_space<vmem>>, vector<1x16x16xf32>
    %311 = vector.shape_cast %310 : vector<1x16x16xf32> to vector<16x16xf32>
    %cst_114 = arith.constant dense<0.000000e+00> : vector<16x128xf32>
    %312 = tpu.matmul %311, %0, %cst_114 {dimension_numbers = #tpu.dot_dimension_numbers<[1], [0], [0], [1], [0, 0, 1, 1], [], []>} : vector<16x16xf32>, vector<16x128xf32>, vector<16x128xf32> -> vector<16x128xf32>
    %c2_115 = arith.constant 2 : index
    %c0_116 = arith.constant 0 : index
    %c0_117 = arith.constant 0 : index
    %313 = vector.load %arg3[%c2_115, %c0_116, %c0_117] : memref<3x16x1xf32, #tpu.memory_space<vmem>>, vector<1x16x1xf32>
    %314 = vector.shape_cast %313 : vector<1x16x1xf32> to vector<16x1xf32>
    %315 = vector.broadcast %314 : vector<16x1xf32> to vector<16x128xf32>
    %316 = arith.addf %312, %315 : vector<16x128xf32>
    %317 = vector.extract_strided_slice %316 {offsets = [0, 0], sizes = [8, 128], strides = [1, 1]} : vector<16x128xf32> to vector<8x128xf32>
    %318 = vector.extract_strided_slice %316 {offsets = [8, 0], sizes = [8, 128], strides = [1, 1]} : vector<16x128xf32> to vector<8x128xf32>
    %c2_118 = arith.constant 2 : index
    %c0_119 = arith.constant 0 : index
    %c0_120 = arith.constant 0 : index
    %319 = vector.load %arg5[%c2_118, %c0_119, %c0_120] : memref<3x16x16xf32, #tpu.memory_space<vmem>>, vector<1x16x16xf32>
    %320 = vector.shape_cast %319 : vector<1x16x16xf32> to vector<16x16xf32>
    %321 = vector.extract_strided_slice %317 {offsets = [0, 0], sizes = [8, 16], strides = [1, 1]} : vector<8x128xf32> to vector<8x16xf32>
    %322 = vector.extract_strided_slice %318 {offsets = [0, 0], sizes = [8, 16], strides = [1, 1]} : vector<8x128xf32> to vector<8x16xf32>
    %cst_121 = arith.constant dense<0.000000e+00> : vector<16x16xf32>
    %323 = tpu.matmul %321, %322, %cst_121 {dimension_numbers = #tpu.dot_dimension_numbers<[0], [0], [1], [1], [0, 1, 1, 1], [], []>} : vector<8x16xf32>, vector<8x16xf32>, vector<16x16xf32> -> vector<16x16xf32>
    %cst_122 = arith.constant 1.250000e-01 : f32
    %324 = vector.broadcast %cst_122 : f32 to vector<16x16xf32>
    %325 = arith.mulf %323, %324 : vector<16x16xf32>
    %cst_123 = arith.constant dense<0xFF800000> : vector<16xf32>
    %326 = vector.multi_reduction <maximumf>, %325, %cst_123 [0] : vector<16x16xf32> to vector<16xf32>
    %327 = vector.shape_cast %326 : vector<16xf32> to vector<1x16xf32>
    %328 = vector.broadcast %327 : vector<1x16xf32> to vector<16x16xf32>
    %329 = arith.subf %325, %328 : vector<16x16xf32>
    %330 = math.exp %329 : vector<16x16xf32>
    %cst_124 = arith.constant dense<0.000000e+00> : vector<16xf32>
    %331 = vector.multi_reduction <add>, %330, %cst_124 [0] : vector<16x16xf32> to vector<16xf32>
    %332 = vector.shape_cast %331 : vector<16xf32> to vector<1x16xf32>
    %333 = vector.broadcast %332 : vector<1x16xf32> to vector<16x16xf32>
    %334 = arith.divf %330, %333 : vector<16x16xf32>
    %335 = arith.addf %334, %320 : vector<16x16xf32>
    %336 = vector.extract_strided_slice %0 {offsets = [0, 0], sizes = [16, 16], strides = [1, 1]} : vector<16x128xf32> to vector<16x16xf32>
    %cst_125 = arith.constant dense<0.000000e+00> : vector<16x16xf32>
    %337 = tpu.matmul %336, %335, %cst_125 {dimension_numbers = #tpu.dot_dimension_numbers<[1], [0], [0], [1], [0, 0, 1, 1], [], []>} : vector<16x16xf32>, vector<16x16xf32>, vector<16x16xf32> -> vector<16x16xf32>
    %338 = vector.extract_strided_slice %317 {offsets = [0, 16], sizes = [8, 16], strides = [1, 1]} : vector<8x128xf32> to vector<8x16xf32>
    %339 = vector.extract_strided_slice %318 {offsets = [0, 16], sizes = [8, 16], strides = [1, 1]} : vector<8x128xf32> to vector<8x16xf32>
    %cst_126 = arith.constant dense<0.000000e+00> : vector<16x16xf32>
    %340 = tpu.matmul %338, %339, %cst_126 {dimension_numbers = #tpu.dot_dimension_numbers<[0], [0], [1], [1], [0, 1, 1, 1], [], []>} : vector<8x16xf32>, vector<8x16xf32>, vector<16x16xf32> -> vector<16x16xf32>
    %cst_127 = arith.constant 1.250000e-01 : f32
    %341 = vector.broadcast %cst_127 : f32 to vector<16x16xf32>
    %342 = arith.mulf %340, %341 : vector<16x16xf32>
    %cst_128 = arith.constant dense<0xFF800000> : vector<16xf32>
    %343 = vector.multi_reduction <maximumf>, %342, %cst_128 [0] : vector<16x16xf32> to vector<16xf32>
    %344 = vector.shape_cast %343 : vector<16xf32> to vector<1x16xf32>
    %345 = vector.broadcast %344 : vector<1x16xf32> to vector<16x16xf32>
    %346 = arith.subf %342, %345 : vector<16x16xf32>
    %347 = math.exp %346 : vector<16x16xf32>
    %cst_129 = arith.constant dense<0.000000e+00> : vector<16xf32>
    %348 = vector.multi_reduction <add>, %347, %cst_129 [0] : vector<16x16xf32> to vector<16xf32>
    %349 = vector.shape_cast %348 : vector<16xf32> to vector<1x16xf32>
    %350 = vector.broadcast %349 : vector<1x16xf32> to vector<16x16xf32>
    %351 = arith.divf %347, %350 : vector<16x16xf32>
    %352 = arith.addf %351, %320 : vector<16x16xf32>
    %353 = vector.extract_strided_slice %0 {offsets = [0, 16], sizes = [16, 16], strides = [1, 1]} : vector<16x128xf32> to vector<16x16xf32>
    %cst_130 = arith.constant dense<0.000000e+00> : vector<16x16xf32>
    %354 = tpu.matmul %353, %352, %cst_130 {dimension_numbers = #tpu.dot_dimension_numbers<[1], [0], [0], [1], [0, 0, 1, 1], [], []>} : vector<16x16xf32>, vector<16x16xf32>, vector<16x16xf32> -> vector<16x16xf32>
    %355 = vector.extract_strided_slice %317 {offsets = [0, 32], sizes = [8, 16], strides = [1, 1]} : vector<8x128xf32> to vector<8x16xf32>
    %356 = vector.extract_strided_slice %318 {offsets = [0, 32], sizes = [8, 16], strides = [1, 1]} : vector<8x128xf32> to vector<8x16xf32>
    %cst_131 = arith.constant dense<0.000000e+00> : vector<16x16xf32>
    %357 = tpu.matmul %355, %356, %cst_131 {dimension_numbers = #tpu.dot_dimension_numbers<[0], [0], [1], [1], [0, 1, 1, 1], [], []>} : vector<8x16xf32>, vector<8x16xf32>, vector<16x16xf32> -> vector<16x16xf32>
    %cst_132 = arith.constant 1.250000e-01 : f32
    %358 = vector.broadcast %cst_132 : f32 to vector<16x16xf32>
    %359 = arith.mulf %357, %358 : vector<16x16xf32>
    %cst_133 = arith.constant dense<0xFF800000> : vector<16xf32>
    %360 = vector.multi_reduction <maximumf>, %359, %cst_133 [0] : vector<16x16xf32> to vector<16xf32>
    %361 = vector.shape_cast %360 : vector<16xf32> to vector<1x16xf32>
    %362 = vector.broadcast %361 : vector<1x16xf32> to vector<16x16xf32>
    %363 = arith.subf %359, %362 : vector<16x16xf32>
    %364 = math.exp %363 : vector<16x16xf32>
    %cst_134 = arith.constant dense<0.000000e+00> : vector<16xf32>
    %365 = vector.multi_reduction <add>, %364, %cst_134 [0] : vector<16x16xf32> to vector<16xf32>
    %366 = vector.shape_cast %365 : vector<16xf32> to vector<1x16xf32>
    %367 = vector.broadcast %366 : vector<1x16xf32> to vector<16x16xf32>
    %368 = arith.divf %364, %367 : vector<16x16xf32>
    %369 = arith.addf %368, %320 : vector<16x16xf32>
    %370 = vector.extract_strided_slice %0 {offsets = [0, 32], sizes = [16, 16], strides = [1, 1]} : vector<16x128xf32> to vector<16x16xf32>
    %cst_135 = arith.constant dense<0.000000e+00> : vector<16x16xf32>
    %371 = tpu.matmul %370, %369, %cst_135 {dimension_numbers = #tpu.dot_dimension_numbers<[1], [0], [0], [1], [0, 0, 1, 1], [], []>} : vector<16x16xf32>, vector<16x16xf32>, vector<16x16xf32> -> vector<16x16xf32>
    %372 = vector.extract_strided_slice %317 {offsets = [0, 48], sizes = [8, 16], strides = [1, 1]} : vector<8x128xf32> to vector<8x16xf32>
    %373 = vector.extract_strided_slice %318 {offsets = [0, 48], sizes = [8, 16], strides = [1, 1]} : vector<8x128xf32> to vector<8x16xf32>
    %cst_136 = arith.constant dense<0.000000e+00> : vector<16x16xf32>
    %374 = tpu.matmul %372, %373, %cst_136 {dimension_numbers = #tpu.dot_dimension_numbers<[0], [0], [1], [1], [0, 1, 1, 1], [], []>} : vector<8x16xf32>, vector<8x16xf32>, vector<16x16xf32> -> vector<16x16xf32>
    %cst_137 = arith.constant 1.250000e-01 : f32
    %375 = vector.broadcast %cst_137 : f32 to vector<16x16xf32>
    %376 = arith.mulf %374, %375 : vector<16x16xf32>
    %cst_138 = arith.constant dense<0xFF800000> : vector<16xf32>
    %377 = vector.multi_reduction <maximumf>, %376, %cst_138 [0] : vector<16x16xf32> to vector<16xf32>
    %378 = vector.shape_cast %377 : vector<16xf32> to vector<1x16xf32>
    %379 = vector.broadcast %378 : vector<1x16xf32> to vector<16x16xf32>
    %380 = arith.subf %376, %379 : vector<16x16xf32>
    %381 = math.exp %380 : vector<16x16xf32>
    %cst_139 = arith.constant dense<0.000000e+00> : vector<16xf32>
    %382 = vector.multi_reduction <add>, %381, %cst_139 [0] : vector<16x16xf32> to vector<16xf32>
    %383 = vector.shape_cast %382 : vector<16xf32> to vector<1x16xf32>
    %384 = vector.broadcast %383 : vector<1x16xf32> to vector<16x16xf32>
    %385 = arith.divf %381, %384 : vector<16x16xf32>
    %386 = arith.addf %385, %320 : vector<16x16xf32>
    %387 = vector.extract_strided_slice %0 {offsets = [0, 48], sizes = [16, 16], strides = [1, 1]} : vector<16x128xf32> to vector<16x16xf32>
    %cst_140 = arith.constant dense<0.000000e+00> : vector<16x16xf32>
    %388 = tpu.matmul %387, %386, %cst_140 {dimension_numbers = #tpu.dot_dimension_numbers<[1], [0], [0], [1], [0, 0, 1, 1], [], []>} : vector<16x16xf32>, vector<16x16xf32>, vector<16x16xf32> -> vector<16x16xf32>
    %389 = vector.extract_strided_slice %317 {offsets = [0, 64], sizes = [8, 16], strides = [1, 1]} : vector<8x128xf32> to vector<8x16xf32>
    %390 = vector.extract_strided_slice %318 {offsets = [0, 64], sizes = [8, 16], strides = [1, 1]} : vector<8x128xf32> to vector<8x16xf32>
    %cst_141 = arith.constant dense<0.000000e+00> : vector<16x16xf32>
    %391 = tpu.matmul %389, %390, %cst_141 {dimension_numbers = #tpu.dot_dimension_numbers<[0], [0], [1], [1], [0, 1, 1, 1], [], []>} : vector<8x16xf32>, vector<8x16xf32>, vector<16x16xf32> -> vector<16x16xf32>
    %cst_142 = arith.constant 1.250000e-01 : f32
    %392 = vector.broadcast %cst_142 : f32 to vector<16x16xf32>
    %393 = arith.mulf %391, %392 : vector<16x16xf32>
    %cst_143 = arith.constant dense<0xFF800000> : vector<16xf32>
    %394 = vector.multi_reduction <maximumf>, %393, %cst_143 [0] : vector<16x16xf32> to vector<16xf32>
    %395 = vector.shape_cast %394 : vector<16xf32> to vector<1x16xf32>
    %396 = vector.broadcast %395 : vector<1x16xf32> to vector<16x16xf32>
    %397 = arith.subf %393, %396 : vector<16x16xf32>
    %398 = math.exp %397 : vector<16x16xf32>
    %cst_144 = arith.constant dense<0.000000e+00> : vector<16xf32>
    %399 = vector.multi_reduction <add>, %398, %cst_144 [0] : vector<16x16xf32> to vector<16xf32>
    %400 = vector.shape_cast %399 : vector<16xf32> to vector<1x16xf32>
    %401 = vector.broadcast %400 : vector<1x16xf32> to vector<16x16xf32>
    %402 = arith.divf %398, %401 : vector<16x16xf32>
    %403 = arith.addf %402, %320 : vector<16x16xf32>
    %404 = vector.extract_strided_slice %0 {offsets = [0, 64], sizes = [16, 16], strides = [1, 1]} : vector<16x128xf32> to vector<16x16xf32>
    %cst_145 = arith.constant dense<0.000000e+00> : vector<16x16xf32>
    %405 = tpu.matmul %404, %403, %cst_145 {dimension_numbers = #tpu.dot_dimension_numbers<[1], [0], [0], [1], [0, 0, 1, 1], [], []>} : vector<16x16xf32>, vector<16x16xf32>, vector<16x16xf32> -> vector<16x16xf32>
    %406 = vector.extract_strided_slice %317 {offsets = [0, 80], sizes = [8, 16], strides = [1, 1]} : vector<8x128xf32> to vector<8x16xf32>
    %407 = vector.extract_strided_slice %318 {offsets = [0, 80], sizes = [8, 16], strides = [1, 1]} : vector<8x128xf32> to vector<8x16xf32>
    %cst_146 = arith.constant dense<0.000000e+00> : vector<16x16xf32>
    %408 = tpu.matmul %406, %407, %cst_146 {dimension_numbers = #tpu.dot_dimension_numbers<[0], [0], [1], [1], [0, 1, 1, 1], [], []>} : vector<8x16xf32>, vector<8x16xf32>, vector<16x16xf32> -> vector<16x16xf32>
    %cst_147 = arith.constant 1.250000e-01 : f32
    %409 = vector.broadcast %cst_147 : f32 to vector<16x16xf32>
    %410 = arith.mulf %408, %409 : vector<16x16xf32>
    %cst_148 = arith.constant dense<0xFF800000> : vector<16xf32>
    %411 = vector.multi_reduction <maximumf>, %410, %cst_148 [0] : vector<16x16xf32> to vector<16xf32>
    %412 = vector.shape_cast %411 : vector<16xf32> to vector<1x16xf32>
    %413 = vector.broadcast %412 : vector<1x16xf32> to vector<16x16xf32>
    %414 = arith.subf %410, %413 : vector<16x16xf32>
    %415 = math.exp %414 : vector<16x16xf32>
    %cst_149 = arith.constant dense<0.000000e+00> : vector<16xf32>
    %416 = vector.multi_reduction <add>, %415, %cst_149 [0] : vector<16x16xf32> to vector<16xf32>
    %417 = vector.shape_cast %416 : vector<16xf32> to vector<1x16xf32>
    %418 = vector.broadcast %417 : vector<1x16xf32> to vector<16x16xf32>
    %419 = arith.divf %415, %418 : vector<16x16xf32>
    %420 = arith.addf %419, %320 : vector<16x16xf32>
    %421 = vector.extract_strided_slice %0 {offsets = [0, 80], sizes = [16, 16], strides = [1, 1]} : vector<16x128xf32> to vector<16x16xf32>
    %cst_150 = arith.constant dense<0.000000e+00> : vector<16x16xf32>
    %422 = tpu.matmul %421, %420, %cst_150 {dimension_numbers = #tpu.dot_dimension_numbers<[1], [0], [0], [1], [0, 0, 1, 1], [], []>} : vector<16x16xf32>, vector<16x16xf32>, vector<16x16xf32> -> vector<16x16xf32>
    %423 = vector.extract_strided_slice %317 {offsets = [0, 96], sizes = [8, 16], strides = [1, 1]} : vector<8x128xf32> to vector<8x16xf32>
    %424 = vector.extract_strided_slice %318 {offsets = [0, 96], sizes = [8, 16], strides = [1, 1]} : vector<8x128xf32> to vector<8x16xf32>
    %cst_151 = arith.constant dense<0.000000e+00> : vector<16x16xf32>
    %425 = tpu.matmul %423, %424, %cst_151 {dimension_numbers = #tpu.dot_dimension_numbers<[0], [0], [1], [1], [0, 1, 1, 1], [], []>} : vector<8x16xf32>, vector<8x16xf32>, vector<16x16xf32> -> vector<16x16xf32>
    %cst_152 = arith.constant 1.250000e-01 : f32
    %426 = vector.broadcast %cst_152 : f32 to vector<16x16xf32>
    %427 = arith.mulf %425, %426 : vector<16x16xf32>
    %cst_153 = arith.constant dense<0xFF800000> : vector<16xf32>
    %428 = vector.multi_reduction <maximumf>, %427, %cst_153 [0] : vector<16x16xf32> to vector<16xf32>
    %429 = vector.shape_cast %428 : vector<16xf32> to vector<1x16xf32>
    %430 = vector.broadcast %429 : vector<1x16xf32> to vector<16x16xf32>
    %431 = arith.subf %427, %430 : vector<16x16xf32>
    %432 = math.exp %431 : vector<16x16xf32>
    %cst_154 = arith.constant dense<0.000000e+00> : vector<16xf32>
    %433 = vector.multi_reduction <add>, %432, %cst_154 [0] : vector<16x16xf32> to vector<16xf32>
    %434 = vector.shape_cast %433 : vector<16xf32> to vector<1x16xf32>
    %435 = vector.broadcast %434 : vector<1x16xf32> to vector<16x16xf32>
    %436 = arith.divf %432, %435 : vector<16x16xf32>
    %437 = arith.addf %436, %320 : vector<16x16xf32>
    %438 = vector.extract_strided_slice %0 {offsets = [0, 96], sizes = [16, 16], strides = [1, 1]} : vector<16x128xf32> to vector<16x16xf32>
    %cst_155 = arith.constant dense<0.000000e+00> : vector<16x16xf32>
    %439 = tpu.matmul %438, %437, %cst_155 {dimension_numbers = #tpu.dot_dimension_numbers<[1], [0], [0], [1], [0, 0, 1, 1], [], []>} : vector<16x16xf32>, vector<16x16xf32>, vector<16x16xf32> -> vector<16x16xf32>
    %440 = vector.extract_strided_slice %317 {offsets = [0, 112], sizes = [8, 16], strides = [1, 1]} : vector<8x128xf32> to vector<8x16xf32>
    %441 = vector.extract_strided_slice %318 {offsets = [0, 112], sizes = [8, 16], strides = [1, 1]} : vector<8x128xf32> to vector<8x16xf32>
    %cst_156 = arith.constant dense<0.000000e+00> : vector<16x16xf32>
    %442 = tpu.matmul %440, %441, %cst_156 {dimension_numbers = #tpu.dot_dimension_numbers<[0], [0], [1], [1], [0, 1, 1, 1], [], []>} : vector<8x16xf32>, vector<8x16xf32>, vector<16x16xf32> -> vector<16x16xf32>
    %cst_157 = arith.constant 1.250000e-01 : f32
    %443 = vector.broadcast %cst_157 : f32 to vector<16x16xf32>
    %444 = arith.mulf %442, %443 : vector<16x16xf32>
    %cst_158 = arith.constant dense<0xFF800000> : vector<16xf32>
    %445 = vector.multi_reduction <maximumf>, %444, %cst_158 [0] : vector<16x16xf32> to vector<16xf32>
    %446 = vector.shape_cast %445 : vector<16xf32> to vector<1x16xf32>
    %447 = vector.broadcast %446 : vector<1x16xf32> to vector<16x16xf32>
    %448 = arith.subf %444, %447 : vector<16x16xf32>
    %449 = math.exp %448 : vector<16x16xf32>
    %cst_159 = arith.constant dense<0.000000e+00> : vector<16xf32>
    %450 = vector.multi_reduction <add>, %449, %cst_159 [0] : vector<16x16xf32> to vector<16xf32>
    %451 = vector.shape_cast %450 : vector<16xf32> to vector<1x16xf32>
    %452 = vector.broadcast %451 : vector<1x16xf32> to vector<16x16xf32>
    %453 = arith.divf %449, %452 : vector<16x16xf32>
    %454 = arith.addf %453, %320 : vector<16x16xf32>
    %455 = vector.extract_strided_slice %0 {offsets = [0, 112], sizes = [16, 16], strides = [1, 1]} : vector<16x128xf32> to vector<16x16xf32>
    %cst_160 = arith.constant dense<0.000000e+00> : vector<16x16xf32>
    %456 = tpu.matmul %455, %454, %cst_160 {dimension_numbers = #tpu.dot_dimension_numbers<[1], [0], [0], [1], [0, 0, 1, 1], [], []>} : vector<16x16xf32>, vector<16x16xf32>, vector<16x16xf32> -> vector<16x16xf32>
    %457 = tpu.concatenate %337, %354, %371, %388, %405, %422, %439, %456 in 1 : vector<16x16xf32>, vector<16x16xf32>, vector<16x16xf32>, vector<16x16xf32>, vector<16x16xf32>, vector<16x16xf32>, vector<16x16xf32>, vector<16x16xf32> -> vector<16x128xf32>
    %c2_161 = arith.constant 2 : index
    %c0_162 = arith.constant 0 : index
    %c0_163 = arith.constant 0 : index
    %458 = vector.load %arg4[%c2_161, %c0_162, %c0_163] : memref<3x32x16xf32, #tpu.memory_space<vmem>>, vector<1x32x16xf32>
    %459 = vector.shape_cast %458 : vector<1x32x16xf32> to vector<32x16xf32>
    %cst_164 = arith.constant dense<0.000000e+00> : vector<32x128xf32>
    %460 = tpu.matmul %459, %457, %cst_164 {dimension_numbers = #tpu.dot_dimension_numbers<[1], [0], [0], [1], [0, 0, 1, 1], [], []>} : vector<32x16xf32>, vector<16x128xf32>, vector<32x128xf32> -> vector<32x128xf32>
    %461 = arith.addf %309, %460 : vector<32x128xf32>
    %cst_165 = arith.constant 0.000000e+00 : f32
    %462 = vector.broadcast %cst_165 : f32 to vector<32x128xf32>
    %463 = arith.maximumf %461, %462 : vector<32x128xf32>
    %c0_166 = arith.constant 0 : index
    %c0_167 = arith.constant 0 : index
    %464 = vector.load %arg8[%c0_166, %c0_167] : memref<32x128xf32, #tpu.memory_space<vmem>>, vector<32x128xf32>
    tpu.vector_store %arg8[%c0_166, %c0_167], %463 {strides = array<i32>} : memref<32x128xf32, #tpu.memory_space<vmem>>, vector<32x128xf32>,
    return
  }
  func.func @transform_0(%arg0: i32) -> (i32, i32) {
    %c0_i32 = arith.constant 0 : i32
    %c0_i32_0 = arith.constant 0 : i32
    return %c0_i32, %arg0 : i32, i32
  }
  func.func @transform_1(%arg0: i32) -> (i32, i32, i32) {
    %c0_i32 = arith.constant 0 : i32
    %c0_i32_0 = arith.constant 0 : i32
    %c0_i32_1 = arith.constant 0 : i32
    %c0_i32_2 = arith.constant 0 : i32
    return %c0_i32, %c0_i32_0, %c0_i32_1 : i32, i32, i32
  }
  func.func @transform_2(%arg0: i32) -> (i32, i32, i32) {
    %c0_i32 = arith.constant 0 : i32
    %c0_i32_0 = arith.constant 0 : i32
    %c0_i32_1 = arith.constant 0 : i32
    %c0_i32_2 = arith.constant 0 : i32
    return %c0_i32, %c0_i32_0, %c0_i32_1 : i32, i32, i32
  }
  func.func @transform_3(%arg0: i32) -> (i32, i32, i32) {
    %c0_i32 = arith.constant 0 : i32
    %c0_i32_0 = arith.constant 0 : i32
    %c0_i32_1 = arith.constant 0 : i32
    %c0_i32_2 = arith.constant 0 : i32
    return %c0_i32, %c0_i32_0, %c0_i32_1 : i32, i32, i32
  }
  func.func @transform_4(%arg0: i32) -> (i32, i32, i32) {
    %c0_i32 = arith.constant 0 : i32
    %c0_i32_0 = arith.constant 0 : i32
    %c0_i32_1 = arith.constant 0 : i32
    %c0_i32_2 = arith.constant 0 : i32
    return %c0_i32, %c0_i32_0, %c0_i32_1 : i32, i32, i32
  }
  func.func @transform_5(%arg0: i32) -> (i32, i32) {
    %c0_i32 = arith.constant 0 : i32
    %c0_i32_0 = arith.constant 0 : i32
    %c0_i32_1 = arith.constant 0 : i32
    return %c0_i32, %c0_i32_0 : i32, i32
  }
  func.func @transform_6(%arg0: i32) -> (i32, i32) {
    %c0_i32 = arith.constant 0 : i32
    %c0_i32_0 = arith.constant 0 : i32
    %c0_i32_1 = arith.constant 0 : i32
    return %c0_i32, %c0_i32_0 : i32, i32
  }
  func.func @transform_7(%arg0: i32) -> (i32, i32) {
    %c0_i32 = arith.constant 0 : i32
    %c0_i32_0 = arith.constant 0 : i32
    return %c0_i32, %arg0 : i32, i32
  }
}

</mosaic_0001>

<bundles_post_ra>
// kernel: tpu_custom_call.1
= control target key start
LH: loop header
LB: loop body
LE: loop exit
PB: predicated region body
PF: predicated region fallthrough
CT: control target
= control target key end

     0   :  { %12 = vsyncpa [#allocation4], 0  ;;  %s9131_s0 = inlined_call_operand.vmem [shape: f32[16,256], index: 0, kind: input, shape index: {}]   ;;  %s9132_s1 = inlined_call_operand.vmem [shape: f32[3,16,16], index: 1, kind: input, shape index: {}]   ;;  %s9133_s2 = inlined_call_operand.vmem [shape: f32[3,16,1], index: 2, kind: input, shape index: {}]   ;;  %s9134_s3 = inlined_call_operand.vmem [shape: f32[3,32,16], index: 3, kind: input, shape index: {}]   ;;  %s9135_s4 = inlined_call_operand.vmem [shape: f32[3,16,16], index: 4, kind: input, shape index: {}]   ;;  %s9136_s5 = inlined_call_operand.vmem [shape: f32[32,16], index: 5, kind: input, shape index: {}]   ;;  %s9137_s6 = inlined_call_operand.vmem [shape: f32[32,1], index: 6, kind: input, shape index: {}]   ;;  %s9138_s7 = inlined_call_operand.hbm [shape: f32[32,256], index: 7, kind: output, shape index: {}]  }
   0x1   :  { %14 = vsyncpa [#allocation4 + $0x1], 0  ;;  %s8077_s24 = smov 0   ;;  %s8079_s25 = smov 0  }
   0x2   :  { %s8081_s26 = smov 0   ;;  %s8083_s27 = smov 0  }
   0x3 LB: > { %s9139_s28 = sadd.s32 4294967295, %s8023_s27   ;;  %s6813_s29 = sadd.s32 4294967294, %s8023_s27   ;;  %s8023_s27 = sphi %s8083_s27, %s9150_s27   ;;  %s8019_s26 = sphi %s8081_s26, %s9149_s26   ;;  %s8015_s25 = sphi %s8079_s25, %s9148_s25   ;;  %s8011_s24 = sphi %s8077_s24, %s9147_s24  }
   0x4   : > { %s8100_s30 = sadd.s32 1, %s8023_s27   ;;  %s27_s8 = sadd.s32 1, %s8019_s26 }
   0x5   : > { %s24_s9 = ssub.s32 %s8023_s27, %s8100_s30  ;;  %p34_p0 = scmp.ne.s32.totalorder %s8019_s26, %s8015_s25 }
   0x6   : > { %p25_p1 = scmp.eq.s32.totalorder %s24_s9, 0  ;;  %p35_p2 = scmp.eq.s32.totalorder %s8023_s27, 0 }
   0x7   : > { %p190_p3 = scmp.eq.s32.totalorder %s9139_s28, 1  ;;  %p195_p4 = scmp.ne.s32.totalorder %s8015_s25, %s8011_s24 }
   0x8   : > { %s8113_s10 = scalar_select %p25_p1, %s8019_s26, %s27_s8  }
   0x9   : > { %p36_p5 = por %p35_p2, %p34_p0  ;;  %p8115_p6 = por %p190_p3, %p34_p0 }
   0xa   : > { %p196_p7 = scmp.eq.s32.totalorder %s6813_s29, 1  ;;  %p6815_p9 = scmp.ge.s32.totalorder %s8023_s27, 2 }
   0xc   : > { %p8119_p8 = por %p196_p7, %p195_p4  ;;  %230 = sbr.rel (%p6815_p9) target bundleno = 26 (0x1a), region = 40 }
  0x13   : > { %233 = sbr.rel (!%p36_p5) target bundleno = 26 (0x1a), region = 44  ;;  %s235_s13 = sand.u32 (%p36_p5), 1, %s8019_s26  }
  0x14   : > { %s6817_s14 = sshll.u32 (%p36_p5), %s8023_s27, 3  ;;  %s6816_s15 = sshll.u32 (%p36_p5), %s235_s13, 4 }
  0x15   : > { %s239_s18 = scalar_lea.vmem (%p36_p5), %s9131_s0, %s6817_s14  ;;  %s237_s19 = scalar_lea.vmem (%p36_p5), [#allocation2], %s6816_s15 }
  0x16   : > { %v269_v0 = vld [vmem:[%s239_s18] sm:$0xff] (%p36_p5)  ;;  %v271_v1 = vld [vmem:[%s239_s18 + $0x10] sm:$0xff] (%p36_p5) }
  0x17   : > { %270 = vst [vmem:[%s237_s19] sm:$0xff] (%p36_p5), %v269_v0  ;;  %272 = vst [vmem:[%s237_s19 + $0x8] sm:$0xff] (%p36_p5), %v271_v1 }
  0x1a PF: > { %p6818_p10 = scmp.ge.s32.totalorder %s8023_s27, 1  ;;  %p277_p11 = scmp.lt.s32.totalorder %s8023_s27, 3 }
  0x1c   : > { %p278_p12 = pnand %p6818_p10, %p277_p11 }
  0x1d   : > { %s8134_s20 = sand.u32 (!%p278_p12), 1, %s8015_s25   ;;  %v317_v2 = vld [vmem:[%s9136_s5] sm:$0xff] (!%p278_p12)  ;;  %vm345_vm0 = vcmask (!%p278_p12), 130048   ;;  %v8025_v3 = vmov (!%p278_p12), 0   ;;  %v446_v8 = vld [vmem:[%s9133_s2 + $0x8] sm:$0xff] (!%p278_p12)  ;;  %v319_v10 = vld [vmem:[%s9136_s5 + $0x10] sm:$0xff] (!%p278_p12) }
  0x1e   : > { %281 = sbr.rel (%p278_p12) target bundleno = 2972 (0xb9c), region = 82  ;;  %s6819_s23 = sshll.u32 (!%p278_p12), %s8134_s20, 4  ;;  %7171 = vmatprep.mubr.msk.f32.mxu1 (!%p278_p12), %vm345_vm0, %v317_v2  ;;  %7707 = vset.pattern.permute.xlu0 (!%p278_p12), %v8025_v3  ;;  %v445_v4 = vld [vmem:[%s9133_s2] sm:$0xff] (!%p278_p12)  ;;  %v318_v9 = vld [vmem:[%s9136_s5 + $0x8] sm:$0xff] (!%p278_p12)  ;;  %v320_v11 = vld [vmem:[%s9136_s5 + $0x18] sm:$0xff] (!%p278_p12)  ;;  %vm572_vm1 = vcmask (!%p278_p12), 64512  }
  0x1f   : > { %s8145_s9 = scalar_lea.vmem (!%p278_p12), [#allocation2], %s6819_s23  ;;  %449 = vperm.xlu0 (!%p278_p12), %7707, %v445_v4   ;;  %v443_v12 = vld [vmem:[%s9132_s1] sm:$0xff] (!%p278_p12)  ;;  %v444_v13 = vld [vmem:[%s9132_s1 + $0x8] sm:$0xff] (!%p278_p12)  ;;  %s9141_s13 = smov (!%p278_p12), 96   ;;  %v6866_v32 = vld [vmem:[%s9133_s2 + $0x18] sm:$0xff] (!%p278_p12)  ;;  %vm2457_vm2 = vcmask (!%p278_p12), 261120  }
  0x20   : > { %v8148_v5 = vld [vmem:[%s8145_s9] sm:$0xff] (!%p278_p12)  ;;  %v8151_v6 = vld [vmem:[%s8145_s9 + $0x8] sm:$0xff] (!%p278_p12)  ;;  %s9140_s14 = smov (!%p278_p12), 112   ;;  %s8028_s15 = smov (!%p278_p12), 64   ;;  %vm2460_vm3 = vcmask (!%p278_p12), 392192   ;;  %vm2463_vm4 = vcmask (!%p278_p12), 523264  }
  0x21   : > { %v8155_v7 = vpack.c.bf16 (!%p278_p12), %v8151_v6, %v8148_v5  ;;  %s8029_s16 = smov (!%p278_p12), 80   ;;  %s8030_s17 = smov (!%p278_p12), 48   ;;  %v6865_v40 = vld [vmem:[%s9133_s2 + $0x10] sm:$0xff] (!%p278_p12)  ;;  %v6864_v57 = vld [vmem:[%s9132_s1 + $0x18] sm:$0xff] (!%p278_p12)  ;;  %vm2466_vm5 = vcmask (!%p278_p12), 654336   ;;  %vm2469_vm6 = vcmask (!%p278_p12), 785408  }
  0x22   : > { %s8031_s18 = smov (!%p278_p12), 32   ;;  %s8032_s19 = smov (!%p278_p12), 16   ;;  %v6863_v55 = vld [vmem:[%s9132_s1 + $0x10] sm:$0xff] (!%p278_p12)  ;;  %vm2472_vm7 = vcmask (!%p278_p12), 916480  }
  0x23   : > { %7517 = vmatprep.subr.bf16.mxu1 (!%p278_p12), %v8155_v7  ;;  %454 = vperm.xlu0 (!%p278_p12), %7707, %v446_v8   ;;  %s9146_s22 = sadd.s32 (!%p278_p12), 4294967295, %s8023_s27   ;;  %s8033_s28 = smov (!%p278_p12), [#allocation3]  }
  0x24   : > { %7519 = vmatpush3.bf16.msra.mxu1 (!%p278_p12), %v8155_v7  ;;  %s7965_s29 = sshll.u32 (!%p278_p12), %s8033_s28, 4  ;;  %s7966_s29 = int_to_ptr.vmem [resolvable:$false] %s7965_s29 }
  0x25   : > { %7521 = vmatprep.subr.bf16.mxu1 %v8155_v7  ;;  %s7967_s8 = scalar_lea.vmem %s7966_s29, 1024 }
  0x27   : > { %7172 = vmatmul.mubr.msk.f32.vlgmr.msra.gmra.mrb[0].mxu1 %vm345_vm0, %v318_v9 }
  0x28   : > { %7523 = vmatpush3.bf16.msra.mxu1 %v8155_v7  ;;  %7174 = vmatprep.mubr.msk.f32.mxu1 %vm345_vm0, %v319_v10 }
  0x2b   : > { %7175 = vmatmul.mubr.msk.f32.gmra.mrb[2].mxu1 %vm345_vm0, %v320_v11 }
  0x2c   : > { %7181 = vmatprep.mubr.msk.f32.mxu1 %vm345_vm0, %v443_v12 }
  0x2f   : > { %7182 = vmatmul.mubr.msk.f32.vlgmr.msra.gmra.mrb[4].mxu1 %vm345_vm0, %v444_v13 }
  0x9e   : > { %v450_v16 = vpop.permute.xlu0 %449 }
  0xa2   : > { %v455_v19 = vpop.permute.xlu0 %454 }
  0xfa   : > { %v8184_v14 = vpop.f32.mrb[0].mxu1 }
  0xfb   : > { %v8186_v15 = vpop.f32.mrb[1].mxu1 }
  0xfe   : > { %v8188_v17 = vpop.f32.mrb[2].mxu1 }
  0xff   : > { %v8190_v18 = vpop.f32.mrb[3].mxu1 }
 0x102   : > { %v7183_v20 = vpop.f32.mrb[4].mxu1 }
 0x103   : > { %v535_v21 = vadd.f32 %v7183_v20, %v455_v19  ;;  %v529_v22 = vpop.f32.mrb[5].mxu1 }
 0x104   : > { %v530_v23 = vadd.f32 %v529_v22, %v450_v16 }
 0x105   : > { %1036 = vrot.lane.b32.xlu0 %v535_v21, %s9141_s13  ;;  %803 = vrot.lane.b32.xlu1 %v535_v21, %s9140_s14 }
 0x106   : > { %7184 = vmatprep.subr.mxu0 %v535_v21 }
 0x107   : > { %7185 = vmatpush3.msra.mxu0 %v535_v21 }
 0x109   : > { %1502 = vrot.lane.b32.xlu0 %v535_v21, %s8028_s15  ;;  %1269 = vrot.lane.b32.xlu1 %v535_v21, %s8029_s16 }
 0x10d   : > { %1735 = vrot.lane.b32.xlu1 %v535_v21, %s8030_s17  ;;  %1234 = vrot.lane.b32.xlu0 %v530_v23, %s8029_s16 }
 0x111   : > { %1968 = vrot.lane.b32.xlu1 %v535_v21, %s8031_s18  ;;  %1700 = vrot.lane.b32.xlu0 %v530_v23, %s8030_s17 }
 0x115   : > { %2166 = vrot.lane.b32.xlu0 %v530_v23, %s8032_s19  ;;  %767 = vrot.lane.b32.xlu1 %v530_v23, %s9140_s14 }
 0x119   : > { %1001 = vrot.lane.b32.xlu1 %v530_v23, %s9141_s13 }
 0x11d   : > { %1467 = vrot.lane.b32.xlu1 %v530_v23, %s8028_s15 }
 0x121   : > { %1933 = vrot.lane.b32.xlu1 %v530_v23, %s8031_s18 }
 0x133   : > { %540 = vxpose.xlu0.b32.start.end [1/1] (short) (narrow) %v530_v23, 16 }
 0x160   : > { %2201 = vrot.lane.b32.xlu0 %v535_v21, %s8032_s19 }
 0x164   : > { %918 = vrot.lane.b32.xlu0 %v8148_v5, %s9140_s14 }
 0x168   : > { %1151 = vrot.lane.b32.xlu0 %v8148_v5, %s9141_s13 }
 0x16c   : > { %1153 = vrot.lane.b32.xlu0 %v8151_v6, %s9141_s13 }
 0x170   : > { %1384 = vrot.lane.b32.xlu0 %v8148_v5, %s8029_s16 }
 0x174   : > { %1386 = vrot.lane.b32.xlu0 %v8151_v6, %s8029_s16 }
 0x177   : > { %v804_v24 = vpop.permute.xlu1 %803  ;;  %v1037_v25 = vpop.permute.xlu0 %1036 }
 0x178   : > { %7196 = vmatprep.subr.mxu1 %v804_v24  ;;  %1617 = vrot.lane.b32.xlu0 %v8148_v5, %s8028_s15 }
 0x179   : > { %7197 = vmatpush3.msra.mxu1 %v804_v24 }
 0x17a   : > { %7208 = vmatprep.subr.mxu1 %v1037_v25 }
 0x17b   : > { %v1270_v26 = vpop.permute.xlu1 %1269  ;;  %v1503_v30 = vpop.permute.xlu0 %1502 }
 0x17c   : > { %1619 = vrot.lane.b32.xlu0 %v8151_v6, %s8028_s15 }
 0x17f   : > { %v1736_v27 = vpop.permute.xlu1 %1735  ;;  %v1235_v33 = vpop.permute.xlu0 %1234 }
 0x180   : > { %1850 = vrot.lane.b32.xlu0 %v8148_v5, %s8030_s17 }
 0x183   : > { %v1969_v28 = vpop.permute.xlu1 %1968  ;;  %v1701_v35 = vpop.permute.xlu0 %1700 }
 0x184   : > { %1852 = vrot.lane.b32.xlu0 %v8151_v6, %s8030_s17 }
 0x187   : > { %v768_v29 = vpop.permute.xlu1 %767  ;;  %v2167_v37 = vpop.permute.xlu0 %2166 }
 0x188   : > { %2085 = vrot.lane.b32.xlu0 %v8151_v6, %s8031_s18  ;;  %770 = vxpose.xlu1.b32.start.end [1/1] (short) (narrow) %v768_v29, 16  ;;  %v8276_v29 = vld [vmem:[%s9135_s4] sm:$0xff] }
 0x18b   : > { %v1002_v31 = vpop.permute.xlu1 %1001 }
 0x18c   : > { %2318 = vrot.lane.b32.xlu0 %v8151_v6, %s8032_s19 }
 0x18d   : > { %1004 = vxpose.xlu1.b32.start.end [1/1] (short) (narrow) %v1002_v31, 16 }
 0x18f   : > { %v1468_v34 = vpop.permute.xlu1 %1467 }
 0x190   : > { %2593 = vperm.xlu0 %7707, %v6866_v32  }
 0x192   : > { %1237 = vxpose.xlu1.b32.start.end [1/1] (short) (narrow) %v1235_v33, 16 }
 0x193   : > { %v1934_v36 = vpop.permute.xlu1 %1933 }
 0x197   : > { %1470 = vxpose.xlu1.b32.start.end [1/1] (short) (narrow) %v1468_v34, 16 }
 0x19c   : > { %1703 = vxpose.xlu1.b32.start.end [1/1] (short) (narrow) %v1701_v35, 16 }
 0x1a1   : > { %1936 = vxpose.xlu1.b32.start.end [1/1] (short) (narrow) %v1934_v36, 16 }
 0x1a6   : > { %2169 = vxpose.xlu1.b32.start.end [1/1] (short) (narrow) %v2167_v37, 16 }
 0x1b3   : > { %v556_v38 = vpop.trf.xlu0 }
 0x1b4   : > { %7186 = vmatprep.mubr.msk.f32.mxu0 %vm572_vm1, %v556_v38 }
 0x1b7   : > { %v557_v39 = vpop.trf.xlu0 }
 0x1b8   : > { %7187 = vmatmul.mubr.msk.f32.vlgmr.msra.gmra.mrb[0].mxu0 %vm572_vm1, %v557_v39 }
 0x1b9   : > { %7193 = vmatprep.mubr.msk.f32.mxu0 %vm345_vm0, %v8148_v5 }
 0x1c4   : > { %7708 = vset.pattern.permute.xlu1 %v8025_v3 }
 0x1c8   : > { %920 = vrot.lane.b32.xlu1 %v8151_v6, %s9140_s14 }
 0x1cc   : > { %2083 = vrot.lane.b32.xlu1 %v8148_v5, %s8031_s18 }
 0x1d0   : > { %2316 = vrot.lane.b32.xlu1 %v8148_v5, %s8032_s19 }
 0x1d2   : > { %v2202_v51 = vpop.permute.xlu0 %2201 }
 0x1d4   : > { %2588 = vperm.xlu1 %7708, %v6865_v40  }
 0x1d6   : > { %v8285_v36 = vpop.permute.xlu0 %918 }
 0x1da   : > { %v8291_v37 = vpop.permute.xlu0 %1151 }
 0x1de   : > { %v8293_v38 = vpop.permute.xlu0 %1153 }
 0x208   : > { %v786_v41 = vpop.trf.xlu1 }
 0x209   : > { %7198 = vmatprep.mubr.msk.f32.mxu1 %vm572_vm1, %v786_v41 }
 0x20c   : > { %v787_v42 = vpop.trf.xlu1 }
 0x20d   : > { %7199 = vmatmul.mubr.msk.f32.vlgmr.msra.gmra.mrb[6].mxu1 %vm572_vm1, %v787_v42 }
 0x20e   : > { %7209 = vmatpush3.msra.mxu1 %v1037_v25 }
 0x20f   : > { %7220 = vmatprep.subr.mxu1 %v1270_v26 }
 0x210   : > { %v1020_v43 = vpop.trf.xlu1 }
 0x211   : > { %7210 = vmatprep.mubr.msk.f32.mxu1 %vm572_vm1, %v1020_v43 }
 0x214   : > { %v1021_v44 = vpop.trf.xlu1 }
 0x215   : > { %7211 = vmatmul.mubr.msk.f32.vlgmr.msra.gmra.mrb[8].mxu1 %vm572_vm1, %v1021_v44 }
 0x216   : > { %7221 = vmatpush3.msra.mxu1 %v1270_v26 }
 0x217   : > { %7232 = vmatprep.subr.mxu1 %v1503_v30 }
 0x218   : > { %v1253_v45 = vpop.trf.xlu1 }
 0x219   : > { %7222 = vmatprep.mubr.msk.f32.mxu1 %vm572_vm1, %v1253_v45  ;;  %v8297_v45 = vpop.permute.xlu0 %1384 }
 0x21c   : > { %v1254_v46 = vpop.trf.xlu1 }
 0x21d   : > { %7223 = vmatmul.mubr.msk.f32.vlgmr.msra.gmra.mrb[10].mxu1 %vm572_vm1, %v1254_v46 }
 0x21e   : > { %7233 = vmatpush3.msra.mxu1 %v1503_v30  ;;  %v8281_v30 = vld [vmem:[%s9135_s4 + $0x8] sm:$0xff] }
 0x21f   : > { %7244 = vmatprep.subr.mxu1 %v1736_v27 }
 0x220   : > { %v1486_v47 = vpop.trf.xlu1 }
 0x221   : > { %7234 = vmatprep.mubr.msk.f32.mxu1 %vm572_vm1, %v1486_v47 }
 0x224   : > { %v1487_v48 = vpop.trf.xlu1 }
 0x225   : > { %7235 = vmatmul.mubr.msk.f32.vlgmr.msra.gmra.mrb[12].mxu1 %vm572_vm1, %v1487_v48 }
 0x226   : > { %7245 = vmatpush3.msra.mxu1 %v1736_v27 }
 0x227   : > { %7256 = vmatprep.subr.mxu1 %v1969_v28 }
 0x228   : > { %v1719_v49 = vpop.trf.xlu1 }
 0x229   : > { %7246 = vmatprep.mubr.msk.f32.mxu1 %vm572_vm1, %v1719_v49 }
 0x22c   : > { %v1720_v50 = vpop.trf.xlu1 }
 0x22d   : > { %7247 = vmatmul.mubr.msk.f32.vlgmr.msra.gmra.mrb[14].mxu1 %vm572_vm1, %v1720_v50 }
 0x22e   : > { %7257 = vmatpush3.msra.mxu1 %v1969_v28 }
 0x22f   : > { %7268 = vmatprep.subr.mxu1 %v2202_v51 }
 0x230   : > { %v1952_v52 = vpop.trf.xlu1 }
 0x231   : > { %7258 = vmatprep.mubr.msk.f32.mxu1 %vm572_vm1, %v1952_v52  ;;  %v8299_v52 = vpop.permute.xlu0 %1386 }
 0x234   : > { %v1953_v53 = vpop.trf.xlu1 }
 0x235   : > { %7259 = vmatmul.mubr.msk.f32.vlgmr.msra.gmra.mrb[16].mxu1 %vm572_vm1, %v1953_v53 }
 0x236   : > { %7269 = vmatpush3.msra.mxu1 %v2202_v51 }
 0x237   : > { %7561 = vmatprep.subr.bf16.mxu1 %v8155_v7 }
 0x238   : > { %v2185_v54 = vpop.trf.xlu1 }
 0x239   : > { %7270 = vmatprep.mubr.msk.f32.mxu1 %vm572_vm1, %v2185_v54 }
 0x23c   : > { %v2186_v56 = vpop.trf.xlu1 }
 0x23d   : > { %7271 = vmatmul.mubr.msk.f32.vlgmr.msra.gmra.mrb[18].mxu1 %vm572_vm1, %v2186_v56 }
 0x23e   : > { %7563 = vmatpush3.bf16.msra.mxu1 %v8155_v7  ;;  %7294 = vmatprep.mubr.msk.f32.mxu1 %vm345_vm0, %v6863_v55 }
 0x241   : > { %7295 = vmatmul.mubr.msk.f32.vlgmr.msra.gmra.mrb[20].mxu1 %vm345_vm0, %v6864_v57 }
 0x28b   : > { %v7188_v58 = vpop.f32.mrb[0].mxu0 }
 0x28c   : > { %v655_v59 = vmul.f32 0.125, %v7188_v58  ;;  %v645_v60 = vpop.f32.mrb[1].mxu0 }
 0x28d   : > { %v654_v61 = vmul.f32 0.125, %v645_v60 }
 0x28e   : > { %v657_v62 = vsel %vm345_vm0, %v655_v59, -inf }
 0x28f   : > { %v656_v63 = vsel %vm345_vm0, %v654_v61, -inf }
 0x290   : > { %v658_v0 = vmax.f32 %v656_v63, %v657_v62 }
 0x292   : > { %v659_v1 = vrot.slane %v658_v0, 4 }
 0x294   : > { %v660_v2 = vmax.f32 %v658_v0, %v659_v1 }
 0x296   : > { %v661_v3 = vrot.slane %v660_v2, 2 }
 0x298   : > { %v662_v4 = vmax.f32 %v660_v2, %v661_v3 }
 0x29a   : > { %v663_v5 = vrot.slane %v662_v4, 1 }
 0x29c   : > { %v664_v8 = vmax.f32 %v662_v4, %v663_v5 }
 0x29e   : > { %v665_v9 = vsub.f32 %v654_v61, %v664_v8  ;;  %v666_v10 = vsub.f32 %v655_v59, %v664_v8  ;;  %v8303_v61 = vpop.permute.xlu0 %1617 }
 0x2a0   : > { %v667_v11 = vmul.f32 1.442695, %v665_v9  ;;  %v669_v12 = vmul.f32 1.442695, %v666_v10 }
 0x2a2   : > { %7814 = vpow2.f32 %v667_v11 }
 0x2a3   : > { %7816 = vpow2.f32 %v669_v12 }
 0x2ac   : > { %v7815_v13 = vpop.eup %7814 }
 0x2ad   : > { %v7817_v16 = vpop.eup %7816  ;;  %v671_v19 = vsel %vm345_vm0, %v7815_v13, 0.0 }
 0x2ae   : > { %v672_v20 = vsel %vm345_vm0, %v7817_v16, 0.0 }
 0x2af   : > { %v673_v21 = vadd.f32 %v672_v20, %v671_v19 }
 0x2b1   : > { %v674_v22 = vrot.slane %v673_v21, 4 }
 0x2b3   : > { %v675_v23 = vadd.f32 %v674_v22, %v673_v21 }
 0x2b5   : > { %v676_v24 = vrot.slane %v675_v23, 2 }
 0x2b7   : > { %v677_v25 = vadd.f32 %v676_v24, %v675_v23 }
 0x2b9   : > { %v678_v26 = vrot.slane %v677_v25, 1 }
 0x2bb   : > { %v679_v27 = vadd.f32 %v678_v26, %v677_v25 }
 0x2bd   : > { %7818 = vrcp.f32 %v679_v27 }
 0x2c7   : > { %v7819_v28 = vpop.eup %7818 }
 0x2c8   : > { %v681_v31 = vmul.f32 %v7819_v28, %v7815_v13  ;;  %v682_v32 = vmul.f32 %v7819_v28, %v7817_v16  ;;  %v8307_v16 = vpop.permute.xlu0 %1619 }
 0x2ca   : > { %v683_v33 = vadd.f32 %v681_v31, %v8276_v29  ;;  %v684_v34 = vadd.f32 %v682_v32, %v8281_v30 }
 0x2cc   : > { %v7524_v35 = vpack.c.bf16 %v684_v34, %v683_v33  ;;  %v8317_v34 = vpop.permute.xlu0 %1850 }
 0x2ce   : > { %7525 = vmatprep.subr.bf16.mxu0 %v7524_v35 }
 0x2cf   : > { %7527 = vmatpush3.bf16.msra.mxu0 %v7524_v35 }
 0x2d2   : > { %7194 = vmatmul.mubr.msk.f32.vlgmr.msra.gmra.mrb[2].mxu0 %vm345_vm0, %v8151_v6 }
 0x2d3   : > { %7205 = vmatprep.mubr.msk.f32.mxu0 %vm345_vm0, %v8285_v36 }
 0x2e0   : > { %v7200_v39 = vpop.f32.mrb[6].mxu1 }
 0x2e1   : > { %v888_v40 = vmul.f32 0.125, %v7200_v39  ;;  %v878_v41 = vpop.f32.mrb[7].mxu1 }
 0x2e2   : > { %v887_v42 = vmul.f32 0.125, %v878_v41 }
 0x2e3   : > { %v890_v43 = vsel %vm345_vm0, %v888_v40, -inf }
 0x2e4   : > { %v889_v44 = vsel %vm345_vm0, %v887_v42, -inf }
 0x2e5   : > { %v891_v46 = vmax.f32 %v889_v44, %v890_v43 }
 0x2e7   : > { %v892_v47 = vrot.slane %v891_v46, 4 }
 0x2e8   : > { %v7212_v6 = vpop.f32.mrb[8].mxu1 }
 0x2e9   : > { %v893_v48 = vmax.f32 %v891_v46, %v892_v47  ;;  %v1121_v49 = vmul.f32 0.125, %v7212_v6  ;;  %v1111_v50 = vpop.f32.mrb[9].mxu1 }
 0x2ea   : > { %v1120_v51 = vmul.f32 0.125, %v1111_v50  ;;  %v8323_v50 = vpop.permute.xlu1 %920 }
 0x2eb   : > { %v894_v53 = vrot.slane %v893_v48, 2  ;;  %v1123_v54 = vsel %vm345_vm0, %v1121_v49, -inf }
 0x2ec   : > { %v1122_v55 = vsel %vm345_vm0, %v1120_v51, -inf }
 0x2ed   : > { %v895_v56 = vmax.f32 %v893_v48, %v894_v53  ;;  %v1124_v57 = vmax.f32 %v1122_v55, %v1123_v54  ;;  %v8331_v55 = vpop.permute.xlu0 %1852 }
 0x2ef   : > { %v896_v58 = vrot.slane %v895_v56, 1  ;;  %v1125_v59 = vrot.slane %v1124_v57, 4 }
 0x2f0   : > { %v7224_v60 = vpop.f32.mrb[10].mxu1 }
 0x2f1   : > { %v897_v62 = vmax.f32 %v895_v56, %v896_v58  ;;  %v1126_v63 = vmax.f32 %v1124_v57, %v1125_v59  ;;  %v1354_v0 = vmul.f32 0.125, %v7224_v60  ;;  %v1344_v1 = vpop.f32.mrb[11].mxu1 }
 0x2f2   : > { %v1353_v2 = vmul.f32 0.125, %v1344_v1 }
 0x2f3   : > { %v898_v3 = vsub.f32 %v887_v42, %v897_v62  ;;  %v899_v4 = vsub.f32 %v888_v40, %v897_v62  ;;  %v1127_v5 = vrot.slane %v1126_v63, 2  ;;  %v1356_v8 = vsel %vm345_vm0, %v1354_v0, -inf }
 0x2f4   : > { %v1355_v9 = vsel %vm345_vm0, %v1353_v2, -inf }
 0x2f5   : > { %v900_v10 = vmul.f32 1.442695, %v898_v3  ;;  %v902_v11 = vmul.f32 1.442695, %v899_v4  ;;  %v1128_v12 = vmax.f32 %v1126_v63, %v1127_v5  ;;  %v1357_v13 = vmax.f32 %v1355_v9, %v1356_v8 }
 0x2f7   : > { %7820 = vpow2.f32 %v900_v10  ;;  %v1129_v19 = vrot.slane %v1128_v12, 1  ;;  %v1358_v20 = vrot.slane %v1357_v13, 4 }
 0x2f8   : > { %7822 = vpow2.f32 %v902_v11  ;;  %v7236_v21 = vpop.f32.mrb[12].mxu1  ;;  %v8339_v11 = vpop.permute.xlu1 %2083 }
 0x2f9   : > { %v1130_v22 = vmax.f32 %v1128_v12, %v1129_v19  ;;  %v1359_v23 = vmax.f32 %v1357_v13, %v1358_v20  ;;  %v8309_v24 = vmul.f32 0.125, %v7236_v21  ;;  %v1577_v25 = vpop.f32.mrb[13].mxu1  ;;  %v8343_v13 = vpop.permute.xlu0 %2085 }
 0x2fa   : > { %v8311_v26 = vmul.f32 0.125, %v1577_v25 }
 0x2fb   : > { %v1131_v27 = vsub.f32 %v1120_v51, %v1130_v22  ;;  %v1132_v28 = vsub.f32 %v1121_v49, %v1130_v22  ;;  %v1360_v31 = vrot.slane %v1359_v23, 2  ;;  %v1589_v32 = vsel %vm345_vm0, %v8309_v24, -inf }
 0x2fc   : > { %v1588_v33 = vsel %vm345_vm0, %v8311_v26, -inf }
 0x2fd   : > { %v1133_v35 = vmul.f32 1.442695, %v1131_v27  ;;  %v1135_v39 = vmul.f32 1.442695, %v1132_v28  ;;  %v1361_v40 = vmax.f32 %v1359_v23, %v1360_v31  ;;  %v1590_v41 = vmax.f32 %v1588_v33, %v1589_v32 }
 0x2ff   : > { %7824 = vpow2.f32 %v1133_v35  ;;  %v1362_v42 = vrot.slane %v1361_v40, 1  ;;  %v1591_v43 = vrot.slane %v1590_v41, 4 }
 0x300   : > { %7826 = vpow2.f32 %v1135_v39  ;;  %v7248_v44 = vpop.f32.mrb[14].mxu1 }
 0x301   : > { %v8319_v46 = vpop.eup %7820  ;;  %v1363_v47 = vmax.f32 %v1361_v40, %v1362_v42  ;;  %v1592_v6 = vmax.f32 %v1590_v41, %v1591_v43  ;;  %v8321_v48 = vmul.f32 0.125, %v7248_v44  ;;  %v1810_v49 = vpop.f32.mrb[15].mxu1 }
 0x302   : > { %v8325_v51 = vpop.eup %7822  ;;  %v904_v53 = vsel %vm345_vm0, %v8319_v46, 0.0  ;;  %v8329_v54 = vmul.f32 0.125, %v1810_v49  ;;  %v8361_v49 = vpop.permute.xlu1 %2316 }
 0x303   : > { %v905_v56 = vsel %vm345_vm0, %v8325_v51, 0.0  ;;  %v1364_v57 = vsub.f32 %v1353_v2, %v1363_v47  ;;  %v1365_v58 = vsub.f32 %v1354_v0, %v1363_v47  ;;  %v1593_v59 = vrot.slane %v1592_v6, 2 }
 0x304   : > { %v906_v60 = vadd.f32 %v905_v56, %v904_v53  ;;  %v1822_v62 = vsel %vm345_vm0, %v8321_v48, -inf  ;;  %v1821_v63 = vsel %vm345_vm0, %v8329_v54, -inf }
 0x305   : > { %v1366_v1 = vmul.f32 1.442695, %v1364_v57  ;;  %v1368_v3 = vmul.f32 1.442695, %v1365_v58  ;;  %v1594_v4 = vmax.f32 %v1592_v6, %v1593_v59  ;;  %v1823_v5 = vmax.f32 %v1821_v63, %v1822_v62 }
 0x306   : > { %v907_v8 = vrot.slane %v906_v60, 4 }
 0x307   : > { %7828 = vpow2.f32 %v1366_v1  ;;  %v1595_v9 = vrot.slane %v1594_v4, 1  ;;  %v1824_v10 = vrot.slane %v1823_v5, 4 }
 0x308   : > { %v908_v2 = vadd.f32 %v907_v8, %v906_v60  ;;  %7830 = vpow2.f32 %v1368_v3  ;;  %v7260_v0 = vpop.f32.mrb[16].mxu1 }
 0x309   : > { %v8341_v12 = vpop.eup %7824  ;;  %v1596_v19 = vmax.f32 %v1594_v4, %v1595_v9  ;;  %v1825_v20 = vmax.f32 %v1823_v5, %v1824_v10  ;;  %v8345_v21 = vmul.f32 0.125, %v7260_v0  ;;  %v2043_v22 = vpop.f32.mrb[17].mxu1 }
 0x30a   : > { %v8347_v23 = vpop.eup %7826  ;;  %v909_v25 = vrot.slane %v908_v2, 2  ;;  %v1137_v27 = vsel %vm345_vm0, %v8341_v12, 0.0  ;;  %v8351_v28 = vmul.f32 0.125, %v2043_v22  ;;  %v2589_v22 = vpop.permute.xlu1 %2588 }
 0x30b   : > { %v1138_v31 = vsel %vm345_vm0, %v8347_v23, 0.0  ;;  %v1597_v32 = vsub.f32 %v8311_v26, %v1596_v19  ;;  %v1598_v33 = vsub.f32 %v8309_v24, %v1596_v19  ;;  %v1826_v35 = vrot.slane %v1825_v20, 2  ;;  %v8363_v26 = vpop.permute.xlu0 %2318 }
 0x30c   : > { %v910_v39 = vadd.f32 %v909_v25, %v908_v2  ;;  %v1139_v40 = vadd.f32 %v1138_v31, %v1137_v27  ;;  %v2055_v41 = vsel %vm345_vm0, %v8345_v21, -inf  ;;  %v2054_v42 = vsel %vm345_vm0, %v8351_v28, -inf }
 0x30d   : > { %v1599_v43 = vmul.f32 1.442695, %v1597_v32  ;;  %v1601_v44 = vmul.f32 1.442695, %v1598_v33  ;;  %v1827_v47 = vmax.f32 %v1825_v20, %v1826_v35  ;;  %v2056_v6 = vmax.f32 %v2054_v42, %v2055_v41 }
 0x30e   : > { %v1140_v53 = vrot.slane %v1139_v40, 4  ;;  %v911_v56 = vrot.slane %v910_v39, 1 }
 0x30f   : > { %7832 = vpow2.f32 %v1599_v43  ;;  %v1828_v24 = vrot.slane %v1827_v47, 1  ;;  %v2057_v57 = vrot.slane %v2056_v6, 4  ;;  %v2594_v35 = vpop.permute.xlu0 %2593 }
 0x310   : > { %v1141_v58 = vadd.f32 %v1140_v53, %v1139_v40  ;;  %7834 = vpow2.f32 %v1601_v44  ;;  %v7272_v59 = vpop.f32.mrb[18].mxu1  ;;  %v912_v60 = vadd.f32 %v911_v56, %v910_v39 }
 0x311   : > { %v8365_v62 = vpop.eup %7828  ;;  %v1829_v63 = vmax.f32 %v1827_v47, %v1828_v24  ;;  %v2058_v1 = vmax.f32 %v2056_v6, %v2057_v57  ;;  %v8367_v3 = vmul.f32 0.125, %v7272_v59  ;;  %v2276_v4 = vpop.f32.mrb[19].mxu1 }
 0x312   : > { %v8369_v5 = vpop.eup %7830  ;;  %v1142_v8 = vrot.slane %v1141_v58, 2  ;;  %v1370_v9 = vsel %vm345_vm0, %v8365_v62, 0.0  ;;  %v8373_v10 = vmul.f32 0.125, %v2276_v4  ;;  %7836 = vrcp.f32 %v912_v60 }
 0x313   : > { %v1371_v2 = vsel %vm345_vm0, %v8369_v5, 0.0  ;;  %v1830_v0 = vsub.f32 %v8329_v54, %v1829_v63  ;;  %v1831_v19 = vsub.f32 %v8321_v48, %v1829_v63  ;;  %v2059_v20 = vrot.slane %v2058_v1, 2 }
 0x314   : > { %v1143_v25 = vadd.f32 %v1142_v8, %v1141_v58  ;;  %v1372_v27 = vadd.f32 %v1371_v2, %v1370_v9  ;;  %v2288_v31 = vsel %vm345_vm0, %v8367_v3, -inf  ;;  %v2287_v32 = vsel %vm345_vm0, %v8373_v10, -inf  ;;  %v7296_v33 = vpop.f32.mrb[20].mxu1 }
 0x315   : > { %v1832_v39 = vmul.f32 1.442695, %v1830_v0  ;;  %v1834_v40 = vmul.f32 1.442695, %v1831_v19  ;;  %v2060_v41 = vmax.f32 %v2058_v1, %v2059_v20  ;;  %v2289_v42 = vmax.f32 %v2287_v32, %v2288_v31  ;;  %v2668_v43 = vpop.f32.mrb[21].mxu1 }
 0x316   : > { %v1373_v54 = vrot.slane %v1372_v27, 4  ;;  %v8383_v44 = vadd.f32 %v7296_v33, %v2594_v35  ;;  %v8385_v48 = vadd.f32 %v2668_v43, %v2589_v22  ;;  %v1144_v47 = vrot.slane %v1143_v25, 1 }
 0x317   : > { %7838 = vpow2.f32 %v1832_v39  ;;  %v2061_v6 = vrot.slane %v2060_v41, 1  ;;  %v2290_v53 = vrot.slane %v2289_v42, 4 }
 0x318   : > { %v1374_v56 = vadd.f32 %v1373_v54, %v1372_v27  ;;  %7840 = vpow2.f32 %v1834_v40  ;;  %3161 = vrot.lane.b32.xlu0 %v8383_v44, %s9141_s13  ;;  %7297 = vmatprep.subr.mxu1 %v8383_v44  ;;  %v1145_v24 = vadd.f32 %v1144_v47, %v1143_v25 }
 0x319   : > { %v8390_v57 = vpop.eup %7832  ;;  %v2062_v58 = vmax.f32 %v2060_v41, %v2061_v6  ;;  %v2291_v59 = vmax.f32 %v2289_v42, %v2290_v53  ;;  %7298 = vmatpush3.msra.mxu1 %v8383_v44  ;;  %2900 = vrot.lane.b32.xlu1 %v8385_v48, %s9140_s14 }
 0x31a   : > { %v8395_v60 = vpop.eup %7834  ;;  %v1375_v63 = vrot.slane %v1374_v56, 2  ;;  %v1603_v1 = vsel %vm345_vm0, %v8390_v57, 0.0  ;;  %7842 = vrcp.f32 %v1145_v24 }
 0x31b   : > { %v1604_v4 = vsel %vm345_vm0, %v8395_v60, 0.0  ;;  %v2063_v8 = vsub.f32 %v8351_v28, %v2062_v58  ;;  %v2064_v9 = vsub.f32 %v8345_v21, %v2062_v58  ;;  %v2292_v2 = vrot.slane %v2291_v59, 2 }
 0x31c   : > { %v7837_v0 = vpop.eup %7836  ;;  %v1376_v19 = vadd.f32 %v1375_v63, %v1374_v56  ;;  %v1605_v20 = vadd.f32 %v1604_v4, %v1603_v1  ;;  %3611 = vrot.lane.b32.xlu0 %v8383_v44, %s8028_s15 }
 0x31d   : > { %v2065_v22 = vmul.f32 1.442695, %v2063_v8  ;;  %v2067_v25 = vmul.f32 1.442695, %v2064_v9  ;;  %v2293_v27 = vmax.f32 %v2291_v59, %v2292_v2  ;;  %v914_v31 = vmul.f32 %v7837_v0, %v8319_v46 }
 0x31e   : > { %v1606_v32 = vrot.slane %v1605_v20, 4  ;;  %v915_v33 = vmul.f32 %v7837_v0, %v8325_v51  ;;  %v1377_v35 = vrot.slane %v1376_v19, 1 }
 0x31f   : > { %7844 = vpow2.f32 %v2065_v22  ;;  %v2294_v28 = vrot.slane %v2293_v27, 1  ;;  %v916_v21 = vadd.f32 %v914_v31, %v8276_v29 }
 0x320   : > { %v1607_v39 = vadd.f32 %v1606_v32, %v1605_v20  ;;  %7846 = vpow2.f32 %v2067_v25  ;;  %3126 = vrot.lane.b32.xlu0 %v8385_v48, %s9141_s13  ;;  %v917_v40 = vadd.f32 %v915_v33, %v8281_v30  ;;  %v1378_v41 = vadd.f32 %v1377_v35, %v1376_v19 }
 0x321   : > { %v8411_v42 = vpop.eup %7838  ;;  %v2295_v43 = vmax.f32 %v2293_v27, %v2294_v28 }
 0x322   : > { %v8413_v46 = vpop.eup %7840  ;;  %v1608_v54 = vrot.slane %v1607_v39, 2  ;;  %v1836_v51 = vsel %vm345_vm0, %v8411_v42, 0.0  ;;  %v7528_v47 = vpack.c.bf16 %v917_v40, %v916_v21  ;;  %7848 = vrcp.f32 %v1378_v41 }
 0x323   : > { %v1837_v6 = vsel %vm345_vm0, %v8413_v46, 0.0  ;;  %v2296_v53 = vsub.f32 %v8373_v10, %v2295_v43  ;;  %v2297_v56 = vsub.f32 %v8367_v3, %v2295_v43 }
 0x324   : > { %v7843_v24 = vpop.eup %7842  ;;  %v1609_v58 = vadd.f32 %v1608_v54, %v1607_v39  ;;  %v1838_v59 = vadd.f32 %v1837_v6, %v1836_v51  ;;  %7529 = vmatprep.subr.bf16.mxu0 %v7528_v47  ;;  %3576 = vrot.lane.b32.xlu0 %v8385_v48, %s8028_s15 }
 0x325   : > { %v2298_v63 = vmul.f32 1.442695, %v2296_v53  ;;  %v2300_v1 = vmul.f32 1.442695, %v2297_v56  ;;  %7531 = vmatpush3.bf16.msra.mxu0 %v7528_v47  ;;  %v1147_v4 = vmul.f32 %v7843_v24, %v8341_v12  ;;  %v1148_v8 = vmul.f32 %v7843_v24, %v8347_v23 }
 0x326   : > { %v1839_v9 = vrot.slane %v1838_v59, 4  ;;  %v1610_v2 = vrot.slane %v1609_v58, 1 }
 0x327   : > { %7850 = vpow2.f32 %v2298_v63  ;;  %v1149_v10 = vadd.f32 %v1147_v4, %v8276_v29  ;;  %v1150_v3 = vadd.f32 %v1148_v8, %v8281_v30 }
 0x328   : > { %v1840_v0 = vadd.f32 %v1839_v9, %v1838_v59  ;;  %7852 = vpow2.f32 %v2300_v1  ;;  %7206 = vmatmul.mubr.msk.f32.vlgmr.msra.gmra.mrb[4].mxu0 %vm345_vm0, %v8323_v50  ;;  %v1611_v19 = vadd.f32 %v1610_v2, %v1609_v58  ;;  %3801 = vrot.lane.b32.xlu0 %v8385_v48, %s8030_s17 }
 0x329   : > { %v8431_v20 = vpop.eup %7844  ;;  %v7532_v12 = vpack.c.bf16 %v1150_v3, %v1149_v10  ;;  %7217 = vmatprep.mubr.msk.f32.mxu0 %vm345_vm0, %v8291_v37 }
 0x32a   : > { %v8435_v23 = vpop.eup %7846  ;;  %v1841_v22 = vrot.slane %v1840_v0, 2  ;;  %v2069_v25 = vsel %vm345_vm0, %v8431_v20, 0.0  ;;  %7854 = vrcp.f32 %v1611_v19 }
 0x32b   : > { %v2070_v27 = vsel %vm345_vm0, %v8435_v23, 0.0  ;;  %7533 = vmatprep.subr.bf16.mxu0 %v7532_v12 }
 0x32c   : > { %v7849_v31 = vpop.eup %7848  ;;  %v1842_v32 = vadd.f32 %v1841_v22, %v1840_v0  ;;  %v2071_v33 = vadd.f32 %v2070_v27, %v2069_v25  ;;  %7535 = vmatpush3.bf16.msra.mxu0 %v7532_v12  ;;  %4251 = vrot.lane.b32.xlu0 %v8385_v48, %s8032_s19 }
 0x32d   : > { %v1380_v35 = vmul.f32 %v7849_v31, %v8365_v62  ;;  %v1381_v28 = vmul.f32 %v7849_v31, %v8369_v5 }
 0x32e   : > { %v2072_v21 = vrot.slane %v2071_v33, 4  ;;  %v1843_v39 = vrot.slane %v1842_v32, 1 }
 0x32f   : > { %7218 = vmatmul.mubr.msk.f32.vlgmr.msra.gmra.mrb[6].mxu0 %vm345_vm0, %v8293_v38  ;;  %v1382_v40 = vadd.f32 %v1380_v35, %v8276_v29  ;;  %v1383_v41 = vadd.f32 %v1381_v28, %v8281_v30 }
 0x330   : > { %v2073_v43 = vadd.f32 %v2072_v21, %v2071_v33  ;;  %7229 = vmatprep.mubr.msk.f32.mxu0 %vm345_vm0, %v8297_v45  ;;  %v1844_v54 = vadd.f32 %v1843_v39, %v1842_v32 }
 0x331   : > { %v7851_v51 = vpop.eup %7850  ;;  %v7536_v47 = vpack.c.bf16 %v1383_v41, %v1382_v40 }
 0x332   : > { %v7853_v6 = vpop.eup %7852  ;;  %v2074_v62 = vrot.slane %v2073_v43, 2  ;;  %v2302_v5 = vsel %vm345_vm0, %v7851_v51, 0.0  ;;  %7856 = vrcp.f32 %v1844_v54 }
 0x333   : > { %v2303_v53 = vsel %vm345_vm0, %v7853_v6, 0.0  ;;  %7537 = vmatprep.subr.bf16.mxu0 %v7536_v47 }
 0x334   : > { %v7855_v56 = vpop.eup %7854  ;;  %v2075_v24 = vadd.f32 %v2074_v62, %v2073_v43  ;;  %v2304_v58 = vadd.f32 %v2303_v53, %v2302_v5  ;;  %7539 = vmatpush3.bf16.msra.mxu0 %v7536_v47 }
 0x335   : > { %v1613_v59 = vmul.f32 %v7855_v56, %v8390_v57  ;;  %v1614_v63 = vmul.f32 %v7855_v56, %v8395_v60 }
 0x336   : > { %v2305_v1 = vrot.slane %v2304_v58, 4  ;;  %v2076_v4 = vrot.slane %v2075_v24, 1 }
 0x337   : > { %7230 = vmatmul.mubr.msk.f32.vlgmr.msra.gmra.mrb[8].mxu0 %vm345_vm0, %v8299_v52  ;;  %v1615_v8 = vadd.f32 %v1613_v59, %v8276_v29  ;;  %v1616_v9 = vadd.f32 %v1614_v63, %v8281_v30 }
 0x338   : > { %v2306_v2 = vadd.f32 %v2305_v1, %v2304_v58  ;;  %7241 = vmatprep.mubr.msk.f32.mxu0 %vm345_vm0, %v8303_v61  ;;  %v2077_v10 = vadd.f32 %v2076_v4, %v2075_v24 }
 0x339   : > { %v7540_v3 = vpack.c.bf16 %v1616_v9, %v1615_v8 }
 0x33a   : > { %v2307_v0 = vrot.slane %v2306_v2, 2  ;;  %7858 = vrcp.f32 %v2077_v10 }
 0x33b   : > { %7541 = vmatprep.subr.bf16.mxu0 %v7540_v3 }
 0x33c   : > { %v7857_v57 = vpop.eup %7856  ;;  %v2308_v60 = vadd.f32 %v2307_v0, %v2306_v2  ;;  %7543 = vmatpush3.bf16.msra.mxu0 %v7540_v3 }
 0x33d   : > { %v1846_v19 = vmul.f32 %v7857_v57, %v8411_v42  ;;  %v1847_v12 = vmul.f32 %v7857_v57, %v8413_v46 }
 0x33e   : > { %v2309_v22 = vrot.slane %v2308_v60, 1 }
 0x33f   : > { %7242 = vmatmul.mubr.msk.f32.vlgmr.msra.gmra.mrb[10].mxu0 %vm345_vm0, %v8307_v16  ;;  %v1848_v25 = vadd.f32 %v1846_v19, %v8276_v29  ;;  %v1849_v27 = vadd.f32 %v1847_v12, %v8281_v30  ;;  %v2475_v19 = vld [vmem:[%s9134_s3] sm:$0xff] }
 0x340   : > { %7253 = vmatprep.mubr.msk.f32.mxu0 %vm345_vm0, %v8317_v34  ;;  %v2310_v31 = vadd.f32 %v2309_v22, %v2308_v60 }
 0x341   : > { %v7544_v32 = vpack.c.bf16 %v1849_v27, %v1848_v25 }
 0x342   : > { %7860 = vrcp.f32 %v2310_v31 }
 0x343   : > { %7545 = vmatprep.subr.bf16.mxu0 %v7544_v32 }
 0x344   : > { %v7859_v33 = vpop.eup %7858  ;;  %7547 = vmatpush3.bf16.msra.mxu0 %v7544_v32 }
 0x345   : > { %v2079_v42 = vmul.f32 %v7859_v33, %v8431_v20  ;;  %v2080_v46 = vmul.f32 %v7859_v33, %v8435_v23 }
 0x347   : > { %7254 = vmatmul.mubr.msk.f32.vlgmr.msra.gmra.mrb[12].mxu0 %vm345_vm0, %v8331_v55  ;;  %v2081_v35 = vadd.f32 %v2079_v42, %v8276_v29  ;;  %v2082_v28 = vadd.f32 %v2080_v46, %v8281_v30 }
 0x348   : > { %7265 = vmatprep.mubr.msk.f32.mxu0 %vm345_vm0, %v8339_v11 }
 0x349   : > { %v7548_v21 = vpack.c.bf16 %v2082_v28, %v2081_v35  ;;  %v6913_v28 = vld [vmem:[%s9133_s2 + $0x20] sm:$0xff] }
 0x34b   : > { %7549 = vmatprep.subr.bf16.mxu0 %v7548_v21 }
 0x34c   : > { %v7861_v39 = vpop.eup %7860  ;;  %7551 = vmatpush3.bf16.msra.mxu0 %v7548_v21 }
 0x34d   : > { %v2312_v40 = vmul.f32 %v7861_v39, %v7851_v51  ;;  %v2313_v41 = vmul.f32 %v7861_v39, %v7853_v6 }
 0x34f   : > { %7266 = vmatmul.mubr.msk.f32.vlgmr.msra.gmra.mrb[14].mxu0 %vm345_vm0, %v8343_v13  ;;  %v2314_v20 = vadd.f32 %v2312_v40, %v8276_v29  ;;  %v2315_v23 = vadd.f32 %v2313_v41, %v8281_v30 }
 0x350   : > { %7277 = vmatprep.mubr.msk.f32.mxu0 %vm345_vm0, %v8361_v49 }
 0x351   : > { %v7552_v43 = vpack.c.bf16 %v2315_v23, %v2314_v20 }
 0x353   : > { %7553 = vmatprep.subr.bf16.mxu0 %v7552_v43 }
 0x354   : > { %7555 = vmatpush3.bf16.msra.mxu0 %v7552_v43 }
 0x357   : > { %7278 = vmatmul.mubr.msk.f32.vlgmr.msra.gmra.mrb[16].mxu0 %vm345_vm0, %v8363_v26 }
 0x358   : > { %7284 = vmatprep.mubr.msk.f32.mxu0 %vm345_vm0, %v2475_v19 }
 0x38a   : > { %v8485_v54 = vpop.permute.xlu0 %3161 }
 0x38b   : > { %v2901_v51 = vpop.permute.xlu1 %2900 }
 0x38c   : > { %2903 = vxpose.xlu1.b32.start.end [1/1] (short) (narrow) %v2901_v51, 16 }
 0x38e   : > { %v8487_v47 = vpop.permute.xlu0 %3611 }
 0x392   : > { %v3127_v6 = vpop.permute.xlu0 %3126 }
 0x393   : > { %3129 = vxpose.xlu1.b32.start.end [1/1] (short) (narrow) %v3127_v6, 16 }
 0x396   : > { %v3577_v46 = vpop.permute.xlu0 %3576 }
 0x39a   : > { %v3802_v35 = vpop.permute.xlu0 %3801 }
 0x39e   : > { %v4252_v41 = vpop.permute.xlu0 %4251 }
 0x3a5   : > { %v8489_v29 = vpop.f32.mrb[2].mxu0 }
 0x3a6   : > { %v8491_v30 = vpop.f32.mrb[3].mxu0 }
 0x3b5   : > { %3351 = vrot.lane.b32.xlu1 %v8385_v48, %s8029_s16 }
 0x3fb   : > { %v7207_v62 = vpop.f32.mrb[4].mxu0 }
 0x3fc   : > { %v992_v5 = vpop.f32.mrb[5].mxu0 }
 0x3fd   : > { %v7724_v53 = vpack.i.bf16 %v7207_v62, %v992_v5 }
 0x3ff   : > { %7725 = vrot.lane.b32.xlu1 %v7724_v53, %s8032_s19 }
 0x402   : > { %v7219_v56 = vpop.f32.mrb[6].mxu0 }
 0x403   : > { %v1225_v24 = vpop.f32.mrb[7].mxu0 }
 0x404   : > { %v7729_v58 = vpack.i.bf16 %v7219_v56, %v1225_v24 }
 0x406   : > { %7730 = vrot.lane.b32.xlu1 %v7729_v58, %s8031_s18 }
 0x40a   : > { %v7231_v59 = vpop.f32.mrb[8].mxu0 }
 0x40b   : > { %v1458_v63 = vpop.f32.mrb[9].mxu0 }
 0x40c   : > { %v7709_v1 = vpack.i.bf16 %v7231_v59, %v1458_v63  ;;  %v8516_v27 = vpop.trf.xlu1 }
 0x40e   : > { %7710 = vrot.lane.b32.xlu0 %v7709_v1, %s8030_s17 }
 0x410   : > { %v8518_v31 = vpop.trf.xlu1 }
 0x412   : > { %v7243_v4 = vpop.f32.mrb[10].mxu0 }
 0x413   : > { %v1691_v8 = vpop.f32.mrb[11].mxu0 }
 0x414   : > { %v7734_v9 = vpack.i.bf16 %v7243_v4, %v1691_v8  ;;  %v8521_v32 = vpop.trf.xlu1 }
 0x416   : > { %7735 = vrot.lane.b32.xlu1 %v7734_v9, %s8028_s15 }
 0x418   : > { %v8523_v33 = vpop.trf.xlu1 }
 0x41a   : > { %v7255_v2 = vpop.f32.mrb[12].mxu0  ;;  %4026 = vrot.lane.b32.xlu1 %v8385_v48, %s8031_s18 }
 0x41b   : > { %v1924_v10 = vpop.f32.mrb[13].mxu0 }
 0x41c   : > { %v7714_v3 = vpack.i.bf16 %v7255_v2, %v1924_v10 }
 0x41e   : > { %7715 = vrot.lane.b32.xlu0 %v7714_v3, %s8029_s16  ;;  %2936 = vrot.lane.b32.xlu1 %v8383_v44, %s9140_s14 }
 0x422   : > { %v7267_v0 = vpop.f32.mrb[14].mxu0  ;;  %3386 = vrot.lane.b32.xlu1 %v8383_v44, %s8029_s16 }
 0x423   : > { %v2157_v57 = vpop.f32.mrb[15].mxu0 }
 0x424   : > { %v7719_v60 = vpack.i.bf16 %v7267_v0, %v2157_v57 }
 0x426   : > { %7720 = vrot.lane.b32.xlu0 %v7719_v60, %s9141_s13  ;;  %3836 = vrot.lane.b32.xlu1 %v8383_v44, %s8030_s17 }
 0x427   : > { %v3352_v42 = vpop.permute.xlu1 %3351 }
 0x42a   : > { %v7279_v12 = vpop.f32.mrb[16].mxu0  ;;  %4061 = vrot.lane.b32.xlu1 %v8383_v44, %s8031_s18 }
 0x42b   : > { %v2390_v22 = vpop.f32.mrb[17].mxu0 }
 0x42c   : > { %v7739_v25 = vpack.i.bf16 %v7279_v12, %v2390_v22 }
 0x42e   : > { %7740 = vrot.lane.b32.xlu1 %v7739_v25, %s9140_s14 }
 0x444   : > { %2680 = vxpose.xlu0.b32.start.end [1/1] (short) (narrow) %v8385_v48, 16 }
 0x457   : > { %3354 = vxpose.xlu1.b32.start.end [1/1] (short) (narrow) %v3352_v42, 16 }
 0x45c   : > { %3579 = vxpose.xlu1.b32.start.end [1/1] (short) (narrow) %v3577_v46, 16 }
 0x461   : > { %3804 = vxpose.xlu1.b32.start.end [1/1] (short) (narrow) %v3802_v35, 16 }
 0x471   : > { %4286 = vrot.lane.b32.xlu0 %v8383_v44, %s8032_s19  ;;  %v7726_v21 = vpop.permute.xlu1 %7725 }
 0x472   : > { %v7728_v62 = vunpack.i.h.bf16 %v7726_v21  ;;  %v7727_v44 = vunpack.i.l.bf16 %v7726_v21 }
 0x474   : > { %v2456_v4 = vsel %vm345_vm0, %v8489_v29, %v7728_v62  ;;  %v2455_v8 = vsel %vm345_vm0, %v8491_v30, %v7727_v44 }
 0x475   : > { %4660 = vperm.xlu0 %7707, %v6913_v28  }
 0x478   : > { %v7731_v48 = vpop.permute.xlu1 %7730 }
 0x479   : > { %v7733_v5 = vunpack.i.h.bf16 %v7731_v48  ;;  %v7732_v53 = vunpack.i.l.bf16 %v7731_v48 }
 0x47b   : > { %v2458_v10 = vsel %vm2457_vm2, %v2455_v8, %v7732_v53  ;;  %v2459_v3 = vsel %vm2457_vm2, %v2456_v4, %v7733_v5 }
 0x480   : > { %v7711_v23 = vpop.permute.xlu0 %7710 }
 0x481   : > { %v7713_v56 = vunpack.i.h.bf16 %v7711_v23  ;;  %v7712_v24 = vunpack.i.l.bf16 %v7711_v23  ;;  %v2478_v23 = vld [vmem:[%s9134_s3 + $0x18] sm:$0xff] }
 0x483   : > { %v2461_v60 = vsel %vm2460_vm3, %v2458_v10, %v7712_v24  ;;  %v2462_v19 = vsel %vm2460_vm3, %v2459_v3, %v7713_v56 }
 0x488   : > { %v7736_v39 = vpop.permute.xlu1 %7735 }
 0x489   : > { %v7738_v59 = vunpack.i.h.bf16 %v7736_v39  ;;  %v7737_v63 = vunpack.i.l.bf16 %v7736_v39 }
 0x48b   : > { %v2464_v12 = vsel %vm2463_vm4, %v2461_v60, %v7737_v63  ;;  %v2465_v29 = vsel %vm2463_vm4, %v2462_v19, %v7738_v59 }
 0x48c   : > { %v4027_v40 = vpop.permute.xlu1 %4026 }
 0x48d   : > { %4029 = vxpose.xlu1.b32.start.end [1/1] (short) (narrow) %v4027_v40, 16  ;;  %v2476_v40 = vld [vmem:[%s9134_s3 + $0x8] sm:$0xff] }
 0x490   : > { %v2937_v20 = vpop.permute.xlu1 %2936  ;;  %v7716_v51 = vpop.permute.xlu0 %7715 }
 0x491   : > { %v7718_v9 = vunpack.i.h.bf16 %v7716_v51  ;;  %v7717_v2 = vunpack.i.l.bf16 %v7716_v51  ;;  %v6914_v51 = vld [vmem:[%s9133_s2 + $0x28] sm:$0xff] }
 0x492   : > { %4254 = vxpose.xlu1.b32.start.end [1/1] (short) (narrow) %v4252_v41, 16  ;;  %v2477_v41 = vld [vmem:[%s9134_s3 + $0x10] sm:$0xff] }
 0x493   : > { %v2467_v30 = vsel %vm2466_vm5, %v2464_v12, %v7717_v2  ;;  %v2468_v25 = vsel %vm2466_vm5, %v2465_v29, %v7718_v9 }
 0x494   : > { %v3387_v43 = vpop.permute.xlu1 %3386 }
 0x498   : > { %v8530_v6 = vpop.permute.xlu1 %3836  ;;  %v7721_v58 = vpop.permute.xlu0 %7720 }
 0x499   : > { %v7723_v0 = vunpack.i.h.bf16 %v7721_v58  ;;  %v7722_v57 = vunpack.i.l.bf16 %v7721_v58 }
 0x49b   : > { %v2470_v35 = vsel %vm2469_vm6, %v2467_v30, %v7722_v57  ;;  %v2471_v28 = vsel %vm2469_vm6, %v2468_v25, %v7723_v0 }
 0x49c   : > { %v8532_v1 = vpop.permute.xlu1 %4061 }
 0x4a0   : > { %v7741_v22 = vpop.permute.xlu1 %7740 }
 0x4a1   : > { %v7743_v42 = vunpack.i.h.bf16 %v7741_v22  ;;  %v7742_v46 = vunpack.i.l.bf16 %v7741_v22 }
 0x4a3   : > { %v2473_v21 = vsel %vm2472_vm7, %v2470_v35, %v7742_v46  ;;  %v2474_v48 = vsel %vm2472_vm7, %v2471_v28, %v7743_v42 }
 0x4a4   : > { %v7556_v39 = vpack.c.bf16 %v2474_v48, %v2473_v21 }
 0x4a6   : > { %7557 = vmatprep.subr.bf16.mxu0 %v7556_v39 }
 0x4a7   : > { %7559 = vmatpush3.bf16.msra.mxu0 %v7556_v39 }
 0x4a8   : > { %7309 = vmatprep.subr.mxu0 %v2937_v20 }
 0x4aa   : > { %7285 = vmatmul.mubr.msk.f32.vlgmr.msra.gmra.mrb[18].mxu0 %vm345_vm0, %v2476_v40 }
 0x4ab   : > { %7310 = vmatpush3.msra.mxu0 %v2937_v20  ;;  %7287 = vmatprep.mubr.msk.f32.mxu0 %vm345_vm0, %v2477_v41 }
 0x4ac   : > { %7321 = vmatprep.subr.mxu0 %v8485_v54 }
 0x4ae   : > { %7288 = vmatmul.mubr.msk.f32.gmra.mrb[20].mxu0 %vm345_vm0, %v2478_v23 }
 0x4af   : > { %7311 = vmatprep.mubr.msk.f32.mxu0 %vm572_vm1, %v8516_v27 }
 0x4b2   : > { %7312 = vmatmul.mubr.msk.f32.vlgmr.msra.gmra.mrb[22].mxu0 %vm572_vm1, %v8518_v31  ;;  %v7958_v31 = vld [vmem:[%s8145_s9] sm:$0xff] }
 0x4b3   : > { %7322 = vmatpush3.msra.mxu0 %v8485_v54  ;;  %7323 = vmatprep.mubr.msk.f32.mxu0 %vm572_vm1, %v8521_v32 }
 0x4b4   : > { %7333 = vmatprep.subr.mxu0 %v3387_v43  ;;  %4665 = vperm.xlu1 %7708, %v6914_v51  }
 0x4b6   : > { %7324 = vmatmul.mubr.msk.f32.vlgmr.msra.gmra.mrb[24].mxu0 %vm572_vm1, %v8523_v33 }
 0x4b7   : > { %7334 = vmatpush3.msra.mxu0 %v3387_v43 }
 0x4b8   : > { %7345 = vmatprep.subr.mxu0 %v8487_v47 }
 0x4c4   : > { %v2696_v27 = vpop.trf.xlu0 }
 0x4c5   : > { %7299 = vmatprep.mubr.msk.f32.mxu1 %vm572_vm1, %v2696_v27 }
 0x4c8   : > { %v2697_v20 = vpop.trf.xlu0 }
 0x4c9   : > { %7300 = vmatmul.mubr.msk.f32.vlgmr.msra.gmra.mrb[22].mxu1 %vm572_vm1, %v2697_v20 }
 0x4ca   : > { %7306 = vmatprep.mubr.msk.f32.mxu1 %vm345_vm0, %v7958_v31 }
 0x4d7   : > { %v3370_v54 = vpop.trf.xlu1 }
 0x4d8   : > { %7335 = vmatprep.mubr.msk.f32.mxu0 %vm572_vm1, %v3370_v54 }
 0x4db   : > { %v3371_v32 = vpop.trf.xlu1 }
 0x4dc   : > { %7336 = vmatmul.mubr.msk.f32.vlgmr.msra.gmra.mrb[26].mxu0 %vm572_vm1, %v3371_v32 }
 0x4dd   : > { %7346 = vmatpush3.msra.mxu0 %v8487_v47 }
 0x4de   : > { %7357 = vmatprep.subr.mxu0 %v8530_v6 }
 0x4df   : > { %v3595_v33 = vpop.trf.xlu1 }
 0x4e0   : > { %7347 = vmatprep.mubr.msk.f32.mxu0 %vm572_vm1, %v3595_v33 }
 0x4e3   : > { %v3596_v43 = vpop.trf.xlu1  ;;  %v4287_v5 = vpop.permute.xlu0 %4286 }
 0x4e4   : > { %7348 = vmatmul.mubr.msk.f32.vlgmr.msra.gmra.mrb[28].mxu0 %vm572_vm1, %v3596_v43 }
 0x4e5   : > { %7358 = vmatpush3.msra.mxu0 %v8530_v6 }
 0x4e6   : > { %7369 = vmatprep.subr.mxu0 %v8532_v1 }
 0x4e7   : > { %v3820_v62 = vpop.trf.xlu1 }
 0x4e8   : > { %7359 = vmatprep.mubr.msk.f32.mxu0 %vm572_vm1, %v3820_v62 }
 0x4eb   : > { %v3821_v44 = vpop.trf.xlu1 }
 0x4ec   : > { %7360 = vmatmul.mubr.msk.f32.vlgmr.msra.gmra.mrb[30].mxu0 %vm572_vm1, %v3821_v44 }
 0x4ed   : > { %7370 = vmatpush3.msra.mxu0 %v8532_v1 }
 0x4ee   : > { %7381 = vmatprep.subr.mxu0 %v4287_v5 }
 0x50d   : > { %v4045_v47 = vpop.trf.xlu1 }
 0x50e   : > { %7371 = vmatprep.mubr.msk.f32.mxu0 %vm572_vm1, %v4045_v47 }
 0x511   : > { %v4046_v53 = vpop.trf.xlu1 }
 0x512   : > { %7372 = vmatmul.mubr.msk.f32.vlgmr.msra.gmra.mrb[32].mxu0 %vm572_vm1, %v4046_v53 }
 0x513   : > { %7382 = vmatpush3.msra.mxu0 %v4287_v5 }
 0x515   : > { %v4270_v6 = vpop.trf.xlu1 }
 0x516   : > { %7383 = vmatprep.mubr.msk.f32.mxu0 %vm572_vm1, %v4270_v6 }
 0x519   : > { %v4271_v56 = vpop.trf.xlu1 }
 0x51a   : > { %7384 = vmatmul.mubr.msk.f32.vlgmr.msra.gmra.mrb[34].mxu0 %vm572_vm1, %v4271_v56 }
 0x585   : > { %v7313_v24 = vpop.f32.mrb[22].mxu0 }
 0x586   : > { %v3021_v58 = vmul.f32 0.125, %v7313_v24  ;;  %v3011_v59 = vpop.f32.mrb[23].mxu0 }
 0x587   : > { %v3020_v63 = vmul.f32 0.125, %v3011_v59 }
 0x588   : > { %v3023_v1 = vsel %vm345_vm0, %v3021_v58, -inf }
 0x589   : > { %v3022_v4 = vsel %vm345_vm0, %v3020_v63, -inf  ;;  %v7325_v8 = vpop.f32.mrb[24].mxu0 }
 0x58a   : > { %v3024_v9 = vmax.f32 %v3022_v4, %v3023_v1  ;;  %v3246_v2 = vmul.f32 0.125, %v7325_v8  ;;  %v3236_v10 = vpop.f32.mrb[25].mxu0 }
 0x58b   : > { %v3245_v3 = vmul.f32 0.125, %v3236_v10 }
 0x58c   : > { %v3025_v0 = vrot.slane %v3024_v9, 4  ;;  %v3248_v57 = vsel %vm345_vm0, %v3246_v2, -inf }
 0x58d   : > { %v3247_v60 = vsel %vm345_vm0, %v3245_v3, -inf }
 0x58e   : > { %v3026_v19 = vmax.f32 %v3024_v9, %v3025_v0  ;;  %v3249_v12 = vmax.f32 %v3247_v60, %v3248_v57 }
 0x590   : > { %v3027_v29 = vrot.slane %v3026_v19, 2  ;;  %v3250_v22 = vrot.slane %v3249_v12, 4 }
 0x592   : > { %v3028_v30 = vmax.f32 %v3026_v19, %v3027_v29  ;;  %v3251_v25 = vmax.f32 %v3249_v12, %v3250_v22 }
 0x594   : > { %v3029_v42 = vrot.slane %v3028_v30, 1  ;;  %v3252_v46 = vrot.slane %v3251_v25, 2 }
 0x596   : > { %v3030_v35 = vmax.f32 %v3028_v30, %v3029_v42  ;;  %v3253_v28 = vmax.f32 %v3251_v25, %v3252_v46 }
 0x598   : > { %v3031_v21 = vsub.f32 %v3020_v63, %v3030_v35  ;;  %v3032_v48 = vsub.f32 %v3021_v58, %v3030_v35  ;;  %v3254_v39 = vrot.slane %v3253_v28, 1 }
 0x59a   : > { %v3033_v40 = vmul.f32 1.442695, %v3031_v21  ;;  %v3035_v41 = vmul.f32 1.442695, %v3032_v48  ;;  %v3255_v23 = vmax.f32 %v3253_v28, %v3254_v39 }
 0x59c   : > { %7862 = vpow2.f32 %v3033_v40  ;;  %v3256_v51 = vsub.f32 %v3245_v3, %v3255_v23  ;;  %v3257_v27 = vsub.f32 %v3246_v2, %v3255_v23  ;;  %v7301_v20 = vpop.f32.mrb[22].mxu1 }
 0x59d   : > { %7864 = vpow2.f32 %v3035_v41  ;;  %v2794_v31 = vmul.f32 0.125, %v7301_v20  ;;  %v2784_v54 = vpop.f32.mrb[23].mxu1 }
 0x59e   : > { %v3258_v32 = vmul.f32 1.442695, %v3256_v51  ;;  %v3260_v33 = vmul.f32 1.442695, %v3257_v27  ;;  %v2793_v43 = vmul.f32 0.125, %v2784_v54 }
 0x59f   : > { %v2796_v62 = vsel %vm345_vm0, %v2794_v31, -inf }
 0x5a0   : > { %7866 = vpow2.f32 %v3258_v32  ;;  %v2795_v44 = vsel %vm345_vm0, %v2793_v43, -inf }
 0x5a1   : > { %7868 = vpow2.f32 %v3260_v33  ;;  %v2797_v5 = vmax.f32 %v2795_v44, %v2796_v62 }
 0x5a3   : > { %v2798_v47 = vrot.slane %v2797_v5, 4 }
 0x5a5   : > { %v2799_v53 = vmax.f32 %v2797_v5, %v2798_v47 }
 0x5a6   : > { %v8601_v6 = vpop.eup %7862 }
 0x5a7   : > { %v8603_v56 = vpop.eup %7864  ;;  %v3037_v24 = vsel %vm345_vm0, %v8601_v6, 0.0  ;;  %v2800_v58 = vrot.slane %v2799_v53, 2 }
 0x5a8   : > { %v3038_v59 = vsel %vm345_vm0, %v8603_v56, 0.0 }
 0x5a9   : > { %v3039_v63 = vadd.f32 %v3038_v59, %v3037_v24  ;;  %v2801_v1 = vmax.f32 %v2799_v53, %v2800_v58 }
 0x5aa   : > { %v8609_v4 = vpop.eup %7866 }
 0x5ab   : > { %v8611_v8 = vpop.eup %7868  ;;  %v3040_v9 = vrot.slane %v3039_v63, 4  ;;  %v3262_v2 = vsel %vm345_vm0, %v8609_v4, 0.0  ;;  %v2802_v10 = vrot.slane %v2801_v1, 1 }
 0x5ac   : > { %v3263_v3 = vsel %vm345_vm0, %v8611_v8, 0.0 }
 0x5ad   : > { %v3041_v0 = vadd.f32 %v3040_v9, %v3039_v63  ;;  %v3264_v57 = vadd.f32 %v3263_v3, %v3262_v2  ;;  %v2803_v60 = vmax.f32 %v2801_v1, %v2802_v10 }
 0x5af   : > { %v3042_v19 = vrot.slane %v3041_v0, 2  ;;  %v3265_v12 = vrot.slane %v3264_v57, 4  ;;  %v2804_v29 = vsub.f32 %v2793_v43, %v2803_v60  ;;  %v2805_v22 = vsub.f32 %v2794_v31, %v2803_v60  ;;  %v7337_v30 = vpop.f32.mrb[26].mxu0 }
 0x5b0   : > { %v3471_v25 = vmul.f32 0.125, %v7337_v30  ;;  %v3461_v42 = vpop.f32.mrb[27].mxu0 }
 0x5b1   : > { %v3043_v46 = vadd.f32 %v3042_v19, %v3041_v0  ;;  %v3266_v35 = vadd.f32 %v3265_v12, %v3264_v57  ;;  %v2806_v28 = vmul.f32 1.442695, %v2804_v29  ;;  %v2808_v21 = vmul.f32 1.442695, %v2805_v22 }
 0x5b2   : > { %v3473_v48 = vsel %vm345_vm0, %v3471_v25, -inf  ;;  %v3470_v39 = vmul.f32 0.125, %v3461_v42  ;;  %v8632_v42 = vld [vmem:[%s9135_s4 + $0x10] sm:$0xff] }
 0x5b3   : > { %v3267_v40 = vrot.slane %v3266_v35, 2  ;;  %7870 = vpow2.f32 %v2806_v28  ;;  %v3044_v41 = vrot.slane %v3043_v46, 1 }
 0x5b4   : > { %7872 = vpow2.f32 %v2808_v21  ;;  %v3472_v23 = vsel %vm345_vm0, %v3470_v39, -inf  ;;  %v8638_v21 = vld [vmem:[%s9135_s4 + $0x18] sm:$0xff] }
 0x5b5   : > { %v3268_v51 = vadd.f32 %v3267_v40, %v3266_v35  ;;  %v3474_v27 = vmax.f32 %v3472_v23, %v3473_v48  ;;  %v3045_v20 = vadd.f32 %v3044_v41, %v3043_v46 }
 0x5b7   : > { %v3475_v31 = vrot.slane %v3474_v27, 4  ;;  %v7349_v54 = vpop.f32.mrb[28].mxu0  ;;  %7874 = vrcp.f32 %v3045_v20  ;;  %v3269_v32 = vrot.slane %v3268_v51, 1 }
 0x5b8   : > { %v3696_v33 = vmul.f32 0.125, %v7349_v54  ;;  %v3686_v43 = vpop.f32.mrb[29].mxu0 }
 0x5b9   : > { %v3476_v62 = vmax.f32 %v3474_v27, %v3475_v31  ;;  %v3695_v44 = vmul.f32 0.125, %v3686_v43  ;;  %v3270_v5 = vadd.f32 %v3269_v32, %v3268_v51 }
 0x5ba   : > { %v3698_v47 = vsel %vm345_vm0, %v3696_v33, -inf }
 0x5bb   : > { %v3477_v53 = vrot.slane %v3476_v62, 2  ;;  %v3697_v24 = vsel %vm345_vm0, %v3695_v44, -inf  ;;  %7876 = vrcp.f32 %v3270_v5 }
 0x5bc   : > { %v3699_v58 = vmax.f32 %v3697_v24, %v3698_v47 }
 0x5bd   : > { %v8621_v59 = vpop.eup %7870  ;;  %v3478_v63 = vmax.f32 %v3476_v62, %v3477_v53 }
 0x5be   : > { %v8623_v1 = vpop.eup %7872  ;;  %v2810_v9 = vsel %vm345_vm0, %v8621_v59, 0.0  ;;  %v3700_v2 = vrot.slane %v3699_v58, 4 }
 0x5bf   : > { %v2811_v10 = vsel %vm345_vm0, %v8623_v1, 0.0  ;;  %v3479_v3 = vrot.slane %v3478_v63, 1  ;;  %v7361_v0 = vpop.f32.mrb[30].mxu0 }
 0x5c0   : > { %v2812_v57 = vadd.f32 %v2811_v10, %v2810_v9  ;;  %v3701_v60 = vmax.f32 %v3699_v58, %v3700_v2  ;;  %v3921_v19 = vmul.f32 0.125, %v7361_v0  ;;  %v3911_v12 = vpop.f32.mrb[31].mxu0 }
 0x5c1   : > { %v7875_v29 = vpop.eup %7874  ;;  %v3480_v22 = vmax.f32 %v3478_v63, %v3479_v3  ;;  %v3920_v30 = vmul.f32 0.125, %v3911_v12 }
 0x5c2   : > { %v2813_v46 = vrot.slane %v2812_v57, 4  ;;  %v3702_v35 = vrot.slane %v3701_v60, 2  ;;  %v3923_v28 = vsel %vm345_vm0, %v3921_v19, -inf  ;;  %v3047_v48 = vmul.f32 %v7875_v29, %v8601_v6 }
 0x5c3   : > { %v3481_v40 = vsub.f32 %v3470_v39, %v3480_v22  ;;  %v3482_v41 = vsub.f32 %v3471_v25, %v3480_v22  ;;  %v3922_v23 = vsel %vm345_vm0, %v3920_v30, -inf  ;;  %v3048_v51 = vmul.f32 %v7875_v29, %v8603_v56 }
 0x5c4   : > { %v2814_v27 = vadd.f32 %v2813_v46, %v2812_v57  ;;  %v3703_v20 = vmax.f32 %v3701_v60, %v3702_v35  ;;  %v3924_v31 = vmax.f32 %v3922_v23, %v3923_v28  ;;  %v3049_v54 = vadd.f32 %v8632_v42, %v3047_v48 }
 0x5c5   : > { %v7877_v32 = vpop.eup %7876  ;;  %v3483_v43 = vmul.f32 1.442695, %v3481_v40  ;;  %v3485_v62 = vmul.f32 1.442695, %v3482_v41  ;;  %v3050_v5 = vadd.f32 %v8638_v21, %v3048_v51 }
 0x5c6   : > { %v2815_v47 = vrot.slane %v2814_v27, 2  ;;  %v3704_v53 = vrot.slane %v3703_v20, 1  ;;  %v3925_v24 = vrot.slane %v3924_v31, 4  ;;  %v3272_v6 = vmul.f32 %v7877_v32, %v8609_v4 }
 0x5c7   : > { %7878 = vpow2.f32 %v3483_v43  ;;  %v8646_v25 = vpack.c.bf16 %v3050_v5, %v3049_v54  ;;  %v3273_v56 = vmul.f32 %v7877_v32, %v8611_v8 }
 0x5c8   : > { %v2816_v39 = vadd.f32 %v2815_v47, %v2814_v27  ;;  %7880 = vpow2.f32 %v3485_v62  ;;  %v3705_v58 = vmax.f32 %v3703_v20, %v3704_v53  ;;  %v3926_v63 = vmax.f32 %v3924_v31, %v3925_v24 }
 0x5c9   : > { %v3274_v9 = vadd.f32 %v8632_v42, %v3272_v6  ;;  %v3275_v2 = vadd.f32 %v8638_v21, %v3273_v56 }
 0x5ca   : > { %v3706_v10 = vsub.f32 %v3695_v44, %v3705_v58  ;;  %v3707_v3 = vsub.f32 %v3696_v33, %v3705_v58  ;;  %v3927_v0 = vrot.slane %v3926_v63, 2  ;;  %v2817_v57 = vrot.slane %v2816_v39, 1 }
 0x5cb   : > { %v8651_v60 = vpack.c.bf16 %v3275_v2, %v3274_v9 }
 0x5cc   : > { %v3708_v4 = vmul.f32 1.442695, %v3706_v10  ;;  %v3710_v12 = vmul.f32 1.442695, %v3707_v3  ;;  %v3928_v29 = vmax.f32 %v3926_v63, %v3927_v0  ;;  %v2818_v22 = vadd.f32 %v2817_v57, %v2816_v39 }
 0x5ce   : > { %7882 = vpow2.f32 %v3708_v4  ;;  %v3929_v8 = vrot.slane %v3928_v29, 1 }
 0x5cf   : > { %7884 = vpow2.f32 %v3710_v12  ;;  %v8683_v12 = vld [vmem:[%s8145_s9 + $0x8] sm:$0xff] }
 0x5d0   : > { %v3930_v46 = vmax.f32 %v3928_v29, %v3929_v8  ;;  %7886 = vrcp.f32 %v2818_v22 }
 0x5d1   : > { %v8653_v35 = vpop.eup %7878 }
 0x5d2   : > { %v8655_v28 = vpop.eup %7880  ;;  %v3487_v33 = vsel %vm345_vm0, %v8653_v35, 0.0  ;;  %v3931_v44 = vsub.f32 %v3920_v30, %v3930_v46  ;;  %v3932_v48 = vsub.f32 %v3921_v19, %v3930_v46 }
 0x5d3   : > { %v3488_v40 = vsel %vm345_vm0, %v8655_v28, 0.0 }
 0x5d4   : > { %v3489_v41 = vadd.f32 %v3488_v40, %v3487_v33  ;;  %v3933_v23 = vmul.f32 1.442695, %v3931_v44  ;;  %v3935_v51 = vmul.f32 1.442695, %v3932_v48 }
 0x5d6   : > { %v3490_v27 = vrot.slane %v3489_v41, 4  ;;  %7888 = vpow2.f32 %v3933_v23 }
 0x5d7   : > { %7890 = vpow2.f32 %v3935_v51 }
 0x5d8   : > { %v8661_v20 = vpop.eup %7882  ;;  %v3491_v31 = vadd.f32 %v3490_v27, %v3489_v41 }
 0x5d9   : > { %v8663_v54 = vpop.eup %7884  ;;  %v3712_v32 = vsel %vm345_vm0, %v8661_v20, 0.0 }
 0x5da   : > { %v7887_v43 = vpop.eup %7886  ;;  %v3492_v30 = vrot.slane %v3491_v31, 2  ;;  %v3713_v19 = vsel %vm345_vm0, %v8663_v54, 0.0 }
 0x5db   : > { %v3714_v62 = vadd.f32 %v3713_v19, %v3712_v32  ;;  %v2820_v5 = vmul.f32 %v7887_v43, %v8621_v59  ;;  %v2821_v47 = vmul.f32 %v7887_v43, %v8623_v1 }
 0x5dc   : > { %v3493_v53 = vadd.f32 %v3492_v30, %v3491_v31 }
 0x5dd   : > { %v3715_v24 = vrot.slane %v3714_v62, 4  ;;  %v2822_v6 = vadd.f32 %v8632_v42, %v2820_v5  ;;  %v2823_v56 = vadd.f32 %v8638_v21, %v2821_v47 }
 0x5de   : > { %v3494_v39 = vrot.slane %v3493_v53, 1 }
 0x5df   : > { %v3716_v58 = vadd.f32 %v3715_v24, %v3714_v62  ;;  %v7564_v63 = vpack.c.bf16 %v2823_v56, %v2822_v6 }
 0x5e0   : > { %v8673_v9 = vpop.eup %7888  ;;  %v3495_v2 = vadd.f32 %v3494_v39, %v3493_v53 }
 0x5e1   : > { %v8675_v10 = vpop.eup %7890  ;;  %v3717_v3 = vrot.slane %v3716_v58, 2  ;;  %v3937_v59 = vsel %vm345_vm0, %v8673_v9, 0.0  ;;  %7565 = vmatprep.subr.bf16.mxu1 %v7564_v63 }
 0x5e2   : > { %v3938_v1 = vsel %vm345_vm0, %v8675_v10, 0.0  ;;  %7567 = vmatpush3.bf16.msra.mxu1 %v7564_v63  ;;  %7892 = vrcp.f32 %v3495_v2 }
 0x5e3   : > { %v3718_v0 = vadd.f32 %v3717_v3, %v3716_v58  ;;  %v3939_v57 = vadd.f32 %v3938_v1, %v3937_v59  ;;  %7569 = vmatprep.subr.bf16.mxu1 %v8646_v25 }
 0x5e5   : > { %v3940_v4 = vrot.slane %v3939_v57, 4  ;;  %7307 = vmatmul.mubr.msk.f32.vlgmr.msra.gmra.mrb[24].mxu1 %vm345_vm0, %v8683_v12  ;;  %v7373_v29 = vpop.f32.mrb[32].mxu0  ;;  %v3719_v22 = vrot.slane %v3718_v0, 1 }
 0x5e6   : > { %7571 = vmatpush3.bf16.msra.mxu1 %v8646_v25  ;;  %7318 = vmatprep.mubr.msk.f32.mxu1 %vm345_vm0, %v8285_v36  ;;  %v4146_v8 = vmul.f32 0.125, %v7373_v29  ;;  %v4136_v46 = vpop.f32.mrb[33].mxu0 }
 0x5e7   : > { %v3941_v33 = vadd.f32 %v3940_v4, %v3939_v57  ;;  %7573 = vmatprep.subr.bf16.mxu1 %v8651_v60  ;;  %v4145_v44 = vmul.f32 0.125, %v4136_v46  ;;  %v3720_v48 = vadd.f32 %v3719_v22, %v3718_v0 }
 0x5e8   : > { %v4148_v40 = vsel %vm345_vm0, %v4146_v8, -inf }
 0x5e9   : > { %v3942_v41 = vrot.slane %v3941_v33, 2  ;;  %7319 = vmatmul.mubr.msk.f32.vlgmr.msra.gmra.mrb[26].mxu1 %vm345_vm0, %v8323_v50  ;;  %v4147_v23 = vsel %vm345_vm0, %v4145_v44, -inf  ;;  %7894 = vrcp.f32 %v3720_v48 }
 0x5ea   : > { %v4149_v25 = vmax.f32 %v4147_v23, %v4148_v40  ;;  %7575 = vmatpush3.bf16.msra.mxu1 %v8651_v60  ;;  %7330 = vmatprep.mubr.msk.f32.mxu1 %vm345_vm0, %v8291_v37 }
 0x5eb   : > { %v3943_v51 = vadd.f32 %v3942_v41, %v3941_v33 }
 0x5ec   : > { %v7893_v27 = vpop.eup %7892  ;;  %v4150_v31 = vrot.slane %v4149_v25, 4 }
 0x5ed   : > { %7331 = vmatmul.mubr.msk.f32.vlgmr.msra.gmra.mrb[28].mxu1 %vm345_vm0, %v8293_v38  ;;  %v7385_v32 = vpop.f32.mrb[34].mxu0  ;;  %v3497_v43 = vmul.f32 %v7893_v27, %v8653_v35  ;;  %v3498_v30 = vmul.f32 %v7893_v27, %v8655_v28  ;;  %v3944_v19 = vrot.slane %v3943_v51, 1 }
 0x5ee   : > { %v4151_v62 = vmax.f32 %v4149_v25, %v4150_v31  ;;  %7342 = vmatprep.mubr.msk.f32.mxu1 %vm345_vm0, %v8297_v45  ;;  %v4371_v60 = vmul.f32 0.125, %v7385_v32  ;;  %v4361_v5 = vpop.f32.mrb[35].mxu0 }
 0x5ef   : > { %v4370_v47 = vmul.f32 0.125, %v4361_v5  ;;  %v3499_v53 = vadd.f32 %v8632_v42, %v3497_v43  ;;  %v3500_v24 = vadd.f32 %v8638_v21, %v3498_v30  ;;  %v3945_v6 = vadd.f32 %v3944_v19, %v3943_v51 }
 0x5f0   : > { %v4152_v56 = vrot.slane %v4151_v62, 2  ;;  %v4373_v39 = vsel %vm345_vm0, %v4371_v60, -inf }
 0x5f1   : > { %v4372_v35 = vsel %vm345_vm0, %v4370_v47, -inf  ;;  %v7576_v58 = vpack.c.bf16 %v3500_v24, %v3499_v53  ;;  %7896 = vrcp.f32 %v3945_v6 }
 0x5f2   : > { %v4153_v28 = vmax.f32 %v4151_v62, %v4152_v56  ;;  %v4374_v63 = vmax.f32 %v4372_v35, %v4373_v39 }
 0x5f3   : > { %v7895_v2 = vpop.eup %7894  ;;  %7577 = vmatprep.subr.bf16.mxu1 %v7576_v58 }
 0x5f4   : > { %v4154_v3 = vrot.slane %v4153_v28, 1  ;;  %v4375_v59 = vrot.slane %v4374_v63, 4  ;;  %7579 = vmatpush3.bf16.msra.mxu1 %v7576_v58  ;;  %v3722_v1 = vmul.f32 %v7895_v2, %v8661_v20  ;;  %v3723_v0 = vmul.f32 %v7895_v2, %v8663_v54 }
 0x5f6   : > { %v4155_v57 = vmax.f32 %v4153_v28, %v4154_v3  ;;  %v4376_v4 = vmax.f32 %v4374_v63, %v4375_v59  ;;  %v3724_v29 = vadd.f32 %v8632_v42, %v3722_v1  ;;  %v3725_v22 = vadd.f32 %v8638_v21, %v3723_v0 }
 0x5f7   : > { %7343 = vmatmul.mubr.msk.f32.vlgmr.msra.gmra.mrb[30].mxu1 %vm345_vm0, %v8299_v52 }
 0x5f8   : > { %v4156_v46 = vsub.f32 %v4145_v44, %v4155_v57  ;;  %v4157_v33 = vsub.f32 %v4146_v8, %v4155_v57  ;;  %v4377_v48 = vrot.slane %v4376_v4, 2  ;;  %7354 = vmatprep.mubr.msk.f32.mxu1 %vm345_vm0, %v8303_v61  ;;  %v7580_v40 = vpack.c.bf16 %v3725_v22, %v3724_v29 }
 0x5fa   : > { %v4158_v41 = vmul.f32 1.442695, %v4156_v46  ;;  %v4160_v20 = vmul.f32 1.442695, %v4157_v33  ;;  %v4378_v23 = vmax.f32 %v4376_v4, %v4377_v48  ;;  %7581 = vmatprep.subr.bf16.mxu1 %v7580_v40 }
 0x5fb   : > { %v7897_v54 = vpop.eup %7896  ;;  %7583 = vmatpush3.bf16.msra.mxu1 %v7580_v40 }
 0x5fc   : > { %7898 = vpow2.f32 %v4158_v41  ;;  %v4379_v25 = vrot.slane %v4378_v23, 1  ;;  %v3947_v51 = vmul.f32 %v7897_v54, %v8673_v9  ;;  %v3948_v27 = vmul.f32 %v7897_v54, %v8675_v10 }
 0x5fd   : > { %7900 = vpow2.f32 %v4160_v20 }
 0x5fe   : > { %v4380_v44 = vmax.f32 %v4378_v23, %v4379_v25  ;;  %7355 = vmatmul.mubr.msk.f32.vlgmr.msra.gmra.mrb[32].mxu1 %vm345_vm0, %v8307_v16  ;;  %v3949_v8 = vadd.f32 %v8632_v42, %v3947_v51  ;;  %v3950_v31 = vadd.f32 %v8638_v21, %v3948_v27 }
 0x5ff   : > { %7366 = vmatprep.mubr.msk.f32.mxu1 %vm345_vm0, %v8317_v34 }
 0x600   : > { %v4381_v32 = vsub.f32 %v4370_v47, %v4380_v44  ;;  %v4382_v43 = vsub.f32 %v4371_v60, %v4380_v44  ;;  %v7584_v30 = vpack.c.bf16 %v3950_v31, %v3949_v8  ;;  %v6911_v44 = vld [vmem:[%s9132_s1 + $0x20] sm:$0xff] }
 0x602   : > { %v4383_v19 = vmul.f32 1.442695, %v4381_v32  ;;  %v4385_v62 = vmul.f32 1.442695, %v4382_v43  ;;  %7585 = vmatprep.subr.bf16.mxu1 %v7584_v30 }
 0x603   : > { %7587 = vmatpush3.bf16.msra.mxu1 %v7584_v30 }
 0x604   : > { %7902 = vpow2.f32 %v4383_v19 }
 0x605   : > { %7904 = vpow2.f32 %v4385_v62 }
 0x606   : > { %v7899_v9 = vpop.eup %7898  ;;  %7367 = vmatmul.mubr.msk.f32.vlgmr.msra.gmra.mrb[34].mxu1 %vm345_vm0, %v8331_v55 }
 0x607   : > { %v7901_v10 = vpop.eup %7900  ;;  %v4162_v5 = vsel %vm345_vm0, %v7899_v9, 0.0  ;;  %7378 = vmatprep.mubr.msk.f32.mxu1 %vm345_vm0, %v8339_v11 }
 0x608   : > { %v4163_v47 = vsel %vm345_vm0, %v7901_v10, 0.0 }
 0x609   : > { %v4164_v60 = vadd.f32 %v4163_v47, %v4162_v5 }
 0x60b   : > { %v4165_v53 = vrot.slane %v4164_v60, 4 }
 0x60d   : > { %v4166_v24 = vadd.f32 %v4165_v53, %v4164_v60 }
 0x60e   : > { %v7903_v6 = vpop.eup %7902 }
 0x60f   : > { %v7905_v56 = vpop.eup %7904  ;;  %v4167_v39 = vrot.slane %v4166_v24, 2  ;;  %v4387_v35 = vsel %vm345_vm0, %v7903_v6, 0.0 }
 0x610   : > { %v4388_v58 = vsel %vm345_vm0, %v7905_v56, 0.0 }
 0x611   : > { %v4168_v28 = vadd.f32 %v4167_v39, %v4166_v24  ;;  %v4389_v63 = vadd.f32 %v4388_v58, %v4387_v35 }
 0x613   : > { %v4390_v2 = vrot.slane %v4389_v63, 4  ;;  %v4169_v3 = vrot.slane %v4168_v28, 1 }
 0x615   : > { %v4391_v59 = vadd.f32 %v4390_v2, %v4389_v63  ;;  %v4170_v1 = vadd.f32 %v4169_v3, %v4168_v28  ;;  %v4666_v2 = vpop.permute.xlu1 %4665 }
 0x617   : > { %v4392_v0 = vrot.slane %v4391_v59, 2  ;;  %7906 = vrcp.f32 %v4170_v1 }
 0x619   : > { %v4393_v57 = vadd.f32 %v4392_v0, %v4391_v59  ;;  %v4661_v0 = vpop.permute.xlu0 %4660 }
 0x61b   : > { %v4394_v4 = vrot.slane %v4393_v57, 1 }
 0x61d   : > { %v4395_v29 = vadd.f32 %v4394_v4, %v4393_v57 }
 0x61f   : > { %7908 = vrcp.f32 %v4395_v29 }
 0x621   : > { %v7907_v22 = vpop.eup %7906 }
 0x622   : > { %v4172_v46 = vmul.f32 %v7907_v22, %v7899_v9  ;;  %v4173_v33 = vmul.f32 %v7907_v22, %v7901_v10 }
 0x624   : > { %v4174_v48 = vadd.f32 %v8632_v42, %v4172_v46  ;;  %v4175_v40 = vadd.f32 %v8638_v21, %v4173_v33 }
 0x626   : > { %v7588_v41 = vpack.c.bf16 %v4175_v40, %v4174_v48  ;;  %v321_v40 = vld [vmem:[%s9137_s6] sm:$0xff] }
 0x628   : > { %7589 = vmatprep.subr.bf16.mxu1 %v7588_v41 }
 0x629   : > { %v7909_v20 = vpop.eup %7908  ;;  %7591 = vmatpush3.bf16.msra.mxu1 %v7588_v41 }
 0x62a   : > { %v4397_v23 = vmul.f32 %v7909_v20, %v7903_v6  ;;  %v4398_v54 = vmul.f32 %v7909_v20, %v7905_v56  ;;  %v322_v20 = vld [vmem:[%s9137_s6 + $0x8] sm:$0xff] }
 0x62c   : > { %7379 = vmatmul.mubr.msk.f32.vlgmr.msra.gmra.mrb[36].mxu1 %vm345_vm0, %v8343_v13  ;;  %v4399_v25 = vadd.f32 %v8632_v42, %v4397_v23  ;;  %v4400_v51 = vadd.f32 %v8638_v21, %v4398_v54  ;;  %v6912_v42 = vld [vmem:[%s9132_s1 + $0x28] sm:$0xff]  ;;  %v323_v54 = vld [vmem:[%s9137_s6 + $0x10] sm:$0xff] }
 0x62d   : > { %7390 = vmatprep.mubr.msk.f32.mxu1 %vm345_vm0, %v8361_v49 }
 0x62e   : > { %v7592_v27 = vpack.c.bf16 %v4400_v51, %v4399_v25 }
 0x630   : > { %7593 = vmatprep.subr.bf16.mxu1 %v7592_v27 }
 0x631   : > { %7595 = vmatpush3.bf16.msra.mxu1 %v7592_v27  ;;  %v324_v27 = vld [vmem:[%s9137_s6 + $0x18] sm:$0xff] }
 0x632   : > { %7601 = vmatprep.subr.bf16.mxu1 %v8155_v7 }
 0x634   : > { %7391 = vmatmul.mubr.msk.f32.vlgmr.msra.gmra.mrb[38].mxu1 %vm345_vm0, %v8363_v26 }
 0x635   : > { %7603 = vmatpush3.bf16.msra.mxu1 %v8155_v7  ;;  %7407 = vmatprep.mubr.msk.f32.mxu1 %vm345_vm0, %v6911_v44 }
 0x638   : > { %7408 = vmatmul.mubr.msk.f32.vlgmr.msra.gmra.mrb[40].mxu1 %vm345_vm0, %v6912_v42 }
 0x6b8   : > { %v8752_v21 = vpop.f32.mrb[24].mxu1 }
 0x6b9   : > { %v8754_v8 = vpop.f32.mrb[25].mxu1 }
 0x6bc   : > { %v7320_v31 = vpop.f32.mrb[26].mxu1 }
 0x6bd   : > { %v3117_v32 = vpop.f32.mrb[27].mxu1 }
 0x6be   : > { %v7744_v43 = vpack.i.bf16 %v7320_v31, %v3117_v32 }
 0x6c0   : > { %v8756_v30 = vpop.f32.mrb[28].mxu1 }
 0x6c1   : > { %v8758_v19 = vpop.f32.mrb[29].mxu1 }
 0x6c2   : > { %v7749_v7 = vpack.i.bf16 %v8756_v30, %v8758_v19 }
 0x6ca   : > { %v7344_v62 = vpop.f32.mrb[30].mxu1 }
 0x6cb   : > { %v3567_v9 = vpop.f32.mrb[31].mxu1 }
 0x6cc   : > { %v7754_v10 = vpack.i.bf16 %v7344_v62, %v3567_v9 }
 0x6d1   : > { %v7356_v5 = vpop.f32.mrb[32].mxu1 }
 0x6d2   : > { %v3792_v47 = vpop.f32.mrb[33].mxu1 }
 0x6d3   : > { %v7759_v60 = vpack.i.bf16 %v7356_v5, %v3792_v47 }
 0x6d9   : > { %v7368_v53 = vpop.f32.mrb[34].mxu1 }
 0x6da   : > { %v4017_v24 = vpop.f32.mrb[35].mxu1 }
 0x6db   : > { %v7764_v6 = vpack.i.bf16 %v7368_v53, %v4017_v24 }
 0x6ff   : > { %v7380_v56 = vpop.f32.mrb[36].mxu1 }
 0x700   : > { %v4242_v39 = vpop.f32.mrb[37].mxu1 }
 0x701   : > { %v7769_v35 = vpack.i.bf16 %v7380_v56, %v4242_v39 }
 0x707   : > { %v7392_v58 = vpop.f32.mrb[38].mxu1 }
 0x708   : > { %v4467_v28 = vpop.f32.mrb[39].mxu1 }
 0x709   : > { %v7774_v63 = vpack.i.bf16 %v7392_v58, %v4467_v28 }
 0x70b   : > { %v7409_v3 = vpop.f32.mrb[40].mxu1 }
 0x70c   : > { %v4746_v59 = vadd.f32 %v7409_v3, %v4666_v2  ;;  %v4740_v1 = vpop.f32.mrb[41].mxu1 }
 0x70d   : > { %v4741_v57 = vadd.f32 %v4740_v1, %v4661_v0 }
 0x70e   : > { %5458 = vrot.lane.b32.xlu1 %v4746_v59, %s8029_s16  ;;  %5008 = vrot.lane.b32.xlu0 %v4746_v59, %s9140_s14 }
 0x70f   : > { %7410 = vmatprep.subr.mxu1 %v4746_v59 }
 0x710   : > { %7411 = vmatpush3.msra.mxu1 %v4746_v59 }
 0x712   : > { %5908 = vrot.lane.b32.xlu1 %v4746_v59, %s8030_s17  ;;  %5233 = vrot.lane.b32.xlu0 %v4746_v59, %s9141_s13 }
 0x716   : > { %6133 = vrot.lane.b32.xlu1 %v4746_v59, %s8031_s18  ;;  %5683 = vrot.lane.b32.xlu0 %v4746_v59, %s8028_s15 }
 0x71a   : > { %4972 = vrot.lane.b32.xlu0 %v4741_v57, %s9140_s14 }
 0x71e   : > { %5198 = vrot.lane.b32.xlu0 %v4741_v57, %s9141_s13 }
 0x722   : > { %5423 = vrot.lane.b32.xlu0 %v4741_v57, %s8029_s16 }
 0x726   : > { %5648 = vrot.lane.b32.xlu0 %v4741_v57, %s8028_s15 }
 0x72a   : > { %5873 = vrot.lane.b32.xlu0 %v4741_v57, %s8030_s17 }
 0x72e   : > { %6098 = vrot.lane.b32.xlu0 %v4741_v57, %s8031_s18 }
 0x732   : > { %6323 = vrot.lane.b32.xlu0 %v4741_v57, %s8032_s19 }
 0x750   : > { %4752 = vxpose.xlu0.b32.start.end [1/1] (short) (narrow) %v4741_v57, 16 }
 0x77d   : > { %6358 = vrot.lane.b32.xlu0 %v4746_v59, %s8032_s19 }
 0x780   : > { %v5009_v4 = vpop.permute.xlu0 %5008  ;;  %v5459_v62 = vpop.permute.xlu1 %5458 }
 0x781   : > { %7422 = vmatprep.subr.mxu1 %v5009_v4  ;;  %7745 = vrot.lane.b32.xlu0 %v7744_v43, %s8032_s19 }
 0x784   : > { %v5234_v29 = vpop.permute.xlu0 %5233  ;;  %v5909_v19 = vpop.permute.xlu1 %5908 }
 0x785   : > { %7755 = vrot.lane.b32.xlu0 %v7754_v10, %s8030_s17 }
 0x788   : > { %v8778_v22 = vpop.permute.xlu0 %5683  ;;  %v6134_v9 = vpop.permute.xlu1 %6133 }
 0x789   : > { %7760 = vrot.lane.b32.xlu0 %v7759_v60, %s8028_s15 }
 0x78c   : > { %v4973_v46 = vpop.permute.xlu0 %4972 }
 0x78d   : > { %7765 = vrot.lane.b32.xlu0 %v7764_v6, %s8029_s16  ;;  %4975 = vxpose.xlu1.b32.start.end [1/1] (short) (narrow) %v4973_v46, 16 }
 0x790   : > { %v5199_v33 = vpop.permute.xlu0 %5198 }
 0x791   : > { %7770 = vrot.lane.b32.xlu0 %v7769_v35, %s9141_s13 }
 0x792   : > { %5201 = vxpose.xlu1.b32.start.end [1/1] (short) (narrow) %v5199_v33, 16 }
 0x794   : > { %v5424_v48 = vpop.permute.xlu0 %5423 }
 0x795   : > { %7775 = vrot.lane.b32.xlu0 %v7774_v63, %s9140_s14 }
 0x797   : > { %5426 = vxpose.xlu1.b32.start.end [1/1] (short) (narrow) %v5424_v48, 16 }
 0x798   : > { %v5649_v41 = vpop.permute.xlu0 %5648 }
 0x799   : > { %327 = vperm.xlu0 %7707, %v321_v40  }
 0x79c   : > { %5651 = vxpose.xlu1.b32.start.end [1/1] (short) (narrow) %v5649_v41, 16  ;;  %v5874_v23 = vpop.permute.xlu0 %5873 }
 0x79d   : > { %332 = vperm.xlu0 %7707, %v322_v20  }
 0x7a0   : > { %v6099_v25 = vpop.permute.xlu0 %6098 }
 0x7a1   : > { %337 = vperm.xlu0 %7707, %v323_v54   ;;  %5876 = vxpose.xlu1.b32.start.end [1/1] (short) (narrow) %v5874_v23, 16 }
 0x7a4   : > { %v6324_v51 = vpop.permute.xlu0 %6323 }
 0x7a6   : > { %6101 = vxpose.xlu1.b32.start.end [1/1] (short) (narrow) %v6099_v25, 16 }
 0x7ab   : > { %6326 = vxpose.xlu1.b32.start.end [1/1] (short) (narrow) %v6324_v51, 16 }
 0x7cd   : > { %7750 = vrot.lane.b32.xlu1 %v7749_v7, %s8031_s18 }
 0x7d0   : > { %v4768_v44 = vpop.trf.xlu0 }
 0x7d1   : > { %342 = vperm.xlu1 %7708, %v324_v27   ;;  %7412 = vmatprep.mubr.msk.f32.mxu1 %vm572_vm1, %v4768_v44 }
 0x7d4   : > { %v4769_v42 = vpop.trf.xlu0 }
 0x7d5   : > { %7413 = vmatmul.mubr.msk.f32.vlgmr.msra.gmra.mrb[42].mxu1 %vm572_vm1, %v4769_v42 }
 0x7d6   : > { %7423 = vmatpush3.msra.mxu1 %v5009_v4 }
 0x7d7   : > { %7434 = vmatprep.subr.mxu1 %v5234_v29 }
 0x7ef   : > { %v6359_v31 = vpop.permute.xlu0 %6358 }
 0x7f3   : > { %v7746_v32 = vpop.permute.xlu0 %7745 }
 0x7f4   : > { %v7748_v57 = vunpack.i.h.bf16 %v7746_v32  ;;  %v7747_v4 = vunpack.i.l.bf16 %v7746_v32 }
 0x7f6   : > { %v4533_v33 = vsel %vm345_vm0, %v8752_v21, %v7748_v57  ;;  %v4532_v48 = vsel %vm345_vm0, %v8754_v8, %v7747_v4 }
 0x7f7   : > { %v8802_v43 = vpop.permute.xlu0 %7755 }
 0x7f8   : > { %v7758_v40 = vunpack.i.h.bf16 %v8802_v43  ;;  %v7757_v41 = vunpack.i.l.bf16 %v8802_v43 }
 0x7fb   : > { %v8804_v30 = vpop.permute.xlu0 %7760 }
 0x7fc   : > { %v7763_v20 = vunpack.i.h.bf16 %v8804_v30  ;;  %v7762_v23 = vunpack.i.l.bf16 %v8804_v30 }
 0x7ff   : > { %v8806_v7 = vpop.permute.xlu0 %7765 }
 0x800   : > { %v7768_v51 = vunpack.i.h.bf16 %v8806_v7  ;;  %v7767_v27 = vunpack.i.l.bf16 %v8806_v7 }
 0x803   : > { %v8808_v5 = vpop.permute.xlu0 %7770 }
 0x804   : > { %v7773_v44 = vunpack.i.h.bf16 %v8808_v5  ;;  %v7772_v42 = vunpack.i.l.bf16 %v8808_v5 }
 0x807   : > { %v8812_v60 = vpop.permute.xlu0 %7775 }
 0x808   : > { %v7778_v43 = vunpack.i.h.bf16 %v8812_v60 }
 0x80d   : > { %v4991_v10 = vpop.trf.xlu1 }
 0x80e   : > { %7424 = vmatprep.mubr.msk.f32.mxu1 %vm572_vm1, %v4991_v10 }
 0x811   : > { %v4992_v47 = vpop.trf.xlu1 }
 0x812   : > { %7425 = vmatmul.mubr.msk.f32.vlgmr.msra.gmra.mrb[44].mxu1 %vm572_vm1, %v4992_v47 }
 0x813   : > { %7435 = vmatpush3.msra.mxu1 %v5234_v29 }
 0x814   : > { %7446 = vmatprep.subr.mxu1 %v5459_v62 }
 0x815   : > { %v5217_v53 = vpop.trf.xlu1 }
 0x816   : > { %7436 = vmatprep.mubr.msk.f32.mxu1 %vm572_vm1, %v5217_v53  ;;  %v6904_v53 = vld [vmem:[%s9134_s3 + $0x28] sm:$0xff] }
 0x818   : > { %v328_v24 = vpop.permute.xlu0 %327 }
 0x819   : > { %v8816_v6 = vadd.f32 %v8186_v15, %v328_v24  ;;  %v5218_v56 = vpop.trf.xlu1  ;;  %v6905_v24 = vld [vmem:[%s9134_s3 + $0x30] sm:$0xff] }
 0x81a   : > { %7437 = vmatmul.mubr.msk.f32.vlgmr.msra.gmra.mrb[46].mxu1 %vm572_vm1, %v5218_v56  ;;  %v6906_v56 = vld [vmem:[%s9134_s3 + $0x38] sm:$0xff] }
 0x81b   : > { %7447 = vmatpush3.msra.mxu1 %v5459_v62  ;;  %v7777_v62 = vunpack.i.l.bf16 %v8812_v60  ;;  %v6903_v60 = vld [vmem:[%s9134_s3 + $0x20] sm:$0xff] }
 0x81c   : > { %7458 = vmatprep.subr.mxu1 %v8778_v22  ;;  %v333_v39 = vpop.permute.xlu0 %332  ;;  %7397 = vmatprep.mubr.msk.f32.mxu0 %vm345_vm0, %v6903_v60 }
 0x81d   : > { %v8821_v35 = vadd.f32 %v8184_v14, %v333_v39  ;;  %v5442_v58 = vpop.trf.xlu1  ;;  %v7960_v39 = vld [vmem:[%s8145_s9] sm:$0xff]  ;;  %s6820_s9 = sshll.u32 %s8134_s20, 5 }
 0x81e   : > { %7448 = vmatprep.mubr.msk.f32.mxu1 %vm572_vm1, %v5442_v58  ;;  %s314_s13 = scalar_lea.vmem [#allocation3], %s6820_s9 }
 0x81f   : > { %s6745_s14 = sshll.u32 %s314_s13, 4  ;;  %s9082_s14 = int_to_ptr.vmem [resolvable:$true] %s6745_s14 }
 0x820   : > { %p7968_p2 = scmp.lt.s32.totalorder %s9082_s14, %s7966_s29 }
 0x821   : > { %v5443_v28 = vpop.trf.xlu1 }
 0x822   : > { %7449 = vmatmul.mubr.msk.f32.vlgmr.msra.gmra.mrb[48].mxu1 %vm572_vm1, %v5443_v28 }
 0x823   : > { %7459 = vmatpush3.msra.mxu1 %v8778_v22 }
 0x824   : > { %7470 = vmatprep.subr.mxu1 %v5909_v19 }
 0x825   : > { %v5667_v15 = vpop.trf.xlu1 }
 0x826   : > { %7460 = vmatprep.mubr.msk.f32.mxu1 %vm572_vm1, %v5667_v15 }
 0x829   : > { %v5668_v63 = vpop.trf.xlu1 }
 0x82a   : > { %7461 = vmatmul.mubr.msk.f32.vlgmr.msra.gmra.mrb[50].mxu1 %vm572_vm1, %v5668_v63 }
 0x82b   : > { %7471 = vmatpush3.msra.mxu1 %v5909_v19 }
 0x82c   : > { %7482 = vmatprep.subr.mxu1 %v6134_v9 }
 0x82d   : > { %v5892_v2 = vpop.trf.xlu1 }
 0x82e   : > { %7472 = vmatprep.mubr.msk.f32.mxu1 %vm572_vm1, %v5892_v2 }
 0x831   : > { %v5893_v14 = vpop.trf.xlu1 }
 0x832   : > { %7473 = vmatmul.mubr.msk.f32.vlgmr.msra.gmra.mrb[52].mxu1 %vm572_vm1, %v5893_v14 }
 0x833   : > { %7483 = vmatpush3.msra.mxu1 %v6134_v9 }
 0x834   : > { %7494 = vmatprep.subr.mxu1 %v6359_v31 }
 0x835   : > { %v6117_v3 = vpop.trf.xlu1 }
 0x836   : > { %7484 = vmatprep.mubr.msk.f32.mxu1 %vm572_vm1, %v6117_v3 }
 0x839   : > { %v6118_v59 = vpop.trf.xlu1 }
 0x83a   : > { %7485 = vmatmul.mubr.msk.f32.vlgmr.msra.gmra.mrb[54].mxu1 %vm572_vm1, %v6118_v59 }
 0x83b   : > { %7495 = vmatpush3.msra.mxu1 %v6359_v31 }
 0x83d   : > { %v6342_v1 = vpop.trf.xlu1 }
 0x83e   : > { %7496 = vmatprep.mubr.msk.f32.mxu1 %vm572_vm1, %v6342_v1 }
 0x841   : > { %v6343_v0 = vpop.trf.xlu1 }
 0x842   : > { %7497 = vmatmul.mubr.msk.f32.vlgmr.msra.gmra.mrb[56].mxu1 %vm572_vm1, %v6343_v0 }
 0x845   : > { %v7751_v29 = vpop.permute.xlu1 %7750 }
 0x846   : > { %v7753_v22 = vunpack.i.h.bf16 %v7751_v29  ;;  %v7752_v46 = vunpack.i.l.bf16 %v7751_v29 }
 0x848   : > { %v4534_v54 = vsel %vm2457_vm2, %v4532_v48, %v7752_v46  ;;  %v4535_v25 = vsel %vm2457_vm2, %v4533_v33, %v7753_v22 }
 0x849   : > { %v4536_v21 = vsel %vm2460_vm3, %v4534_v54, %v7757_v41  ;;  %v4537_v8 = vsel %vm2460_vm3, %v4535_v25, %v7758_v40 }
 0x84a   : > { %v4538_v31 = vsel %vm2463_vm4, %v4536_v21, %v7762_v23  ;;  %v4539_v32 = vsel %vm2463_vm4, %v4537_v8, %v7763_v20 }
 0x84b   : > { %v4540_v30 = vsel %vm2466_vm5, %v4538_v31, %v7767_v27  ;;  %v4541_v19 = vsel %vm2466_vm5, %v4539_v32, %v7768_v51  ;;  %v8885_v31 = vld [vmem:[%s9135_s4 + $0x20] sm:$0xff]  ;;  %v8890_v32 = vld [vmem:[%s9135_s4 + $0x28] sm:$0xff] }
 0x84c   : > { %v4542_v7 = vsel %vm2469_vm6, %v4540_v30, %v7772_v42  ;;  %v4543_v9 = vsel %vm2469_vm6, %v4541_v19, %v7773_v44 }
 0x84d   : > { %v4544_v10 = vsel %vm2472_vm7, %v4542_v7, %v7777_v62  ;;  %v4545_v5 = vsel %vm2472_vm7, %v4543_v9, %v7778_v43 }
 0x84e   : > { %v7596_v47 = vpack.c.bf16 %v4545_v5, %v4544_v10 }
 0x850   : > { %7597 = vmatprep.subr.bf16.mxu0 %v7596_v47 }
 0x851   : > { %7599 = vmatpush3.bf16.msra.mxu0 %v7596_v47 }
 0x854   : > { %7398 = vmatmul.mubr.msk.f32.vlgmr.msra.gmra.mrb[18].mxu0 %vm345_vm0, %v6904_v53 }
 0x855   : > { %7400 = vmatprep.mubr.msk.f32.mxu0 %vm345_vm0, %v6905_v24 }
 0x858   : > { %7401 = vmatmul.mubr.msk.f32.gmra.mrb[20].mxu0 %vm345_vm0, %v6906_v56 }
 0x859   : > { %7419 = vmatprep.mubr.msk.f32.mxu0 %vm345_vm0, %v7960_v39 }
 0x8a8   : > { %v7414_v58 = vpop.f32.mrb[42].mxu1 }
 0x8a9   : > { %v4866_v28 = vmul.f32 0.125, %v7414_v58  ;;  %v4856_v15 = vpop.f32.mrb[43].mxu1 }
 0x8aa   : > { %v4865_v63 = vmul.f32 0.125, %v4856_v15 }
 0x8ab   : > { %v4868_v2 = vsel %vm345_vm0, %v4866_v28, -inf }
 0x8ac   : > { %v4867_v14 = vsel %vm345_vm0, %v4865_v63, -inf }
 0x8ad   : > { %v4869_v3 = vmax.f32 %v4867_v14, %v4868_v2 }
 0x8af   : > { %v4870_v59 = vrot.slane %v4869_v3, 4 }
 0x8b1   : > { %v4871_v1 = vmax.f32 %v4869_v3, %v4870_v59 }
 0x8b3   : > { %v4872_v0 = vrot.slane %v4871_v1, 2 }
 0x8b5   : > { %v4873_v57 = vmax.f32 %v4871_v1, %v4872_v0 }
 0x8b7   : > { %v4874_v4 = vrot.slane %v4873_v57, 1 }
 0x8b9   : > { %v4875_v29 = vmax.f32 %v4873_v57, %v4874_v4 }
 0x8bb   : > { %v4876_v22 = vsub.f32 %v4865_v63, %v4875_v29  ;;  %v4877_v46 = vsub.f32 %v4866_v28, %v4875_v29 }
 0x8bd   : > { %v4878_v33 = vmul.f32 1.442695, %v4876_v22  ;;  %v4880_v48 = vmul.f32 1.442695, %v4877_v46 }
 0x8bf   : > { %7910 = vpow2.f32 %v4878_v33 }
 0x8c0   : > { %7912 = vpow2.f32 %v4880_v48 }
 0x8c9   : > { %v7911_v40 = vpop.eup %7910 }
 0x8ca   : > { %v7913_v41 = vpop.eup %7912  ;;  %v4882_v20 = vsel %vm345_vm0, %v7911_v40, 0.0 }
 0x8cb   : > { %v4883_v23 = vsel %vm345_vm0, %v7913_v41, 0.0 }
 0x8cc   : > { %v4884_v54 = vadd.f32 %v4883_v23, %v4882_v20 }
 0x8ce   : > { %v4885_v25 = vrot.slane %v4884_v54, 4 }
 0x8d0   : > { %v4886_v51 = vadd.f32 %v4885_v25, %v4884_v54 }
 0x8d2   : > { %v4887_v27 = vrot.slane %v4886_v51, 2 }
 0x8d4   : > { %v4888_v21 = vadd.f32 %v4887_v27, %v4886_v51 }
 0x8d6   : > { %v4889_v8 = vrot.slane %v4888_v21, 1 }
 0x8d8   : > { %v4890_v44 = vadd.f32 %v4889_v8, %v4888_v21 }
 0x8da   : > { %7914 = vrcp.f32 %v4890_v44 }
 0x8e4   : > { %v7915_v42 = vpop.eup %7914 }
 0x8e5   : > { %v7426_v43 = vpop.f32.mrb[44].mxu1  ;;  %v4892_v62 = vmul.f32 %v7915_v42, %v7911_v40  ;;  %v4893_v30 = vmul.f32 %v7915_v42, %v7913_v41 }
 0x8e6   : > { %v5093_v19 = vmul.f32 0.125, %v7426_v43  ;;  %v5083_v7 = vpop.f32.mrb[45].mxu1 }
 0x8e7   : > { %v5092_v9 = vmul.f32 0.125, %v5083_v7  ;;  %v4894_v10 = vadd.f32 %v8885_v31, %v4892_v62  ;;  %v4895_v5 = vadd.f32 %v8890_v32, %v4893_v30 }
 0x8e8   : > { %v5095_v47 = vsel %vm345_vm0, %v5093_v19, -inf }
 0x8e9   : > { %v5094_v60 = vsel %vm345_vm0, %v5092_v9, -inf  ;;  %v7604_v53 = vpack.c.bf16 %v4895_v5, %v4894_v10 }
 0x8ea   : > { %v5096_v24 = vmax.f32 %v5094_v60, %v5095_v47 }
 0x8eb   : > { %7605 = vmatprep.subr.bf16.mxu0 %v7604_v53 }
 0x8ec   : > { %v5097_v56 = vrot.slane %v5096_v24, 4  ;;  %7607 = vmatpush3.bf16.msra.mxu0 %v7604_v53 }
 0x8ed   : > { %v7438_v39 = vpop.f32.mrb[46].mxu1 }
 0x8ee   : > { %v5098_v58 = vmax.f32 %v5096_v24, %v5097_v56  ;;  %v5318_v28 = vmul.f32 0.125, %v7438_v39  ;;  %v5308_v15 = vpop.f32.mrb[47].mxu1 }
 0x8ef   : > { %7420 = vmatmul.mubr.msk.f32.vlgmr.msra.gmra.mrb[36].mxu0 %vm345_vm0, %v8683_v12  ;;  %v5317_v63 = vmul.f32 0.125, %v5308_v15 }
 0x8f0   : > { %v5099_v2 = vrot.slane %v5098_v58, 2  ;;  %v5320_v14 = vsel %vm345_vm0, %v5318_v28, -inf  ;;  %7431 = vmatprep.mubr.msk.f32.mxu0 %vm345_vm0, %v8285_v36 }
 0x8f1   : > { %v5319_v3 = vsel %vm345_vm0, %v5317_v63, -inf }
 0x8f2   : > { %v5100_v59 = vmax.f32 %v5098_v58, %v5099_v2  ;;  %v5321_v1 = vmax.f32 %v5319_v3, %v5320_v14 }
 0x8f4   : > { %v5101_v0 = vrot.slane %v5100_v59, 1  ;;  %v5322_v57 = vrot.slane %v5321_v1, 4 }
 0x8f5   : > { %v7450_v4 = vpop.f32.mrb[48].mxu1 }
 0x8f6   : > { %v5102_v29 = vmax.f32 %v5100_v59, %v5101_v0  ;;  %v5323_v22 = vmax.f32 %v5321_v1, %v5322_v57  ;;  %v5543_v46 = vmul.f32 0.125, %v7450_v4  ;;  %v5533_v33 = vpop.f32.mrb[49].mxu1 }
 0x8f7   : > { %v5542_v48 = vmul.f32 0.125, %v5533_v33 }
 0x8f8   : > { %v5103_v12 = vsub.f32 %v5092_v9, %v5102_v29  ;;  %v5104_v40 = vsub.f32 %v5093_v19, %v5102_v29  ;;  %v5324_v41 = vrot.slane %v5323_v22, 2  ;;  %v5545_v20 = vsel %vm345_vm0, %v5543_v46, -inf }
 0x8f9   : > { %v5544_v23 = vsel %vm345_vm0, %v5542_v48, -inf }
 0x8fa   : > { %v5105_v36 = vmul.f32 1.442695, %v5103_v12  ;;  %v5107_v54 = vmul.f32 1.442695, %v5104_v40  ;;  %v5325_v25 = vmax.f32 %v5323_v22, %v5324_v41  ;;  %v5546_v51 = vmax.f32 %v5544_v23, %v5545_v20 }
 0x8fc   : > { %7916 = vpow2.f32 %v5105_v36  ;;  %v5326_v27 = vrot.slane %v5325_v25, 1  ;;  %v5547_v21 = vrot.slane %v5546_v51, 4 }
 0x8fd   : > { %7918 = vpow2.f32 %v5107_v54  ;;  %v7462_v8 = vpop.f32.mrb[50].mxu1 }
 0x8fe   : > { %v5327_v44 = vmax.f32 %v5325_v25, %v5326_v27  ;;  %v5548_v42 = vmax.f32 %v5546_v51, %v5547_v21  ;;  %v5768_v43 = vmul.f32 0.125, %v7462_v8  ;;  %v5758_v62 = vpop.f32.mrb[51].mxu1 }
 0x8ff   : > { %v5767_v30 = vmul.f32 0.125, %v5758_v62 }
 0x900   : > { %v5328_v19 = vsub.f32 %v5317_v63, %v5327_v44  ;;  %v5329_v7 = vsub.f32 %v5318_v28, %v5327_v44  ;;  %v5549_v9 = vrot.slane %v5548_v42, 2  ;;  %v5770_v10 = vsel %vm345_vm0, %v5768_v43, -inf }
 0x901   : > { %v5769_v5 = vsel %vm345_vm0, %v5767_v30, -inf }
 0x902   : > { %v5330_v47 = vmul.f32 1.442695, %v5328_v19  ;;  %v5332_v60 = vmul.f32 1.442695, %v5329_v7  ;;  %v5550_v53 = vmax.f32 %v5548_v42, %v5549_v9  ;;  %v5771_v24 = vmax.f32 %v5769_v5, %v5770_v10 }
 0x904   : > { %7920 = vpow2.f32 %v5330_v47  ;;  %v5551_v56 = vrot.slane %v5550_v53, 1  ;;  %v5772_v39 = vrot.slane %v5771_v24, 4 }
 0x905   : > { %7922 = vpow2.f32 %v5332_v60  ;;  %v7474_v58 = vpop.f32.mrb[52].mxu1 }
 0x906   : > { %v8906_v15 = vpop.eup %7916  ;;  %v5552_v2 = vmax.f32 %v5550_v53, %v5551_v56  ;;  %v5773_v14 = vmax.f32 %v5771_v24, %v5772_v39  ;;  %v8908_v63 = vmul.f32 0.125, %v7474_v58  ;;  %v5983_v28 = vpop.f32.mrb[53].mxu1 }
 0x907   : > { %v8910_v3 = vpop.eup %7918  ;;  %v5109_v59 = vsel %vm345_vm0, %v8906_v15, 0.0  ;;  %v8914_v1 = vmul.f32 0.125, %v5983_v28 }
 0x908   : > { %v5110_v0 = vsel %vm345_vm0, %v8910_v3, 0.0  ;;  %v5553_v57 = vsub.f32 %v5542_v48, %v5552_v2  ;;  %v5554_v4 = vsub.f32 %v5543_v46, %v5552_v2  ;;  %v5774_v29 = vrot.slane %v5773_v14, 2 }
 0x909   : > { %v5111_v22 = vadd.f32 %v5110_v0, %v5109_v59  ;;  %v5995_v33 = vsel %vm345_vm0, %v8908_v63, -inf  ;;  %v5994_v12 = vsel %vm345_vm0, %v8914_v1, -inf }
 0x90a   : > { %v5555_v40 = vmul.f32 1.442695, %v5553_v57  ;;  %v5557_v41 = vmul.f32 1.442695, %v5554_v4  ;;  %v5775_v20 = vmax.f32 %v5773_v14, %v5774_v29  ;;  %v5996_v23 = vmax.f32 %v5994_v12, %v5995_v33 }
 0x90b   : > { %v5112_v36 = vrot.slane %v5111_v22, 4 }
 0x90c   : > { %7924 = vpow2.f32 %v5555_v40  ;;  %v5776_v54 = vrot.slane %v5775_v20, 1  ;;  %v5997_v25 = vrot.slane %v5996_v23, 4 }
 0x90d   : > { %v5113_v51 = vadd.f32 %v5112_v36, %v5111_v22  ;;  %7926 = vpow2.f32 %v5557_v41  ;;  %v7486_v48 = vpop.f32.mrb[54].mxu1 }
 0x90e   : > { %v8922_v46 = vpop.eup %7920  ;;  %v5777_v27 = vmax.f32 %v5775_v20, %v5776_v54  ;;  %v5998_v21 = vmax.f32 %v5996_v23, %v5997_v25  ;;  %v8924_v8 = vmul.f32 0.125, %v7486_v48  ;;  %v6208_v44 = vpop.f32.mrb[55].mxu1 }
 0x90f   : > { %v8926_v42 = vpop.eup %7922  ;;  %v5114_v62 = vrot.slane %v5113_v51, 2  ;;  %v5334_v19 = vsel %vm345_vm0, %v8922_v46, 0.0  ;;  %v8930_v7 = vmul.f32 0.125, %v6208_v44 }
 0x910   : > { %v5335_v9 = vsel %vm345_vm0, %v8926_v42, 0.0  ;;  %v5778_v10 = vsub.f32 %v5767_v30, %v5777_v27  ;;  %v5779_v5 = vsub.f32 %v5768_v43, %v5777_v27  ;;  %v5999_v47 = vrot.slane %v5998_v21, 2 }
 0x911   : > { %v5115_v60 = vadd.f32 %v5114_v62, %v5113_v51  ;;  %v5336_v53 = vadd.f32 %v5335_v9, %v5334_v19  ;;  %v6220_v24 = vsel %vm345_vm0, %v8924_v8, -inf  ;;  %v6219_v56 = vsel %vm345_vm0, %v8930_v7, -inf }
 0x912   : > { %v5780_v39 = vmul.f32 1.442695, %v5778_v10  ;;  %v5782_v58 = vmul.f32 1.442695, %v5779_v5  ;;  %v6000_v2 = vmax.f32 %v5998_v21, %v5999_v47  ;;  %v6221_v14 = vmax.f32 %v6219_v56, %v6220_v24 }
 0x913   : > { %v5337_v28 = vrot.slane %v5336_v53, 4  ;;  %v5116_v59 = vrot.slane %v5115_v60, 1 }
 0x914   : > { %7928 = vpow2.f32 %v5780_v39  ;;  %v6001_v0 = vrot.slane %v6000_v2, 1  ;;  %v6222_v57 = vrot.slane %v6221_v14, 4 }
 0x915   : > { %v5338_v30 = vadd.f32 %v5337_v28, %v5336_v53  ;;  %7930 = vpow2.f32 %v5782_v58  ;;  %v7498_v43 = vpop.f32.mrb[56].mxu1  ;;  %v5117_v4 = vadd.f32 %v5116_v59, %v5115_v60 }
 0x916   : > { %v8938_v29 = vpop.eup %7924  ;;  %v6002_v22 = vmax.f32 %v6000_v2, %v6001_v0  ;;  %v6223_v33 = vmax.f32 %v6221_v14, %v6222_v57  ;;  %v8940_v12 = vmul.f32 0.125, %v7498_v43  ;;  %v6433_v40 = vpop.f32.mrb[57].mxu1 }
 0x917   : > { %v8942_v41 = vpop.eup %7926  ;;  %v5339_v20 = vrot.slane %v5338_v30, 2  ;;  %v5559_v23 = vsel %vm345_vm0, %v8938_v29, 0.0  ;;  %v8946_v36 = vmul.f32 0.125, %v6433_v40  ;;  %7932 = vrcp.f32 %v5117_v4 }
 0x918   : > { %v5560_v54 = vsel %vm345_vm0, %v8942_v41, 0.0  ;;  %v6003_v25 = vsub.f32 %v8914_v1, %v6002_v22  ;;  %v6004_v51 = vsub.f32 %v8908_v63, %v6002_v22  ;;  %v6224_v48 = vrot.slane %v6223_v33, 2 }
 0x919   : > { %v5340_v27 = vadd.f32 %v5339_v20, %v5338_v30  ;;  %v5561_v21 = vadd.f32 %v5560_v54, %v5559_v23  ;;  %v6445_v44 = vsel %vm345_vm0, %v8940_v12, -inf  ;;  %v6444_v62 = vsel %vm345_vm0, %v8946_v36, -inf }
 0x91a   : > { %v6005_v19 = vmul.f32 1.442695, %v6003_v25  ;;  %v6007_v9 = vmul.f32 1.442695, %v6004_v51  ;;  %v6225_v10 = vmax.f32 %v6223_v33, %v6224_v48  ;;  %v6446_v5 = vmax.f32 %v6444_v62, %v6445_v44 }
 0x91b   : > { %v5562_v47 = vrot.slane %v5561_v21, 4  ;;  %v5341_v60 = vrot.slane %v5340_v27, 1 }
 0x91c   : > { %7934 = vpow2.f32 %v6005_v19  ;;  %v6226_v53 = vrot.slane %v6225_v10, 1  ;;  %v6447_v1 = vrot.slane %v6446_v5, 4 }
 0x91d   : > { %v5563_v24 = vadd.f32 %v5562_v47, %v5561_v21  ;;  %7936 = vpow2.f32 %v6007_v9  ;;  %v5342_v63 = vadd.f32 %v5341_v60, %v5340_v27 }
 0x91e   : > { %v8956_v56 = vpop.eup %7928  ;;  %v6227_v39 = vmax.f32 %v6225_v10, %v6226_v53  ;;  %v6448_v58 = vmax.f32 %v6446_v5, %v6447_v1 }
 0x91f   : > { %v8958_v2 = vpop.eup %7930  ;;  %v5564_v14 = vrot.slane %v5563_v24, 2  ;;  %v5784_v28 = vsel %vm345_vm0, %v8956_v56, 0.0  ;;  %7938 = vrcp.f32 %v5342_v63 }
 0x920   : > { %v5785_v59 = vsel %vm345_vm0, %v8958_v2, 0.0  ;;  %v6228_v0 = vsub.f32 %v8930_v7, %v6227_v39  ;;  %v6229_v57 = vsub.f32 %v8924_v8, %v6227_v39  ;;  %v6449_v30 = vrot.slane %v6448_v58, 2 }
 0x921   : > { %v7933_v43 = vpop.eup %7932  ;;  %v5565_v4 = vadd.f32 %v5564_v14, %v5563_v24  ;;  %v5786_v22 = vadd.f32 %v5785_v59, %v5784_v28 }
 0x922   : > { %v6230_v33 = vmul.f32 1.442695, %v6228_v0  ;;  %v6232_v40 = vmul.f32 1.442695, %v6229_v57  ;;  %v6450_v20 = vmax.f32 %v6448_v58, %v6449_v30  ;;  %v5119_v23 = vmul.f32 %v7933_v43, %v8906_v15 }
 0x923   : > { %v5787_v54 = vrot.slane %v5786_v22, 4  ;;  %v5120_v25 = vmul.f32 %v7933_v43, %v8910_v3  ;;  %v5566_v51 = vrot.slane %v5565_v4, 1 }
 0x924   : > { %7940 = vpow2.f32 %v6230_v33  ;;  %v6451_v48 = vrot.slane %v6450_v20, 1  ;;  %v5121_v27 = vadd.f32 %v8885_v31, %v5119_v23 }
 0x925   : > { %v5788_v7 = vadd.f32 %v5787_v54, %v5786_v22  ;;  %7942 = vpow2.f32 %v6232_v40  ;;  %v5122_v8 = vadd.f32 %v8890_v32, %v5120_v25  ;;  %v5567_v21 = vadd.f32 %v5566_v51, %v5565_v4 }
 0x926   : > { %v8970_v44 = vpop.eup %7934  ;;  %v6452_v62 = vmax.f32 %v6450_v20, %v6451_v48 }
 0x927   : > { %v8972_v19 = vpop.eup %7936  ;;  %v5789_v9 = vrot.slane %v5788_v7, 2  ;;  %v6009_v15 = vsel %vm345_vm0, %v8970_v44, 0.0  ;;  %v7608_v3 = vpack.c.bf16 %v5122_v8, %v5121_v27  ;;  %7944 = vrcp.f32 %v5567_v21 }
 0x928   : > { %v6010_v10 = vsel %vm345_vm0, %v8972_v19, 0.0  ;;  %v6453_v5 = vsub.f32 %v8946_v36, %v6452_v62  ;;  %v6454_v47 = vsub.f32 %v8940_v12, %v6452_v62 }
 0x929   : > { %v7939_v60 = vpop.eup %7938  ;;  %v5790_v53 = vadd.f32 %v5789_v9, %v5788_v7  ;;  %v6011_v1 = vadd.f32 %v6010_v10, %v6009_v15  ;;  %7609 = vmatprep.subr.bf16.mxu0 %v7608_v3 }
 0x92a   : > { %v6455_v24 = vmul.f32 1.442695, %v6453_v5  ;;  %v6457_v63 = vmul.f32 1.442695, %v6454_v47  ;;  %7611 = vmatpush3.bf16.msra.mxu0 %v7608_v3  ;;  %v5344_v39 = vmul.f32 %v7939_v60, %v8922_v46  ;;  %v5345_v58 = vmul.f32 %v7939_v60, %v8926_v42 }
 0x92b   : > { %v6012_v14 = vrot.slane %v6011_v1, 4  ;;  %v5791_v28 = vrot.slane %v5790_v53, 1 }
 0x92c   : > { %7946 = vpow2.f32 %v6455_v24  ;;  %v5346_v59 = vadd.f32 %v8885_v31, %v5344_v39  ;;  %v5347_v36 = vadd.f32 %v8890_v32, %v5345_v58 }
 0x92d   : > { %v6013_v0 = vadd.f32 %v6012_v14, %v6011_v1  ;;  %7948 = vpow2.f32 %v6457_v63  ;;  %7432 = vmatmul.mubr.msk.f32.vlgmr.msra.gmra.mrb[38].mxu0 %vm345_vm0, %v8323_v50  ;;  %v5792_v12 = vadd.f32 %v5791_v28, %v5790_v53 }
 0x92e   : > { %v8986_v57 = vpop.eup %7940  ;;  %7443 = vmatprep.mubr.msk.f32.mxu0 %vm345_vm0, %v8291_v37  ;;  %v7612_v46 = vpack.c.bf16 %v5347_v36, %v5346_v59 }
 0x92f   : > { %v8990_v42 = vpop.eup %7942  ;;  %v6014_v30 = vrot.slane %v6013_v0, 2  ;;  %v6234_v43 = vsel %vm345_vm0, %v8986_v57, 0.0  ;;  %7950 = vrcp.f32 %v5792_v12 }
 0x930   : > { %v6235_v4 = vsel %vm345_vm0, %v8990_v42, 0.0  ;;  %7613 = vmatprep.subr.bf16.mxu0 %v7612_v46 }
 0x931   : > { %v7945_v22 = vpop.eup %7944  ;;  %v6015_v50 = vadd.f32 %v6014_v30, %v6013_v0  ;;  %v6236_v33 = vadd.f32 %v6235_v4, %v6234_v43  ;;  %7615 = vmatpush3.bf16.msra.mxu0 %v7612_v46 }
 0x932   : > { %v5569_v40 = vmul.f32 %v7945_v22, %v8938_v29  ;;  %v5570_v37 = vmul.f32 %v7945_v22, %v8942_v41 }
 0x933   : > { %v6237_v20 = vrot.slane %v6236_v33, 4  ;;  %v6016_v23 = vrot.slane %v6015_v50, 1 }
 0x934   : > { %7444 = vmatmul.mubr.msk.f32.vlgmr.msra.gmra.mrb[40].mxu0 %vm345_vm0, %v8293_v38  ;;  %v5571_v54 = vadd.f32 %v8885_v31, %v5569_v40  ;;  %v5572_v25 = vadd.f32 %v8890_v32, %v5570_v37 }
 0x935   : > { %v6238_v51 = vadd.f32 %v6237_v20, %v6236_v33  ;;  %7455 = vmatprep.mubr.msk.f32.mxu0 %vm345_vm0, %v8297_v45  ;;  %v6017_v48 = vadd.f32 %v6016_v23, %v6015_v50 }
 0x936   : > { %v7947_v27 = vpop.eup %7946  ;;  %v7616_v7 = vpack.c.bf16 %v5572_v25, %v5571_v54 }
 0x937   : > { %v7949_v8 = vpop.eup %7948  ;;  %v6239_v29 = vrot.slane %v6238_v51, 2  ;;  %v6459_v41 = vsel %vm345_vm0, %v7947_v27, 0.0  ;;  %7952 = vrcp.f32 %v6017_v48 }
 0x938   : > { %v6460_v21 = vsel %vm345_vm0, %v7949_v8, 0.0  ;;  %7617 = vmatprep.subr.bf16.mxu0 %v7616_v7 }
 0x939   : > { %v7951_v38 = vpop.eup %7950  ;;  %v6240_v62 = vadd.f32 %v6239_v29, %v6238_v51  ;;  %v6461_v9 = vadd.f32 %v6460_v21, %v6459_v41  ;;  %7619 = vmatpush3.bf16.msra.mxu0 %v7616_v7  ;;  %v338_v41 = vpop.permute.xlu0 %337 }
 0x93a   : > { %v5794_v15 = vmul.f32 %v7951_v38, %v8956_v56  ;;  %v5795_v3 = vmul.f32 %v7951_v38, %v8958_v2  ;;  %v343_v21 = vpop.permute.xlu1 %342 }
 0x93b   : > { %v6462_v45 = vrot.slane %v6461_v9, 4  ;;  %v6241_v10 = vrot.slane %v6240_v62, 1 }
 0x93c   : > { %7456 = vmatmul.mubr.msk.f32.vlgmr.msra.gmra.mrb[42].mxu0 %vm345_vm0, %v8299_v52  ;;  %v5796_v5 = vadd.f32 %v8885_v31, %v5794_v15  ;;  %v5797_v47 = vadd.f32 %v8890_v32, %v5795_v3 }
 0x93d   : > { %v6463_v60 = vadd.f32 %v6462_v45, %v6461_v9  ;;  %7467 = vmatprep.mubr.msk.f32.mxu0 %vm345_vm0, %v8303_v61  ;;  %v6242_v53 = vadd.f32 %v6241_v10, %v6240_v62 }
 0x93e   : > { %v7620_v1 = vpack.c.bf16 %v5797_v47, %v5796_v5 }
 0x93f   : > { %v6464_v24 = vrot.slane %v6463_v60, 2  ;;  %7954 = vrcp.f32 %v6242_v53 }
 0x940   : > { %7621 = vmatprep.subr.bf16.mxu0 %v7620_v1 }
 0x941   : > { %v7953_v56 = vpop.eup %7952  ;;  %v6465_v2 = vadd.f32 %v6464_v24, %v6463_v60  ;;  %7623 = vmatpush3.bf16.msra.mxu0 %v7620_v1 }
 0x942   : > { %v6019_v63 = vmul.f32 %v7953_v56, %v8970_v44  ;;  %v6020_v52 = vmul.f32 %v7953_v56, %v8972_v19 }
 0x943   : > { %v6466_v39 = vrot.slane %v6465_v2, 1 }
 0x944   : > { %7468 = vmatmul.mubr.msk.f32.vlgmr.msra.gmra.mrb[44].mxu0 %vm345_vm0, %v8307_v16  ;;  %v6021_v58 = vadd.f32 %v8885_v31, %v6019_v63  ;;  %v6022_v61 = vadd.f32 %v8890_v32, %v6020_v52 }
 0x945   : > { %7479 = vmatprep.mubr.msk.f32.mxu0 %vm345_vm0, %v8317_v34  ;;  %v6467_v14 = vadd.f32 %v6466_v39, %v6465_v2 }
 0x946   : > { %v7624_v28 = vpack.c.bf16 %v6022_v61, %v6021_v58 }
 0x947   : > { %7956 = vrcp.f32 %v6467_v14 }
 0x948   : > { %7625 = vmatprep.subr.bf16.mxu0 %v7624_v28 }
 0x949   : > { %v7955_v59 = vpop.eup %7954  ;;  %7627 = vmatpush3.bf16.msra.mxu0 %v7624_v28 }
 0x94a   : > { %v6244_v44 = vmul.f32 %v7955_v59, %v8986_v57  ;;  %v6245_v19 = vmul.f32 %v7955_v59, %v8990_v42 }
 0x94c   : > { %7480 = vmatmul.mubr.msk.f32.vlgmr.msra.gmra.mrb[46].mxu0 %vm345_vm0, %v8331_v55  ;;  %v6246_v16 = vadd.f32 %v8885_v31, %v6244_v44  ;;  %v6247_v36 = vadd.f32 %v8890_v32, %v6245_v19 }
 0x94d   : > { %7491 = vmatprep.mubr.msk.f32.mxu0 %vm345_vm0, %v8339_v11 }
 0x94e   : > { %v7628_v34 = vpack.c.bf16 %v6247_v36, %v6246_v16 }
 0x950   : > { %7629 = vmatprep.subr.bf16.mxu0 %v7628_v34 }
 0x951   : > { %v7957_v0 = vpop.eup %7956  ;;  %7631 = vmatpush3.bf16.msra.mxu0 %v7628_v34 }
 0x952   : > { %v6469_v12 = vmul.f32 %v7957_v0, %v7947_v27  ;;  %v6470_v46 = vmul.f32 %v7957_v0, %v7949_v8  ;;  %v6951_v27 = vld [vmem:[%s9134_s3 + $0x40] sm:$0xff] }
 0x954   : > { %7492 = vmatmul.mubr.msk.f32.vlgmr.msra.gmra.mrb[48].mxu0 %vm345_vm0, %v8343_v13  ;;  %v6471_v57 = vadd.f32 %v8885_v31, %v6469_v12  ;;  %v6472_v55 = vadd.f32 %v8890_v32, %v6470_v46 }
 0x955   : > { %7503 = vmatprep.mubr.msk.f32.mxu0 %vm345_vm0, %v8361_v49 }
 0x956   : > { %v7632_v42 = vpack.c.bf16 %v6472_v55, %v6471_v57 }
 0x958   : > { %7633 = vmatprep.subr.bf16.mxu0 %v7632_v42 }
 0x959   : > { %7635 = vmatpush3.bf16.msra.mxu0 %v7632_v42 }
 0x95c   : > { %7504 = vmatmul.mubr.msk.f32.vlgmr.msra.gmra.mrb[50].mxu0 %vm345_vm0, %v8363_v26 }
 0x95d   : > { %7510 = vmatprep.mubr.msk.f32.mxu0 %vm345_vm0, %v6951_v27 }
 0x9c2   : > { %v7421_v11 = vpop.f32.mrb[36].mxu0 }
 0x9c3   : > { %v4962_v30 = vpop.f32.mrb[37].mxu0 }
 0xa00   : > { %v7433_v43 = vpop.f32.mrb[38].mxu0 }
 0xa01   : > { %v5189_v4 = vpop.f32.mrb[39].mxu0 }
 0xa02   : > { %v7779_v22 = vpack.i.bf16 %v7433_v43, %v5189_v4  ;;  %v6952_v43 = vld [vmem:[%s9134_s3 + $0x48] sm:$0xff]  ;;  %v6953_v4 = vld [vmem:[%s9134_s3 + $0x50] sm:$0xff] }
 0xa04   : > { %7780 = vrot.lane.b32.xlu0 %v7779_v22, %s8032_s19  ;;  %s9144_s19 = smov 96   ;;  %v6954_v22 = vld [vmem:[%s9134_s3 + $0x58] sm:$0xff] }
 0xa07   : > { %v7445_v13 = vpop.f32.mrb[40].mxu0 }
 0xa08   : > { %v5414_v31 = vpop.f32.mrb[41].mxu0 }
 0xa09   : > { %v7784_v50 = vpack.i.bf16 %v7445_v13, %v5414_v31 }
 0xa0b   : > { %7785 = vrot.lane.b32.xlu1 %v7784_v50, %s8031_s18 }
 0xa0f   : > { %v7457_v32 = vpop.f32.mrb[42].mxu0 }
 0xa10   : > { %v5639_v49 = vpop.f32.mrb[43].mxu0 }
 0xa11   : > { %v7789_v33 = vpack.i.bf16 %v7457_v32, %v5639_v49  ;;  %v440_v49 = vadd.f32 %v8188_v17, %v343_v21 }
 0xa13   : > { %7790 = vrot.lane.b32.xlu0 %v7789_v33, %s8030_s17  ;;  %s7961_s17 = scalar_lea.vmem %s9082_s14, 512 }
 0xa14   : > { %p7962_p13 = scmp.ne.s32.totalorder %s9082_s14, %s7961_s17  ;;  %p7969_p3 = scmp.lt.s32.totalorder %s7967_s8, %s7961_s17 }
 0xa16   : > { %p7963_p0 = pnand %p7962_p13, %p8115_p6  ;;  %p7970_p4 = por %p7969_p3, %p7968_p2 }
 0xa17   : > { %v7469_v40 = vpop.f32.mrb[44].mxu0 }
 0xa18   : > { %v5864_v37 = vpop.f32.mrb[45].mxu0  ;;  %p7964_p1 = pneg %p7963_p0 }
 0xa19   : > { %v7794_v26 = vpack.i.bf16 %v7469_v40, %v5864_v37  ;;  %v435_v40 = vadd.f32 %v8190_v18, %v338_v41 }
 0xa1a   : > { %p7971_p5 = pnand %p7970_p4, %p7964_p1 }
 0xa1b   : > { %7795 = vrot.lane.b32.xlu1 %v7794_v26, %s8028_s15  ;;  %s9145_s15 = smov 112  }
 0xa1f   : > { %v7481_v20 = vpop.f32.mrb[46].mxu0 }
 0xa20   : > { %v6089_v23 = vpop.f32.mrb[47].mxu0 }
 0xa21   : > { %v7799_v54 = vpack.i.bf16 %v7481_v20, %v6089_v23 }
 0xa23   : > { %7800 = vrot.lane.b32.xlu0 %v7799_v54, %s8029_s16  ;;  %s6733_s16 = scalar_lea.sflag [#allocation4], %s8134_s20 }
 0xa27   : > { %v7493_v25 = vpop.f32.mrb[48].mxu0 }
 0xa28   : > { %v6314_v51 = vpop.f32.mrb[49].mxu0 }
 0xa29   : > { %v7804_v48 = vpack.i.bf16 %v7493_v25, %v6314_v51 }
 0xa2b   : > { %7805 = vrot.lane.b32.xlu1 %v7804_v48, %s9144_s19  ;;  %s6960_s19 = sshll.u32 %s9146_s22, 7 }
 0xa2f   : > { %v7505_v7 = vpop.f32.mrb[50].mxu0 }
 0xa30   : > { %v6539_v8 = vpop.f32.mrb[51].mxu0 }
 0xa31   : > { %v7809_v29 = vpack.i.bf16 %v7505_v7, %v6539_v8 }
 0xa33   : > { %7810 = vrot.lane.b32.xlu0 %v7809_v29, %s9145_s15  ;;  %s9087_s15 = scalar_lea.hbm %s9138_s7, %s6960_s19 }
 0xa76   : > { %v7781_v38 = vpop.permute.xlu0 %7780 }
 0xa77   : > { %v7783_v3 = vunpack.i.h.bf16 %v7781_v38  ;;  %v7782_v45 = vunpack.i.l.bf16 %v7781_v38 }
 0xa79   : > { %v6605_v2 = vsel %vm345_vm0, %v7421_v11, %v7783_v3  ;;  %v6604_v63 = vsel %vm345_vm0, %v4962_v30, %v7782_v45 }
 0xa7d   : > { %v7786_v62 = vpop.permute.xlu1 %7785 }
 0xa7e   : > { %v7788_v10 = vunpack.i.h.bf16 %v7786_v62  ;;  %v7787_v5 = vunpack.i.l.bf16 %v7786_v62 }
 0xa80   : > { %v6607_v58 = vsel %vm2457_vm2, %v6605_v2, %v7788_v10  ;;  %v6606_v61 = vsel %vm2457_vm2, %v6604_v63, %v7787_v5 }
 0xa85   : > { %v7791_v9 = vpop.permute.xlu0 %7790 }
 0xa86   : > { %v7793_v60 = vunpack.i.h.bf16 %v7791_v9  ;;  %v7792_v53 = vunpack.i.l.bf16 %v7791_v9 }
 0xa88   : > { %v6609_v59 = vsel %vm2460_vm3, %v6607_v58, %v7793_v60  ;;  %v6608_v44 = vsel %vm2460_vm3, %v6606_v61, %v7792_v53 }
 0xa8d   : > { %v7796_v15 = vpop.permute.xlu1 %7795 }
 0xa8e   : > { %v7798_v24 = vunpack.i.h.bf16 %v7796_v15  ;;  %v7797_v56 = vunpack.i.l.bf16 %v7796_v15 }
 0xa90   : > { %v6611_v19 = vsel %vm2463_vm4, %v6609_v59, %v7798_v24  ;;  %v6610_v16 = vsel %vm2463_vm4, %v6608_v44, %v7797_v56 }
 0xa95   : > { %v7801_v47 = vpop.permute.xlu0 %7800 }
 0xa96   : > { %v7803_v52 = vunpack.i.h.bf16 %v7801_v47  ;;  %v7802_v39 = vunpack.i.l.bf16 %v7801_v47 }
 0xa98   : > { %v6613_v34 = vsel %vm2466_vm5, %v6611_v19, %v7803_v52  ;;  %v6612_v0 = vsel %vm2466_vm5, %v6610_v16, %v7802_v39 }
 0xa9d   : > { %v7806_v1 = vpop.permute.xlu1 %7805 }
 0xa9e   : > { %v7808_v14 = vunpack.i.h.bf16 %v7806_v1  ;;  %v7807_v28 = vunpack.i.l.bf16 %v7806_v1 }
 0xaa0   : > { %v6615_v57 = vsel %vm2469_vm6, %v6613_v34, %v7808_v14  ;;  %v6614_v55 = vsel %vm2469_vm6, %v6612_v0, %v7807_v28 }
 0xaa5   : > { %v7811_v36 = vpop.permute.xlu0 %7810 }
 0xaa6   : > { %v7813_v12 = vunpack.i.h.bf16 %v7811_v36  ;;  %v7812_v46 = vunpack.i.l.bf16 %v7811_v36 }
 0xaa8   : > { %v6616_v42 = vsel %vm2472_vm7, %v6614_v55, %v7812_v46  ;;  %v6617_v11 = vsel %vm2472_vm7, %v6615_v57, %v7813_v12 }
 0xaa9   : > { %v7636_v30 = vpack.c.bf16 %v6617_v11, %v6616_v42 }
 0xaab   : > { %7637 = vmatprep.subr.bf16.mxu0 %v7636_v30 }
 0xaac   : > { %7639 = vmatpush3.bf16.msra.mxu0 %v7636_v30 }
 0xaaf   : > { %7511 = vmatmul.mubr.msk.f32.vlgmr.msra.gmra.mrb[18].mxu0 %vm345_vm0, %v6952_v43 }
 0xab0   : > { %7513 = vmatprep.mubr.msk.f32.mxu0 %vm345_vm0, %v6953_v4 }
 0xab3   : > { %7514 = vmatmul.mubr.msk.f32.gmra.mrb[20].mxu0 %vm345_vm0, %v6954_v22 }
 0xb82   : > { %v7512_v13 = vpop.f32.mrb[18].mxu0 }
 0xb83   : > { %v7641_v31 = vadd.f32 %v7512_v13, %v8821_v35  ;;  %v6701_v50 = vpop.f32.mrb[19].mxu0 }
 0xb84   : > { %v7643_v32 = vadd.f32 %v6701_v50, %v8816_v6 }
 0xb85   : > { %v6725_v33 = vmax.f32 %v7641_v31, 0.0 }
 0xb86   : > { %v6724_v37 = vmax.f32 %v7643_v32, 0.0  ;;  %v7515_v26 = vpop.f32.mrb[20].mxu0 }
 0xb87   : > { %6729 = vst [vmem:[%s314_s13 + $0x8] sm:$0xff] %v6725_v33  ;;  %v7645_v20 = vadd.f32 %v7515_v26, %v440_v49  ;;  %v6711_v23 = vpop.f32.mrb[21].mxu0 }
 0xb88   : > { %6728 = vst [vmem:[%s314_s13] sm:$0xff] %v6724_v37  ;;  %v7647_v17 = vadd.f32 %v6711_v23, %v435_v40 }
 0xb89   : > { %v6727_v6 = vmax.f32 %v7645_v20, 0.0 }
 0xb8a   : > { %v6726_v18 = vmax.f32 %v7647_v17, 0.0 }
 0xb8b   : > { %6731 = vst [vmem:[%s314_s13 + $0x18] sm:$0xff] %v6727_v6 }
 0xb8c   : > { %6730 = vst [vmem:[%s314_s13 + $0x10] sm:$0xff] %v6726_v18 }
 0xb8d   : > { %7974 = shalt.err (!%p7971_p5)
}
 0xb8e   : > { %s7975_s21 = scalar_lea.hbm %s9087_s15, 512  ;;  %s7979_s22 = scalar_lea.hbm %s9138_s7, 1024 }
 0xb8f   : > { %p7976_p7 = scmp.ne.s32.totalorder %s9087_s15, %s7975_s21  ;;  %p7980_p12 = scmp.lt.u32.totalorder %s9087_s15, %s9138_s7 }
 0xb90   : > { %p7981_p13 = scmp.lt.u32.totalorder %s7979_s22, %s7975_s21  ;;  %p7983_p1 = scmp.lt.u32.totalorder %s7975_s21, %s9087_s15 }
 0xb91   : > { %p7977_p10 = pnand %p7976_p7, %p8115_p6 }
 0xb92   : > { %p7982_p0 = por %p7981_p13, %p7980_p12 }
 0xb93   : > { %p7978_p11 = pneg %p7977_p10 }
 0xb94   : > { %p7984_p2 = por %p7983_p1, %p7982_p0 }
 0xb96   : > { %p7985_p3 = pnand %p7984_p2, %p7978_p11 }
 0xb98   : > { %7988 = shalt.err (!%p7985_p3)
}
 0xb99   : > { %s8034_s23 = smov 128   ;;  %s8035_s17 = smov 256  }
 0xb9a   : > { %s8036_s28 = smov 8  }
 0xb9b   : > { %7656 = dma.vmem_to_hbm [thread:$0]  (%p8115_p6), %s9082_s14, 512, %s9087_s15, %s6733_s16, %s8034_s23, %s8035_s17, %s8036_s28  }
 0xb9c PF: > { %s6760_s29 = sand.u32 1, %s8011_s24   ;;  %p7659_p4 = pnand %p6815_p9, %p8119_p8 }
 0xb9d   : > { %s6761_s8 = scalar_lea.sflag [#allocation4], %s6760_s29 }
 0xb9e   : > { %8006 = dma.done.wait (!%p7659_p4), %s6761_s8, 512  }
 0xb9f   : > { %8008 = vsyncadd (!%p7659_p4), %s6761_s8, 4294966784  ;;  %p17_p5 = scmp.ge.s32.totalorder %s8100_s30, 4   ;;  %s9147_s24 = smov %s8015_s25 }
 0xba0   : > { %s9148_s25 = smov %s8019_s26  ;;  %s9149_s26 = smov %s8113_s10 }
 0xba1   : > { %s9150_s27 = smov %s8100_s30  ;;  %19 = sbr.rel (!%p17_p5) target bundleno = 3 (0x3), region = 134 }
 0xba8   :  { %6766 = vsyncpa [#allocation4], 1 }
 0xba9   :  { %6768 = vsyncpa [#allocation4 + $0x1], 1 }

</bundles_post_ra>
